<compile_context>
chip_gen: v5e
topology: v5e:2x2
jax: 0.10.0
libtpu: 0.0.40
codegen_flags: <defaults>
</compile_context>

<pallas_src>
import math
import functools

import jax
import jax.numpy as jnp
from jax.experimental import pallas as pl
from jax.experimental.pallas import tpu as pltpu  # noqa: F401  (TPU backend import)


def _tabfound_kernel(
    x_ref, w_in_ref, b_in_ref,
    g1_ref, g2_ref,
    w_q_ref, w_k_ref, w_v_ref, w_proj_ref,
    w1_ref, w2_ref, w3_ref,
    g_f_ref, w_head_ref, b_head_ref,
    o_ref,
    *, batch, seq, num_heads, num_blocks):
    BT = batch * seq
    H = num_heads
    C = w_in_ref.shape[1]
    D = C // H
    scale = 1.0 / math.sqrt(D)
    eps = jnp.float32(1e-6)
    neg_big = jnp.float32(-1e30)

    def rmsnorm(h, g):                       # h: (BT, C), g: (1, C)
        ms = jnp.mean(h * h, axis=-1, keepdims=True)
        return h * jax.lax.rsqrt(ms + eps) * g

    def to_heads(t):                         # (BT, C) -> (B*H, T, D), heads on batched axis
        return (t.reshape(batch, seq, H, D)
                 .transpose(0, 2, 1, 3)
                 .reshape(batch * H, seq, D))

    x = x_ref[...]                           # (BT, F)

    # input_layer: Linear(F -> C) with bias, one fat (B*T, F) @ (F, C) dot.
    h = jnp.dot(x, w_in_ref[...], preferred_element_type=jnp.float32) + b_in_ref[...]

    # Causal mask, broadcast over the (B*H) batched axis.
    row = jax.lax.broadcasted_iota(jnp.int32, (seq, seq), 0)
    col = jax.lax.broadcasted_iota(jnp.int32, (seq, seq), 1)
    causal = (col <= row)[None, :, :]        # (1, T, T)

    for blk in range(num_blocks):            # static unroll over the 3 attention blocks
        # ---------------- attention sub-block (pre-norm, residual) ----------------
        n1 = rmsnorm(h, g1_ref[blk])
        q = jnp.dot(n1, w_q_ref[blk], preferred_element_type=jnp.float32) * scale
        k = jnp.dot(n1, w_k_ref[blk], preferred_element_type=jnp.float32)
        v = jnp.dot(n1, w_v_ref[blk], preferred_element_type=jnp.float32)
        qh, kh, vh = to_heads(q), to_heads(k), to_heads(v)          # (B*H, T, D)

        # Batched scores: contract last dims directly (no k transpose materialized).
        s = jnp.einsum('bqd,bkd->bqk', qh, kh,
                       preferred_element_type=jnp.float32)          # (B*H, T, T)
        s = jnp.where(causal, s, neg_big)
        m = jnp.max(s, axis=-1, keepdims=True)
        p = jnp.exp(s - m)
        denom = jnp.sum(p, axis=-1, keepdims=True)
        p = p * pl.reciprocal(denom, approx=True)                   # EUP reciprocal
        oh = jnp.einsum('bqk,bkd->bqd', p, vh,
                        preferred_element_type=jnp.float32)         # (B*H, T, D)

        attn = (oh.reshape(batch, H, seq, D)
                  .transpose(0, 2, 1, 3)
                  .reshape(BT, C))                                  # head merge = layout only
        h = h + jnp.dot(attn, w_proj_ref[blk], preferred_element_type=jnp.float32)

        # ---------------- feed-forward sub-block (pre-norm, residual) -------------
        n2 = rmsnorm(h, g2_ref[blk])
        a = jnp.dot(n2, w1_ref[blk], preferred_element_type=jnp.float32)
        b = jnp.dot(n2, w3_ref[blk], preferred_element_type=jnp.float32)
        ff = jax.nn.silu(a) * b
        h = h + jnp.dot(ff, w2_ref[blk], preferred_element_type=jnp.float32)

    # ---------------- final norm + head + sigmoid ---------------------------------
    hn = rmsnorm(h, g_f_ref[...])
    logits = jnp.dot(hn, w_head_ref[...], preferred_element_type=jnp.float32) + b_head_ref[...]
    o_ref[...] = jax.nn.sigmoid(logits)


def tabfound_forward(x, params, num_heads):
    """x: (B, T, F) f32; params holds PyTorch-layout weights (out_features, in_features)."""
    B, T, F = x.shape
    C = params["w_in"].shape[0]
    NH = params["w_head"].shape[0]
    blocks = params["blocks"]
    nB = len(blocks)
    assert C % num_heads == 0

    # Flatten batch*seq into a fat M dimension; pre-transpose weights so kernel does x @ W.
    x_flat = x.reshape(B * T, F)
    w_in_t = params["w_in"].T                                      # (F, C)
    b_in = params["b_in"].reshape(1, C)

    w_q = jnp.stack([blk["w_attn"][0 * C:1 * C, :].T for blk in blocks])   # (nB, C, C)
    w_k = jnp.stack([blk["w_attn"][1 * C:2 * C, :].T for blk in blocks])
    w_v = jnp.stack([blk["w_attn"][2 * C:3 * C, :].T for blk in blocks])
    w_proj = jnp.stack([blk["w_proj"].T for blk in blocks])
    w1 = jnp.stack([blk["w1"].T for blk in blocks])
    w2 = jnp.stack([blk["w2"].T for blk in blocks])
    w3 = jnp.stack([blk["w3"].T for blk in blocks])
    g1 = jnp.stack([blk["g1"].reshape(1, C) for blk in blocks])    # (nB, 1, C)
    g2 = jnp.stack([blk["g2"].reshape(1, C) for blk in blocks])

    g_f = params["g_f"].reshape(1, C)
    w_head_t = params["w_head"].T                                  # (C, NH)
    b_head = params["b_head"].reshape(1, NH)

    kernel = functools.partial(_tabfound_kernel, batch=B, seq=T,
                               num_heads=num_heads, num_blocks=nB)

    # No grid: whole model in one kernel invocation, all operands resident in VMEM
    # (default whole-array blocks), so there is no per-grid-step pipeline overhead.
    out = pl.pallas_call(
        kernel,
        out_shape=jax.ShapeDtypeStruct((B * T, NH), jnp.float32),
    )(x_flat, w_in_t, b_in, g1, g2, w_q, w_k, w_v, w_proj,
      w1, w2, w3, g_f, w_head_t, b_head)
    return out.reshape(B, T, NH)


def _reference(x, params, num_heads):
    """Pure-JAX reference mirroring the PyTorch TabFound forward (eval mode)."""
    eps = 1e-6

    def rmsnorm(h, g):
        return h * jax.lax.rsqrt(jnp.mean(h * h, axis=-1, keepdims=True) + eps) * g

    h = x @ params["w_in"].T + params["b_in"]
    B, T, C = h.shape
    D = C // num_heads
    mask = jnp.tril(jnp.ones((T, T), dtype=bool))
    for blk in params["blocks"]:
        n1 = rmsnorm(h, blk["g1"])
        qkv = n1 @ blk["w_attn"].T
        q, k, v = jnp.split(qkv, 3, axis=-1)
        q = q.reshape(B, T, num_heads, D).transpose(0, 2, 1, 3)
        k = k.reshape(B, T, num_heads, D).transpose(0, 2, 1, 3)
        v = v.reshape(B, T, num_heads, D).transpose(0, 2, 1, 3)
        s = jnp.einsum("bhtd,bhsd->bhts", q, k) / math.sqrt(D)
        s = jnp.where(mask, s, -jnp.inf)
        p = jax.nn.softmax(s, axis=-1)
        o = jnp.einsum("bhts,bhsd->bhtd", p, v).transpose(0, 2, 1, 3).reshape(B, T, C)
        h = h + o @ blk["w_proj"].T
        n2 = rmsnorm(h, blk["g2"])
        ff = (jax.nn.silu(n2 @ blk["w1"].T) * (n2 @ blk["w3"].T)) @ blk["w2"].T
        h = h + ff
    hn = rmsnorm(h, params["g_f"])
    return jax.nn.sigmoid(hn @ params["w_head"].T + params["b_head"])


if __name__ == "__main__":
    # Shapes implied by TabFound: batch=2, seq=8, input_features=16,
    # mean_embedding_value C=64, 3 attention blocks, 4 heads, 32 hyperparameters out.
    B, T, F = 2, 8, 16
    C, NB, H, NH = 64, 3, 4, 32

    key = jax.random.PRNGKey(0)
    keys = iter(jax.random.split(key, 64))

    def nrm(shape, scale):
        return jax.random.normal(next(keys), shape, dtype=jnp.float32) * scale

    x = jax.random.normal(next(keys), (B, T, F), dtype=jnp.float32)

    params = {
        "w_in": nrm((C, F), 0.1),
        "b_in": nrm((C,), 0.1),
        "g_f": 1.0 + nrm((C,), 0.1),
        "w_head": nrm((NH, C), 0.1),
        "b_head": nrm((NH,), 0.1),
        "blocks": [
            {
                "w_attn": nrm((3 * C, C), 0.05),
                "w_proj": nrm((C, C), 0.05),
                "w1": nrm((C, C), 0.05),
                "w2": nrm((C, C), 0.05),
                "w3": nrm((C, C), 0.05),
                "g1": 1.0 + nrm((C,), 0.1),
                "g2": 1.0 + nrm((C,), 0.1),
            }
            for _ in range(NB)
        ],
    }

    y = tabfound_forward(x, params, H)
    y = jax.block_until_ready(y)

    y_ref = _reference(x, params, H)
    assert y.shape == (B, T, NH)
    max_err = jnp.max(jnp.abs(y - y_ref))
    assert jnp.allclose(y, y_ref, atol=5e-3, rtol=5e-3), f"mismatch vs reference: {max_err}"

    print("KERNEL_OK")
</pallas_src>

<mosaic_0001>
module attributes {stable_mosaic.version = 11 : i64} {
  func.func @_tabfound_kernel(%arg0: memref<16x16xf32, #tpu.memory_space<vmem>>, %arg1: memref<16x64xf32, #tpu.memory_space<vmem>>, %arg2: memref<1x64xf32, #tpu.memory_space<vmem>>, %arg3: memref<3x1x64xf32, #tpu.memory_space<vmem>>, %arg4: memref<3x1x64xf32, #tpu.memory_space<vmem>>, %arg5: memref<3x64x64xf32, #tpu.memory_space<vmem>>, %arg6: memref<3x64x64xf32, #tpu.memory_space<vmem>>, %arg7: memref<3x64x64xf32, #tpu.memory_space<vmem>>, %arg8: memref<3x64x64xf32, #tpu.memory_space<vmem>>, %arg9: memref<3x64x64xf32, #tpu.memory_space<vmem>>, %arg10: memref<3x64x64xf32, #tpu.memory_space<vmem>>, %arg11: memref<3x64x64xf32, #tpu.memory_space<vmem>>, %arg12: memref<1x64xf32, #tpu.memory_space<vmem>>, %arg13: memref<64x32xf32, #tpu.memory_space<vmem>>, %arg14: memref<1x32xf32, #tpu.memory_space<vmem>>, %arg15: memref<16x32xf32, #tpu.memory_space<vmem>>) attributes {dimension_semantics = [], scalar_prefetch = 0 : i64, scratch_operands = 0 : i64, tpu.core_type = #tpu.core_type<tc>} {
    %c0 = arith.constant 0 : index
    %c0_0 = arith.constant 0 : index
    %0 = vector.load %arg0[%c0, %c0_0] : memref<16x16xf32, #tpu.memory_space<vmem>>, vector<16x16xf32>
    %c0_1 = arith.constant 0 : index
    %c0_2 = arith.constant 0 : index
    %1 = vector.load %arg1[%c0_1, %c0_2] : memref<16x64xf32, #tpu.memory_space<vmem>>, vector<16x64xf32>
    %cst = arith.constant dense<0.000000e+00> : vector<16x64xf32>
    %2 = tpu.matmul %0, %1, %cst {dimension_numbers = #tpu.dot_dimension_numbers<[1], [0], [0], [1], [0, 0, 1, 1], [], []>} : vector<16x16xf32>, vector<16x64xf32>, vector<16x64xf32> -> vector<16x64xf32>
    %c0_3 = arith.constant 0 : index
    %c0_4 = arith.constant 0 : index
    %3 = vector.load %arg2[%c0_3, %c0_4] : memref<1x64xf32, #tpu.memory_space<vmem>>, vector<1x64xf32>
    %4 = vector.broadcast %3 : vector<1x64xf32> to vector<16x64xf32>
    %5 = arith.addf %2, %4 : vector<16x64xf32>
    %6 = tpu.iota {dimensions = array<i32: 0>} : vector<8x8xi32>
    %7 = tpu.iota {dimensions = array<i32: 1>} : vector<8x8xi32>
    %8 = arith.cmpi sle, %7, %6 : vector<8x8xi32>
    %9 = vector.shape_cast %8 : vector<8x8xi1> to vector<1x8x8xi1>
    %c0_5 = arith.constant 0 : index
    %c0_6 = arith.constant 0 : index
    %c0_7 = arith.constant 0 : index
    %10 = vector.load %arg3[%c0_5, %c0_6, %c0_7] : memref<3x1x64xf32, #tpu.memory_space<vmem>>, vector<1x1x64xf32>
    %11 = vector.shape_cast %10 : vector<1x1x64xf32> to vector<1x64xf32>
    %12 = arith.mulf %5, %5 : vector<16x64xf32>
    %cst_8 = arith.constant dense<0.000000e+00> : vector<16xf32>
    %13 = vector.multi_reduction <add>, %12, %cst_8 [1] : vector<16x64xf32> to vector<16xf32>
    %14 = vector.shape_cast %13 : vector<16xf32> to vector<16x1xf32>
    %cst_9 = arith.constant 6.400000e+01 : f32
    %15 = vector.broadcast %cst_9 : f32 to vector<16x1xf32>
    %16 = arith.divf %14, %15 : vector<16x1xf32>
    %cst_10 = arith.constant 9.99999997E-7 : f32
    %17 = vector.broadcast %cst_10 : f32 to vector<16x1xf32>
    %18 = arith.addf %16, %17 : vector<16x1xf32>
    %19 = math.rsqrt %18 : vector<16x1xf32>
    %20 = vector.broadcast %19 : vector<16x1xf32> to vector<16x64xf32>
    %21 = arith.mulf %5, %20 : vector<16x64xf32>
    %22 = vector.broadcast %11 : vector<1x64xf32> to vector<16x64xf32>
    %23 = arith.mulf %21, %22 : vector<16x64xf32>
    %c0_11 = arith.constant 0 : index
    %c0_12 = arith.constant 0 : index
    %c0_13 = arith.constant 0 : index
    %24 = vector.load %arg5[%c0_11, %c0_12, %c0_13] : memref<3x64x64xf32, #tpu.memory_space<vmem>>, vector<1x64x64xf32>
    %25 = vector.shape_cast %24 : vector<1x64x64xf32> to vector<64x64xf32>
    %cst_14 = arith.constant dense<0.000000e+00> : vector<16x64xf32>
    %26 = tpu.matmul %23, %25, %cst_14 {dimension_numbers = #tpu.dot_dimension_numbers<[1], [0], [0], [1], [0, 0, 1, 1], [], []>} : vector<16x64xf32>, vector<64x64xf32>, vector<16x64xf32> -> vector<16x64xf32>
    %cst_15 = arith.constant 2.500000e-01 : f32
    %27 = vector.broadcast %cst_15 : f32 to vector<16x64xf32>
    %28 = arith.mulf %26, %27 : vector<16x64xf32>
    %c0_16 = arith.constant 0 : index
    %c0_17 = arith.constant 0 : index
    %c0_18 = arith.constant 0 : index
    %29 = vector.load %arg6[%c0_16, %c0_17, %c0_18] : memref<3x64x64xf32, #tpu.memory_space<vmem>>, vector<1x64x64xf32>
    %30 = vector.shape_cast %29 : vector<1x64x64xf32> to vector<64x64xf32>
    %cst_19 = arith.constant dense<0.000000e+00> : vector<16x64xf32>
    %31 = tpu.matmul %23, %30, %cst_19 {dimension_numbers = #tpu.dot_dimension_numbers<[1], [0], [0], [1], [0, 0, 1, 1], [], []>} : vector<16x64xf32>, vector<64x64xf32>, vector<16x64xf32> -> vector<16x64xf32>
    %c0_20 = arith.constant 0 : index
    %c0_21 = arith.constant 0 : index
    %c0_22 = arith.constant 0 : index
    %32 = vector.load %arg7[%c0_20, %c0_21, %c0_22] : memref<3x64x64xf32, #tpu.memory_space<vmem>>, vector<1x64x64xf32>
    %33 = vector.shape_cast %32 : vector<1x64x64xf32> to vector<64x64xf32>
    %cst_23 = arith.constant dense<0.000000e+00> : vector<16x64xf32>
    %34 = tpu.matmul %23, %33, %cst_23 {dimension_numbers = #tpu.dot_dimension_numbers<[1], [0], [0], [1], [0, 0, 1, 1], [], []>} : vector<16x64xf32>, vector<64x64xf32>, vector<16x64xf32> -> vector<16x64xf32>
    %35 = vector.shape_cast %28 : vector<16x64xf32> to vector<2x8x4x16xf32>
    %36 = tpu.transpose %35, [0, 2, 1, 3] : vector<2x8x4x16xf32> -> vector<2x4x8x16xf32>
    %37 = vector.shape_cast %36 : vector<2x4x8x16xf32> to vector<8x8x16xf32>
    %38 = vector.shape_cast %31 : vector<16x64xf32> to vector<2x8x4x16xf32>
    %39 = tpu.transpose %38, [0, 2, 1, 3] : vector<2x8x4x16xf32> -> vector<2x4x8x16xf32>
    %40 = vector.shape_cast %39 : vector<2x4x8x16xf32> to vector<8x8x16xf32>
    %41 = vector.shape_cast %34 : vector<16x64xf32> to vector<2x8x4x16xf32>
    %42 = tpu.transpose %41, [0, 2, 1, 3] : vector<2x8x4x16xf32> -> vector<2x4x8x16xf32>
    %43 = vector.shape_cast %42 : vector<2x4x8x16xf32> to vector<8x8x16xf32>
    "tpu.trace_start"() <{level = 10 : i32, message = "bqd,bkd->bqk"}> : () -> ()
    %cst_24 = arith.constant dense<0.000000e+00> : vector<8x8x8xf32>
    %44 = tpu.matmul %37, %40, %cst_24 {dimension_numbers = #tpu.dot_dimension_numbers<[2], [2], [1], [1], [0, 0, 0, 1, 1, 1], [0], [0]>} : vector<8x8x16xf32>, vector<8x8x16xf32>, vector<8x8x8xf32> -> vector<8x8x8xf32>
    %cst_25 = arith.constant -1.000000e+30 : f32
    "tpu.trace_stop"() : () -> ()
    %45 = vector.shape_cast %9 : vector<1x8x8xi1> to vector<1x8x8xi1>
    %46 = vector.broadcast %45 : vector<1x8x8xi1> to vector<8x8x8xi1>
    %47 = vector.broadcast %cst_25 : f32 to vector<8x8x8xf32>
    %48 = arith.select %46, %44, %47 : vector<8x8x8xi1>, vector<8x8x8xf32>
    %cst_26 = arith.constant dense<0xFF800000> : vector<8x8xf32>
    %49 = vector.multi_reduction <maximumf>, %48, %cst_26 [2] : vector<8x8x8xf32> to vector<8x8xf32>
    %50 = vector.shape_cast %49 : vector<8x8xf32> to vector<8x8x1xf32>
    %51 = vector.broadcast %50 : vector<8x8x1xf32> to vector<8x8x8xf32>
    %52 = arith.subf %48, %51 : vector<8x8x8xf32>
    %53 = math.exp %52 : vector<8x8x8xf32>
    %cst_27 = arith.constant dense<0.000000e+00> : vector<8x8xf32>
    %54 = vector.multi_reduction <add>, %53, %cst_27 [2] : vector<8x8x8xf32> to vector<8x8xf32>
    %55 = vector.shape_cast %54 : vector<8x8xf32> to vector<8x8x1xf32>
    %56 = tpu.reciprocal %55 {approx = true} : vector<8x8x1xf32> -> vector<8x8x1xf32>
    %57 = vector.broadcast %56 : vector<8x8x1xf32> to vector<8x8x8xf32>
    %58 = arith.mulf %53, %57 : vector<8x8x8xf32>
    "tpu.trace_start"() <{level = 10 : i32, message = "bqk,bkd->bqd"}> : () -> ()
    %cst_28 = arith.constant dense<0.000000e+00> : vector<8x8x16xf32>
    %59 = tpu.matmul %58, %43, %cst_28 {dimension_numbers = #tpu.dot_dimension_numbers<[2], [1], [1], [2], [0, 0, 0, 1, 1, 2], [0], [0]>} : vector<8x8x8xf32>, vector<8x8x16xf32>, vector<8x8x16xf32> -> vector<8x8x16xf32>
    "tpu.trace_stop"() : () -> ()
    %60 = vector.shape_cast %59 : vector<8x8x16xf32> to vector<2x4x8x16xf32>
    %61 = tpu.transpose %60, [0, 2, 1, 3] : vector<2x4x8x16xf32> -> vector<2x8x4x16xf32>
    %62 = vector.shape_cast %61 : vector<2x8x4x16xf32> to vector<16x64xf32>
    %c0_29 = arith.constant 0 : index
    %c0_30 = arith.constant 0 : index
    %c0_31 = arith.constant 0 : index
    %63 = vector.load %arg8[%c0_29, %c0_30, %c0_31] : memref<3x64x64xf32, #tpu.memory_space<vmem>>, vector<1x64x64xf32>
    %64 = vector.shape_cast %63 : vector<1x64x64xf32> to vector<64x64xf32>
    %cst_32 = arith.constant dense<0.000000e+00> : vector<16x64xf32>
    %65 = tpu.matmul %62, %64, %cst_32 {dimension_numbers = #tpu.dot_dimension_numbers<[1], [0], [0], [1], [0, 0, 1, 1], [], []>} : vector<16x64xf32>, vector<64x64xf32>, vector<16x64xf32> -> vector<16x64xf32>
    %66 = arith.addf %5, %65 : vector<16x64xf32>
    %c0_33 = arith.constant 0 : index
    %c0_34 = arith.constant 0 : index
    %c0_35 = arith.constant 0 : index
    %67 = vector.load %arg4[%c0_33, %c0_34, %c0_35] : memref<3x1x64xf32, #tpu.memory_space<vmem>>, vector<1x1x64xf32>
    %68 = vector.shape_cast %67 : vector<1x1x64xf32> to vector<1x64xf32>
    %69 = arith.mulf %66, %66 : vector<16x64xf32>
    %cst_36 = arith.constant dense<0.000000e+00> : vector<16xf32>
    %70 = vector.multi_reduction <add>, %69, %cst_36 [1] : vector<16x64xf32> to vector<16xf32>
    %71 = vector.shape_cast %70 : vector<16xf32> to vector<16x1xf32>
    %cst_37 = arith.constant 6.400000e+01 : f32
    %72 = vector.broadcast %cst_37 : f32 to vector<16x1xf32>
    %73 = arith.divf %71, %72 : vector<16x1xf32>
    %cst_38 = arith.constant 9.99999997E-7 : f32
    %74 = vector.broadcast %cst_38 : f32 to vector<16x1xf32>
    %75 = arith.addf %73, %74 : vector<16x1xf32>
    %76 = math.rsqrt %75 : vector<16x1xf32>
    %77 = vector.broadcast %76 : vector<16x1xf32> to vector<16x64xf32>
    %78 = arith.mulf %66, %77 : vector<16x64xf32>
    %79 = vector.broadcast %68 : vector<1x64xf32> to vector<16x64xf32>
    %80 = arith.mulf %78, %79 : vector<16x64xf32>
    %c0_39 = arith.constant 0 : index
    %c0_40 = arith.constant 0 : index
    %c0_41 = arith.constant 0 : index
    %81 = vector.load %arg9[%c0_39, %c0_40, %c0_41] : memref<3x64x64xf32, #tpu.memory_space<vmem>>, vector<1x64x64xf32>
    %82 = vector.shape_cast %81 : vector<1x64x64xf32> to vector<64x64xf32>
    %cst_42 = arith.constant dense<0.000000e+00> : vector<16x64xf32>
    %83 = tpu.matmul %80, %82, %cst_42 {dimension_numbers = #tpu.dot_dimension_numbers<[1], [0], [0], [1], [0, 0, 1, 1], [], []>} : vector<16x64xf32>, vector<64x64xf32>, vector<16x64xf32> -> vector<16x64xf32>
    %c0_43 = arith.constant 0 : index
    %c0_44 = arith.constant 0 : index
    %c0_45 = arith.constant 0 : index
    %84 = vector.load %arg11[%c0_43, %c0_44, %c0_45] : memref<3x64x64xf32, #tpu.memory_space<vmem>>, vector<1x64x64xf32>
    %85 = vector.shape_cast %84 : vector<1x64x64xf32> to vector<64x64xf32>
    %cst_46 = arith.constant dense<0.000000e+00> : vector<16x64xf32>
    %86 = tpu.matmul %80, %85, %cst_46 {dimension_numbers = #tpu.dot_dimension_numbers<[1], [0], [0], [1], [0, 0, 1, 1], [], []>} : vector<16x64xf32>, vector<64x64xf32>, vector<16x64xf32> -> vector<16x64xf32>
    %87 = arith.negf %83 : vector<16x64xf32>
    %88 = math.exp %87 : vector<16x64xf32>
    %cst_47 = arith.constant 1.000000e+00 : f32
    %89 = vector.broadcast %cst_47 : f32 to vector<16x64xf32>
    %90 = arith.addf %89, %88 : vector<16x64xf32>
    %91 = arith.divf %89, %90 : vector<16x64xf32>
    %92 = arith.mulf %83, %91 : vector<16x64xf32>
    %93 = arith.mulf %92, %86 : vector<16x64xf32>
    %c0_48 = arith.constant 0 : index
    %c0_49 = arith.constant 0 : index
    %c0_50 = arith.constant 0 : index
    %94 = vector.load %arg10[%c0_48, %c0_49, %c0_50] : memref<3x64x64xf32, #tpu.memory_space<vmem>>, vector<1x64x64xf32>
    %95 = vector.shape_cast %94 : vector<1x64x64xf32> to vector<64x64xf32>
    %cst_51 = arith.constant dense<0.000000e+00> : vector<16x64xf32>
    %96 = tpu.matmul %93, %95, %cst_51 {dimension_numbers = #tpu.dot_dimension_numbers<[1], [0], [0], [1], [0, 0, 1, 1], [], []>} : vector<16x64xf32>, vector<64x64xf32>, vector<16x64xf32> -> vector<16x64xf32>
    %97 = arith.addf %66, %96 : vector<16x64xf32>
    %c1 = arith.constant 1 : index
    %c0_52 = arith.constant 0 : index
    %c0_53 = arith.constant 0 : index
    %98 = vector.load %arg3[%c1, %c0_52, %c0_53] : memref<3x1x64xf32, #tpu.memory_space<vmem>>, vector<1x1x64xf32>
    %99 = vector.shape_cast %98 : vector<1x1x64xf32> to vector<1x64xf32>
    %100 = arith.mulf %97, %97 : vector<16x64xf32>
    %cst_54 = arith.constant dense<0.000000e+00> : vector<16xf32>
    %101 = vector.multi_reduction <add>, %100, %cst_54 [1] : vector<16x64xf32> to vector<16xf32>
    %102 = vector.shape_cast %101 : vector<16xf32> to vector<16x1xf32>
    %cst_55 = arith.constant 6.400000e+01 : f32
    %103 = vector.broadcast %cst_55 : f32 to vector<16x1xf32>
    %104 = arith.divf %102, %103 : vector<16x1xf32>
    %cst_56 = arith.constant 9.99999997E-7 : f32
    %105 = vector.broadcast %cst_56 : f32 to vector<16x1xf32>
    %106 = arith.addf %104, %105 : vector<16x1xf32>
    %107 = math.rsqrt %106 : vector<16x1xf32>
    %108 = vector.broadcast %107 : vector<16x1xf32> to vector<16x64xf32>
    %109 = arith.mulf %97, %108 : vector<16x64xf32>
    %110 = vector.broadcast %99 : vector<1x64xf32> to vector<16x64xf32>
    %111 = arith.mulf %109, %110 : vector<16x64xf32>
    %c1_57 = arith.constant 1 : index
    %c0_58 = arith.constant 0 : index
    %c0_59 = arith.constant 0 : index
    %112 = vector.load %arg5[%c1_57, %c0_58, %c0_59] : memref<3x64x64xf32, #tpu.memory_space<vmem>>, vector<1x64x64xf32>
    %113 = vector.shape_cast %112 : vector<1x64x64xf32> to vector<64x64xf32>
    %cst_60 = arith.constant dense<0.000000e+00> : vector<16x64xf32>
    %114 = tpu.matmul %111, %113, %cst_60 {dimension_numbers = #tpu.dot_dimension_numbers<[1], [0], [0], [1], [0, 0, 1, 1], [], []>} : vector<16x64xf32>, vector<64x64xf32>, vector<16x64xf32> -> vector<16x64xf32>
    %cst_61 = arith.constant 2.500000e-01 : f32
    %115 = vector.broadcast %cst_61 : f32 to vector<16x64xf32>
    %116 = arith.mulf %114, %115 : vector<16x64xf32>
    %c1_62 = arith.constant 1 : index
    %c0_63 = arith.constant 0 : index
    %c0_64 = arith.constant 0 : index
    %117 = vector.load %arg6[%c1_62, %c0_63, %c0_64] : memref<3x64x64xf32, #tpu.memory_space<vmem>>, vector<1x64x64xf32>
    %118 = vector.shape_cast %117 : vector<1x64x64xf32> to vector<64x64xf32>
    %cst_65 = arith.constant dense<0.000000e+00> : vector<16x64xf32>
    %119 = tpu.matmul %111, %118, %cst_65 {dimension_numbers = #tpu.dot_dimension_numbers<[1], [0], [0], [1], [0, 0, 1, 1], [], []>} : vector<16x64xf32>, vector<64x64xf32>, vector<16x64xf32> -> vector<16x64xf32>
    %c1_66 = arith.constant 1 : index
    %c0_67 = arith.constant 0 : index
    %c0_68 = arith.constant 0 : index
    %120 = vector.load %arg7[%c1_66, %c0_67, %c0_68] : memref<3x64x64xf32, #tpu.memory_space<vmem>>, vector<1x64x64xf32>
    %121 = vector.shape_cast %120 : vector<1x64x64xf32> to vector<64x64xf32>
    %cst_69 = arith.constant dense<0.000000e+00> : vector<16x64xf32>
    %122 = tpu.matmul %111, %121, %cst_69 {dimension_numbers = #tpu.dot_dimension_numbers<[1], [0], [0], [1], [0, 0, 1, 1], [], []>} : vector<16x64xf32>, vector<64x64xf32>, vector<16x64xf32> -> vector<16x64xf32>
    %123 = vector.shape_cast %116 : vector<16x64xf32> to vector<2x8x4x16xf32>
    %124 = tpu.transpose %123, [0, 2, 1, 3] : vector<2x8x4x16xf32> -> vector<2x4x8x16xf32>
    %125 = vector.shape_cast %124 : vector<2x4x8x16xf32> to vector<8x8x16xf32>
    %126 = vector.shape_cast %119 : vector<16x64xf32> to vector<2x8x4x16xf32>
    %127 = tpu.transpose %126, [0, 2, 1, 3] : vector<2x8x4x16xf32> -> vector<2x4x8x16xf32>
    %128 = vector.shape_cast %127 : vector<2x4x8x16xf32> to vector<8x8x16xf32>
    %129 = vector.shape_cast %122 : vector<16x64xf32> to vector<2x8x4x16xf32>
    %130 = tpu.transpose %129, [0, 2, 1, 3] : vector<2x8x4x16xf32> -> vector<2x4x8x16xf32>
    %131 = vector.shape_cast %130 : vector<2x4x8x16xf32> to vector<8x8x16xf32>
    "tpu.trace_start"() <{level = 10 : i32, message = "bqd,bkd->bqk"}> : () -> ()
    %cst_70 = arith.constant dense<0.000000e+00> : vector<8x8x8xf32>
    %132 = tpu.matmul %125, %128, %cst_70 {dimension_numbers = #tpu.dot_dimension_numbers<[2], [2], [1], [1], [0, 0, 0, 1, 1, 1], [0], [0]>} : vector<8x8x16xf32>, vector<8x8x16xf32>, vector<8x8x8xf32> -> vector<8x8x8xf32>
    %cst_71 = arith.constant -1.000000e+30 : f32
    "tpu.trace_stop"() : () -> ()
    %133 = vector.shape_cast %9 : vector<1x8x8xi1> to vector<1x8x8xi1>
    %134 = vector.broadcast %133 : vector<1x8x8xi1> to vector<8x8x8xi1>
    %135 = vector.broadcast %cst_71 : f32 to vector<8x8x8xf32>
    %136 = arith.select %134, %132, %135 : vector<8x8x8xi1>, vector<8x8x8xf32>
    %cst_72 = arith.constant dense<0xFF800000> : vector<8x8xf32>
    %137 = vector.multi_reduction <maximumf>, %136, %cst_72 [2] : vector<8x8x8xf32> to vector<8x8xf32>
    %138 = vector.shape_cast %137 : vector<8x8xf32> to vector<8x8x1xf32>
    %139 = vector.broadcast %138 : vector<8x8x1xf32> to vector<8x8x8xf32>
    %140 = arith.subf %136, %139 : vector<8x8x8xf32>
    %141 = math.exp %140 : vector<8x8x8xf32>
    %cst_73 = arith.constant dense<0.000000e+00> : vector<8x8xf32>
    %142 = vector.multi_reduction <add>, %141, %cst_73 [2] : vector<8x8x8xf32> to vector<8x8xf32>
    %143 = vector.shape_cast %142 : vector<8x8xf32> to vector<8x8x1xf32>
    %144 = tpu.reciprocal %143 {approx = true} : vector<8x8x1xf32> -> vector<8x8x1xf32>
    %145 = vector.broadcast %144 : vector<8x8x1xf32> to vector<8x8x8xf32>
    %146 = arith.mulf %141, %145 : vector<8x8x8xf32>
    "tpu.trace_start"() <{level = 10 : i32, message = "bqk,bkd->bqd"}> : () -> ()
    %cst_74 = arith.constant dense<0.000000e+00> : vector<8x8x16xf32>
    %147 = tpu.matmul %146, %131, %cst_74 {dimension_numbers = #tpu.dot_dimension_numbers<[2], [1], [1], [2], [0, 0, 0, 1, 1, 2], [0], [0]>} : vector<8x8x8xf32>, vector<8x8x16xf32>, vector<8x8x16xf32> -> vector<8x8x16xf32>
    "tpu.trace_stop"() : () -> ()
    %148 = vector.shape_cast %147 : vector<8x8x16xf32> to vector<2x4x8x16xf32>
    %149 = tpu.transpose %148, [0, 2, 1, 3] : vector<2x4x8x16xf32> -> vector<2x8x4x16xf32>
    %150 = vector.shape_cast %149 : vector<2x8x4x16xf32> to vector<16x64xf32>
    %c1_75 = arith.constant 1 : index
    %c0_76 = arith.constant 0 : index
    %c0_77 = arith.constant 0 : index
    %151 = vector.load %arg8[%c1_75, %c0_76, %c0_77] : memref<3x64x64xf32, #tpu.memory_space<vmem>>, vector<1x64x64xf32>
    %152 = vector.shape_cast %151 : vector<1x64x64xf32> to vector<64x64xf32>
    %cst_78 = arith.constant dense<0.000000e+00> : vector<16x64xf32>
    %153 = tpu.matmul %150, %152, %cst_78 {dimension_numbers = #tpu.dot_dimension_numbers<[1], [0], [0], [1], [0, 0, 1, 1], [], []>} : vector<16x64xf32>, vector<64x64xf32>, vector<16x64xf32> -> vector<16x64xf32>
    %154 = arith.addf %97, %153 : vector<16x64xf32>
    %c1_79 = arith.constant 1 : index
    %c0_80 = arith.constant 0 : index
    %c0_81 = arith.constant 0 : index
    %155 = vector.load %arg4[%c1_79, %c0_80, %c0_81] : memref<3x1x64xf32, #tpu.memory_space<vmem>>, vector<1x1x64xf32>
    %156 = vector.shape_cast %155 : vector<1x1x64xf32> to vector<1x64xf32>
    %157 = arith.mulf %154, %154 : vector<16x64xf32>
    %cst_82 = arith.constant dense<0.000000e+00> : vector<16xf32>
    %158 = vector.multi_reduction <add>, %157, %cst_82 [1] : vector<16x64xf32> to vector<16xf32>
    %159 = vector.shape_cast %158 : vector<16xf32> to vector<16x1xf32>
    %cst_83 = arith.constant 6.400000e+01 : f32
    %160 = vector.broadcast %cst_83 : f32 to vector<16x1xf32>
    %161 = arith.divf %159, %160 : vector<16x1xf32>
    %cst_84 = arith.constant 9.99999997E-7 : f32
    %162 = vector.broadcast %cst_84 : f32 to vector<16x1xf32>
    %163 = arith.addf %161, %162 : vector<16x1xf32>
    %164 = math.rsqrt %163 : vector<16x1xf32>
    %165 = vector.broadcast %164 : vector<16x1xf32> to vector<16x64xf32>
    %166 = arith.mulf %154, %165 : vector<16x64xf32>
    %167 = vector.broadcast %156 : vector<1x64xf32> to vector<16x64xf32>
    %168 = arith.mulf %166, %167 : vector<16x64xf32>
    %c1_85 = arith.constant 1 : index
    %c0_86 = arith.constant 0 : index
    %c0_87 = arith.constant 0 : index
    %169 = vector.load %arg9[%c1_85, %c0_86, %c0_87] : memref<3x64x64xf32, #tpu.memory_space<vmem>>, vector<1x64x64xf32>
    %170 = vector.shape_cast %169 : vector<1x64x64xf32> to vector<64x64xf32>
    %cst_88 = arith.constant dense<0.000000e+00> : vector<16x64xf32>
    %171 = tpu.matmul %168, %170, %cst_88 {dimension_numbers = #tpu.dot_dimension_numbers<[1], [0], [0], [1], [0, 0, 1, 1], [], []>} : vector<16x64xf32>, vector<64x64xf32>, vector<16x64xf32> -> vector<16x64xf32>
    %c1_89 = arith.constant 1 : index
    %c0_90 = arith.constant 0 : index
    %c0_91 = arith.constant 0 : index
    %172 = vector.load %arg11[%c1_89, %c0_90, %c0_91] : memref<3x64x64xf32, #tpu.memory_space<vmem>>, vector<1x64x64xf32>
    %173 = vector.shape_cast %172 : vector<1x64x64xf32> to vector<64x64xf32>
    %cst_92 = arith.constant dense<0.000000e+00> : vector<16x64xf32>
    %174 = tpu.matmul %168, %173, %cst_92 {dimension_numbers = #tpu.dot_dimension_numbers<[1], [0], [0], [1], [0, 0, 1, 1], [], []>} : vector<16x64xf32>, vector<64x64xf32>, vector<16x64xf32> -> vector<16x64xf32>
    %175 = arith.negf %171 : vector<16x64xf32>
    %176 = math.exp %175 : vector<16x64xf32>
    %cst_93 = arith.constant 1.000000e+00 : f32
    %177 = vector.broadcast %cst_93 : f32 to vector<16x64xf32>
    %178 = arith.addf %177, %176 : vector<16x64xf32>
    %179 = arith.divf %177, %178 : vector<16x64xf32>
    %180 = arith.mulf %171, %179 : vector<16x64xf32>
    %181 = arith.mulf %180, %174 : vector<16x64xf32>
    %c1_94 = arith.constant 1 : index
    %c0_95 = arith.constant 0 : index
    %c0_96 = arith.constant 0 : index
    %182 = vector.load %arg10[%c1_94, %c0_95, %c0_96] : memref<3x64x64xf32, #tpu.memory_space<vmem>>, vector<1x64x64xf32>
    %183 = vector.shape_cast %182 : vector<1x64x64xf32> to vector<64x64xf32>
    %cst_97 = arith.constant dense<0.000000e+00> : vector<16x64xf32>
    %184 = tpu.matmul %181, %183, %cst_97 {dimension_numbers = #tpu.dot_dimension_numbers<[1], [0], [0], [1], [0, 0, 1, 1], [], []>} : vector<16x64xf32>, vector<64x64xf32>, vector<16x64xf32> -> vector<16x64xf32>
    %185 = arith.addf %154, %184 : vector<16x64xf32>
    %c2 = arith.constant 2 : index
    %c0_98 = arith.constant 0 : index
    %c0_99 = arith.constant 0 : index
    %186 = vector.load %arg3[%c2, %c0_98, %c0_99] : memref<3x1x64xf32, #tpu.memory_space<vmem>>, vector<1x1x64xf32>
    %187 = vector.shape_cast %186 : vector<1x1x64xf32> to vector<1x64xf32>
    %188 = arith.mulf %185, %185 : vector<16x64xf32>
    %cst_100 = arith.constant dense<0.000000e+00> : vector<16xf32>
    %189 = vector.multi_reduction <add>, %188, %cst_100 [1] : vector<16x64xf32> to vector<16xf32>
    %190 = vector.shape_cast %189 : vector<16xf32> to vector<16x1xf32>
    %cst_101 = arith.constant 6.400000e+01 : f32
    %191 = vector.broadcast %cst_101 : f32 to vector<16x1xf32>
    %192 = arith.divf %190, %191 : vector<16x1xf32>
    %cst_102 = arith.constant 9.99999997E-7 : f32
    %193 = vector.broadcast %cst_102 : f32 to vector<16x1xf32>
    %194 = arith.addf %192, %193 : vector<16x1xf32>
    %195 = math.rsqrt %194 : vector<16x1xf32>
    %196 = vector.broadcast %195 : vector<16x1xf32> to vector<16x64xf32>
    %197 = arith.mulf %185, %196 : vector<16x64xf32>
    %198 = vector.broadcast %187 : vector<1x64xf32> to vector<16x64xf32>
    %199 = arith.mulf %197, %198 : vector<16x64xf32>
    %c2_103 = arith.constant 2 : index
    %c0_104 = arith.constant 0 : index
    %c0_105 = arith.constant 0 : index
    %200 = vector.load %arg5[%c2_103, %c0_104, %c0_105] : memref<3x64x64xf32, #tpu.memory_space<vmem>>, vector<1x64x64xf32>
    %201 = vector.shape_cast %200 : vector<1x64x64xf32> to vector<64x64xf32>
    %cst_106 = arith.constant dense<0.000000e+00> : vector<16x64xf32>
    %202 = tpu.matmul %199, %201, %cst_106 {dimension_numbers = #tpu.dot_dimension_numbers<[1], [0], [0], [1], [0, 0, 1, 1], [], []>} : vector<16x64xf32>, vector<64x64xf32>, vector<16x64xf32> -> vector<16x64xf32>
    %cst_107 = arith.constant 2.500000e-01 : f32
    %203 = vector.broadcast %cst_107 : f32 to vector<16x64xf32>
    %204 = arith.mulf %202, %203 : vector<16x64xf32>
    %c2_108 = arith.constant 2 : index
    %c0_109 = arith.constant 0 : index
    %c0_110 = arith.constant 0 : index
    %205 = vector.load %arg6[%c2_108, %c0_109, %c0_110] : memref<3x64x64xf32, #tpu.memory_space<vmem>>, vector<1x64x64xf32>
    %206 = vector.shape_cast %205 : vector<1x64x64xf32> to vector<64x64xf32>
    %cst_111 = arith.constant dense<0.000000e+00> : vector<16x64xf32>
    %207 = tpu.matmul %199, %206, %cst_111 {dimension_numbers = #tpu.dot_dimension_numbers<[1], [0], [0], [1], [0, 0, 1, 1], [], []>} : vector<16x64xf32>, vector<64x64xf32>, vector<16x64xf32> -> vector<16x64xf32>
    %c2_112 = arith.constant 2 : index
    %c0_113 = arith.constant 0 : index
    %c0_114 = arith.constant 0 : index
    %208 = vector.load %arg7[%c2_112, %c0_113, %c0_114] : memref<3x64x64xf32, #tpu.memory_space<vmem>>, vector<1x64x64xf32>
    %209 = vector.shape_cast %208 : vector<1x64x64xf32> to vector<64x64xf32>
    %cst_115 = arith.constant dense<0.000000e+00> : vector<16x64xf32>
    %210 = tpu.matmul %199, %209, %cst_115 {dimension_numbers = #tpu.dot_dimension_numbers<[1], [0], [0], [1], [0, 0, 1, 1], [], []>} : vector<16x64xf32>, vector<64x64xf32>, vector<16x64xf32> -> vector<16x64xf32>
    %211 = vector.shape_cast %204 : vector<16x64xf32> to vector<2x8x4x16xf32>
    %212 = tpu.transpose %211, [0, 2, 1, 3] : vector<2x8x4x16xf32> -> vector<2x4x8x16xf32>
    %213 = vector.shape_cast %212 : vector<2x4x8x16xf32> to vector<8x8x16xf32>
    %214 = vector.shape_cast %207 : vector<16x64xf32> to vector<2x8x4x16xf32>
    %215 = tpu.transpose %214, [0, 2, 1, 3] : vector<2x8x4x16xf32> -> vector<2x4x8x16xf32>
    %216 = vector.shape_cast %215 : vector<2x4x8x16xf32> to vector<8x8x16xf32>
    %217 = vector.shape_cast %210 : vector<16x64xf32> to vector<2x8x4x16xf32>
    %218 = tpu.transpose %217, [0, 2, 1, 3] : vector<2x8x4x16xf32> -> vector<2x4x8x16xf32>
    %219 = vector.shape_cast %218 : vector<2x4x8x16xf32> to vector<8x8x16xf32>
    "tpu.trace_start"() <{level = 10 : i32, message = "bqd,bkd->bqk"}> : () -> ()
    %cst_116 = arith.constant dense<0.000000e+00> : vector<8x8x8xf32>
    %220 = tpu.matmul %213, %216, %cst_116 {dimension_numbers = #tpu.dot_dimension_numbers<[2], [2], [1], [1], [0, 0, 0, 1, 1, 1], [0], [0]>} : vector<8x8x16xf32>, vector<8x8x16xf32>, vector<8x8x8xf32> -> vector<8x8x8xf32>
    %cst_117 = arith.constant -1.000000e+30 : f32
    "tpu.trace_stop"() : () -> ()
    %221 = vector.shape_cast %9 : vector<1x8x8xi1> to vector<1x8x8xi1>
    %222 = vector.broadcast %221 : vector<1x8x8xi1> to vector<8x8x8xi1>
    %223 = vector.broadcast %cst_117 : f32 to vector<8x8x8xf32>
    %224 = arith.select %222, %220, %223 : vector<8x8x8xi1>, vector<8x8x8xf32>
    %cst_118 = arith.constant dense<0xFF800000> : vector<8x8xf32>
    %225 = vector.multi_reduction <maximumf>, %224, %cst_118 [2] : vector<8x8x8xf32> to vector<8x8xf32>
    %226 = vector.shape_cast %225 : vector<8x8xf32> to vector<8x8x1xf32>
    %227 = vector.broadcast %226 : vector<8x8x1xf32> to vector<8x8x8xf32>
    %228 = arith.subf %224, %227 : vector<8x8x8xf32>
    %229 = math.exp %228 : vector<8x8x8xf32>
    %cst_119 = arith.constant dense<0.000000e+00> : vector<8x8xf32>
    %230 = vector.multi_reduction <add>, %229, %cst_119 [2] : vector<8x8x8xf32> to vector<8x8xf32>
    %231 = vector.shape_cast %230 : vector<8x8xf32> to vector<8x8x1xf32>
    %232 = tpu.reciprocal %231 {approx = true} : vector<8x8x1xf32> -> vector<8x8x1xf32>
    %233 = vector.broadcast %232 : vector<8x8x1xf32> to vector<8x8x8xf32>
    %234 = arith.mulf %229, %233 : vector<8x8x8xf32>
    "tpu.trace_start"() <{level = 10 : i32, message = "bqk,bkd->bqd"}> : () -> ()
    %cst_120 = arith.constant dense<0.000000e+00> : vector<8x8x16xf32>
    %235 = tpu.matmul %234, %219, %cst_120 {dimension_numbers = #tpu.dot_dimension_numbers<[2], [1], [1], [2], [0, 0, 0, 1, 1, 2], [0], [0]>} : vector<8x8x8xf32>, vector<8x8x16xf32>, vector<8x8x16xf32> -> vector<8x8x16xf32>
    "tpu.trace_stop"() : () -> ()
    %236 = vector.shape_cast %235 : vector<8x8x16xf32> to vector<2x4x8x16xf32>
    %237 = tpu.transpose %236, [0, 2, 1, 3] : vector<2x4x8x16xf32> -> vector<2x8x4x16xf32>
    %238 = vector.shape_cast %237 : vector<2x8x4x16xf32> to vector<16x64xf32>
    %c2_121 = arith.constant 2 : index
    %c0_122 = arith.constant 0 : index
    %c0_123 = arith.constant 0 : index
    %239 = vector.load %arg8[%c2_121, %c0_122, %c0_123] : memref<3x64x64xf32, #tpu.memory_space<vmem>>, vector<1x64x64xf32>
    %240 = vector.shape_cast %239 : vector<1x64x64xf32> to vector<64x64xf32>
    %cst_124 = arith.constant dense<0.000000e+00> : vector<16x64xf32>
    %241 = tpu.matmul %238, %240, %cst_124 {dimension_numbers = #tpu.dot_dimension_numbers<[1], [0], [0], [1], [0, 0, 1, 1], [], []>} : vector<16x64xf32>, vector<64x64xf32>, vector<16x64xf32> -> vector<16x64xf32>
    %242 = arith.addf %185, %241 : vector<16x64xf32>
    %c2_125 = arith.constant 2 : index
    %c0_126 = arith.constant 0 : index
    %c0_127 = arith.constant 0 : index
    %243 = vector.load %arg4[%c2_125, %c0_126, %c0_127] : memref<3x1x64xf32, #tpu.memory_space<vmem>>, vector<1x1x64xf32>
    %244 = vector.shape_cast %243 : vector<1x1x64xf32> to vector<1x64xf32>
    %245 = arith.mulf %242, %242 : vector<16x64xf32>
    %cst_128 = arith.constant dense<0.000000e+00> : vector<16xf32>
    %246 = vector.multi_reduction <add>, %245, %cst_128 [1] : vector<16x64xf32> to vector<16xf32>
    %247 = vector.shape_cast %246 : vector<16xf32> to vector<16x1xf32>
    %cst_129 = arith.constant 6.400000e+01 : f32
    %248 = vector.broadcast %cst_129 : f32 to vector<16x1xf32>
    %249 = arith.divf %247, %248 : vector<16x1xf32>
    %cst_130 = arith.constant 9.99999997E-7 : f32
    %250 = vector.broadcast %cst_130 : f32 to vector<16x1xf32>
    %251 = arith.addf %249, %250 : vector<16x1xf32>
    %252 = math.rsqrt %251 : vector<16x1xf32>
    %253 = vector.broadcast %252 : vector<16x1xf32> to vector<16x64xf32>
    %254 = arith.mulf %242, %253 : vector<16x64xf32>
    %255 = vector.broadcast %244 : vector<1x64xf32> to vector<16x64xf32>
    %256 = arith.mulf %254, %255 : vector<16x64xf32>
    %c2_131 = arith.constant 2 : index
    %c0_132 = arith.constant 0 : index
    %c0_133 = arith.constant 0 : index
    %257 = vector.load %arg9[%c2_131, %c0_132, %c0_133] : memref<3x64x64xf32, #tpu.memory_space<vmem>>, vector<1x64x64xf32>
    %258 = vector.shape_cast %257 : vector<1x64x64xf32> to vector<64x64xf32>
    %cst_134 = arith.constant dense<0.000000e+00> : vector<16x64xf32>
    %259 = tpu.matmul %256, %258, %cst_134 {dimension_numbers = #tpu.dot_dimension_numbers<[1], [0], [0], [1], [0, 0, 1, 1], [], []>} : vector<16x64xf32>, vector<64x64xf32>, vector<16x64xf32> -> vector<16x64xf32>
    %c2_135 = arith.constant 2 : index
    %c0_136 = arith.constant 0 : index
    %c0_137 = arith.constant 0 : index
    %260 = vector.load %arg11[%c2_135, %c0_136, %c0_137] : memref<3x64x64xf32, #tpu.memory_space<vmem>>, vector<1x64x64xf32>
    %261 = vector.shape_cast %260 : vector<1x64x64xf32> to vector<64x64xf32>
    %cst_138 = arith.constant dense<0.000000e+00> : vector<16x64xf32>
    %262 = tpu.matmul %256, %261, %cst_138 {dimension_numbers = #tpu.dot_dimension_numbers<[1], [0], [0], [1], [0, 0, 1, 1], [], []>} : vector<16x64xf32>, vector<64x64xf32>, vector<16x64xf32> -> vector<16x64xf32>
    %263 = arith.negf %259 : vector<16x64xf32>
    %264 = math.exp %263 : vector<16x64xf32>
    %cst_139 = arith.constant 1.000000e+00 : f32
    %265 = vector.broadcast %cst_139 : f32 to vector<16x64xf32>
    %266 = arith.addf %265, %264 : vector<16x64xf32>
    %267 = arith.divf %265, %266 : vector<16x64xf32>
    %268 = arith.mulf %259, %267 : vector<16x64xf32>
    %269 = arith.mulf %268, %262 : vector<16x64xf32>
    %c2_140 = arith.constant 2 : index
    %c0_141 = arith.constant 0 : index
    %c0_142 = arith.constant 0 : index
    %270 = vector.load %arg10[%c2_140, %c0_141, %c0_142] : memref<3x64x64xf32, #tpu.memory_space<vmem>>, vector<1x64x64xf32>
    %271 = vector.shape_cast %270 : vector<1x64x64xf32> to vector<64x64xf32>
    %cst_143 = arith.constant dense<0.000000e+00> : vector<16x64xf32>
    %272 = tpu.matmul %269, %271, %cst_143 {dimension_numbers = #tpu.dot_dimension_numbers<[1], [0], [0], [1], [0, 0, 1, 1], [], []>} : vector<16x64xf32>, vector<64x64xf32>, vector<16x64xf32> -> vector<16x64xf32>
    %273 = arith.addf %242, %272 : vector<16x64xf32>
    %c0_144 = arith.constant 0 : index
    %c0_145 = arith.constant 0 : index
    %274 = vector.load %arg12[%c0_144, %c0_145] : memref<1x64xf32, #tpu.memory_space<vmem>>, vector<1x64xf32>
    %275 = arith.mulf %273, %273 : vector<16x64xf32>
    %cst_146 = arith.constant dense<0.000000e+00> : vector<16xf32>
    %276 = vector.multi_reduction <add>, %275, %cst_146 [1] : vector<16x64xf32> to vector<16xf32>
    %277 = vector.shape_cast %276 : vector<16xf32> to vector<16x1xf32>
    %cst_147 = arith.constant 6.400000e+01 : f32
    %278 = vector.broadcast %cst_147 : f32 to vector<16x1xf32>
    %279 = arith.divf %277, %278 : vector<16x1xf32>
    %cst_148 = arith.constant 9.99999997E-7 : f32
    %280 = vector.broadcast %cst_148 : f32 to vector<16x1xf32>
    %281 = arith.addf %279, %280 : vector<16x1xf32>
    %282 = math.rsqrt %281 : vector<16x1xf32>
    %283 = vector.broadcast %282 : vector<16x1xf32> to vector<16x64xf32>
    %284 = arith.mulf %273, %283 : vector<16x64xf32>
    %285 = vector.broadcast %274 : vector<1x64xf32> to vector<16x64xf32>
    %286 = arith.mulf %284, %285 : vector<16x64xf32>
    %c0_149 = arith.constant 0 : index
    %c0_150 = arith.constant 0 : index
    %287 = vector.load %arg13[%c0_149, %c0_150] : memref<64x32xf32, #tpu.memory_space<vmem>>, vector<64x32xf32>
    %cst_151 = arith.constant dense<0.000000e+00> : vector<16x32xf32>
    %288 = tpu.matmul %286, %287, %cst_151 {dimension_numbers = #tpu.dot_dimension_numbers<[1], [0], [0], [1], [0, 0, 1, 1], [], []>} : vector<16x64xf32>, vector<64x32xf32>, vector<16x32xf32> -> vector<16x32xf32>
    %c0_152 = arith.constant 0 : index
    %c0_153 = arith.constant 0 : index
    %289 = vector.load %arg14[%c0_152, %c0_153] : memref<1x32xf32, #tpu.memory_space<vmem>>, vector<1x32xf32>
    %290 = vector.broadcast %289 : vector<1x32xf32> to vector<16x32xf32>
    %291 = arith.addf %288, %290 : vector<16x32xf32>
    %292 = arith.negf %291 : vector<16x32xf32>
    %293 = math.exp %292 : vector<16x32xf32>
    %cst_154 = arith.constant 1.000000e+00 : f32
    %294 = vector.broadcast %cst_154 : f32 to vector<16x32xf32>
    %295 = arith.addf %294, %293 : vector<16x32xf32>
    %296 = arith.divf %294, %295 : vector<16x32xf32>
    %c0_155 = arith.constant 0 : index
    %c0_156 = arith.constant 0 : index
    %297 = vector.load %arg15[%c0_155, %c0_156] : memref<16x32xf32, #tpu.memory_space<vmem>>, vector<16x32xf32>
    tpu.vector_store %arg15[%c0_155, %c0_156], %296 {strides = array<i32>} : memref<16x32xf32, #tpu.memory_space<vmem>>, vector<16x32xf32>,
    return
  }
}

</mosaic_0001>

<bundles_post_ra>
// kernel: tpu_custom_call.1
= control target key start
LH: loop header
LB: loop body
LE: loop exit
PB: predicated region body
PF: predicated region fallthrough
CT: control target
= control target key end

     0   :  { %20 = vsyncpa [#allocation3], 0  ;;  %s8408_s0 = inlined_call_operand.vmem [shape: f32[16,16], index: 0, kind: input, shape index: {}]   ;;  %s8409_s1 = inlined_call_operand.vmem [shape: f32[16,64], index: 1, kind: input, shape index: {}]   ;;  %s8410_s2 = inlined_call_operand.vmem [shape: f32[1,64], index: 2, kind: input, shape index: {}]   ;;  %s8411_s3 = inlined_call_operand.vmem [shape: f32[3,1,64], index: 3, kind: input, shape index: {}]   ;;  %s8412_s4 = inlined_call_operand.vmem [shape: f32[3,1,64], index: 4, kind: input, shape index: {}]   ;;  %s8413_s5 = inlined_call_operand.hbm [shape: f32[3,64,64], index: 5, kind: input, shape index: {}]   ;;  %s8414_s6 = inlined_call_operand.hbm [shape: f32[3,64,64], index: 6, kind: input, shape index: {}]   ;;  %s8415_s7 = inlined_call_operand.hbm [shape: f32[3,64,64], index: 7, kind: input, shape index: {}]   ;;  %s8416_s8 = inlined_call_operand.hbm [shape: f32[3,64,64], index: 8, kind: input, shape index: {}]   ;;  %s8417_s9 = inlined_call_operand.hbm [shape: f32[3,64,64], index: 9, kind: input, shape index: {}]   ;;  %s8418_s10 = inlined_call_operand.hbm [shape: f32[3,64,64], index: 10, kind: input, shape index: {}]   ;;  %s8419_s11 = inlined_call_operand.hbm [shape: f32[3,64,64], index: 11, kind: input, shape index: {}]   ;;  %s8420_s12 = inlined_call_operand.vmem [shape: f32[1,64], index: 12, kind: input, shape index: {}]   ;;  %s8421_s13 = inlined_call_operand.vmem [shape: f32[64,32], index: 13, kind: input, shape index: {}]   ;;  %s8422_s14 = inlined_call_operand.vmem [shape: f32[1,32], index: 14, kind: input, shape index: {}]   ;;  %s8423_s15 = inlined_call_operand.hbm [shape: f32[16,32], index: 15, kind: output, shape index: {}]  }
   0x1   :  { %21 = vsyncpa [#allocation6], 0 }
   0x2   :  { %22 = vsyncpa [#allocation9], 0 }
   0x3   :  { %23 = vsyncpa [#allocation12], 0 }
   0x4   :  { %24 = vsyncpa [#allocation4], 0  ;;  %s52_s20 = sshll.u32 %s8414_s6, 4  ;;  %s6430_s21 = smov [#allocation5]   ;;  %s53_s20 = int_to_ptr.hbm [resolvable:$true] %s52_s20 }
   0x5   :  { %s54_s22 = sshll.u32 %s6430_s21, 4  ;;  %s78_s25 = sshll.u32 %s8416_s8, 4  ;;  %s55_s22 = int_to_ptr.vmem [resolvable:$true] %s54_s22  ;;  %s79_s25 = int_to_ptr.hbm [resolvable:$true] %s78_s25 }
   0x6   :  { %s6431_s26 = smov 128   ;;  %s6432_s27 = smov 8  }
   0x7   :  { %60 = dma.hbm_to_vmem [thread:$0]  %s53_s20, 3072, %s55_s22, [#allocation6], %s6431_s26, %s6431_s26, %s6432_s27  }
   0x8   :  { %s6433_s28 = smov [#allocation8]   ;;  %s104_s6 = sshll.u32 %s8418_s10, 4  ;;  %s105_s6 = int_to_ptr.hbm [resolvable:$true] %s104_s6 }
   0x9   :  { %s80_s29 = sshll.u32 %s6433_s28, 4  ;;  %s39_s18 = sshll.u32 %s8413_s5, 4  ;;  %s81_s29 = int_to_ptr.vmem [resolvable:$true] %s80_s29  ;;  %s40_s18 = int_to_ptr.hbm [resolvable:$true] %s39_s18 }
   0xa   :  { %86 = dma.hbm_to_vmem [thread:$0]  %s79_s25, 3072, %s81_s29, [#allocation9], %s6431_s26, %s6431_s26, %s6432_s27  }
   0xb   :  { %s6434_s19 = smov [#allocation11]   ;;  %s6435_s20 = smov [#allocation2]  }
   0xc   :  { %s106_s21 = sshll.u32 %s6434_s19, 4  ;;  %s41_s10 = sshll.u32 %s6435_s20, 4  ;;  %s107_s21 = int_to_ptr.vmem [resolvable:$true] %s106_s21  ;;  %s42_s10 = int_to_ptr.vmem [resolvable:$true] %s41_s10 }
   0xd   :  { %112 = dma.hbm_to_vmem [thread:$0]  %s105_s6, 3072, %s107_s21, [#allocation12], %s6431_s26, %s6431_s26, %s6432_s27  }
   0xe   :  { %s65_s24 = sshll.u32 %s8415_s7, 4  ;;  %s91_s28 = sshll.u32 %s8417_s9, 4  ;;  %s66_s24 = int_to_ptr.hbm [resolvable:$true] %s65_s24  ;;  %s92_s28 = int_to_ptr.hbm [resolvable:$true] %s91_s28 }
   0xf   :  { %47 = dma.hbm_to_vmem [thread:$0]  %s40_s18, 3072, %s42_s10, [#allocation3], %s6431_s26, %s6431_s26, %s6432_s27  }
  0x10   :  { %s6436_s29 = smov [#allocation7]   ;;  %s6437_s16 = smov [#allocation10]  }
  0x11   :  { %s67_s30 = sshll.u32 %s6436_s29, 4  ;;  %s93_s7 = sshll.u32 %s6437_s16, 4  ;;  %s68_s30 = int_to_ptr.vmem [resolvable:$true] %s67_s30  ;;  %s94_s7 = int_to_ptr.vmem [resolvable:$true] %s93_s7 }
  0x12   :  { %73 = dma.hbm_to_vmem [thread:$0]  %s66_s24, 3072, %s68_s30, [#allocation6], %s6431_s26, %s6431_s26, %s6432_s27  }
  0x13   :  { %s117_s17 = sshll.u32 %s8419_s11, 4  ;;  %s6438_s9 = smov [#allocation13]   ;;  %s118_s17 = int_to_ptr.hbm [resolvable:$true] %s117_s17 }
  0x14   :  { %99 = dma.hbm_to_vmem [thread:$0]  %s92_s28, 3072, %s94_s7, [#allocation9], %s6431_s26, %s6431_s26, %s6432_s27  }
  0x15   :  { %s119_s18 = sshll.u32 %s6438_s9, 4  ;;  %s120_s18 = int_to_ptr.vmem [resolvable:$true] %s119_s18 }
  0x16   :  { %125 = dma.hbm_to_vmem [thread:$0]  %s118_s17, 3072, %s120_s18, [#allocation12], %s6431_s26, %s6431_s26, %s6432_s27  }
  0x17   :  { %6420 = dma.done.wait [#allocation3], 3072  }
  0x18   :  { %6421 = vsyncadd [#allocation3], 4294964224 }
  0x19   :  { %6422 = dma.done.wait [#allocation6], 6144  }
  0x1a   :  { %6423 = vsyncadd [#allocation6], 4294961152 }
  0x1b   :  { %6424 = dma.done.wait [#allocation9], 6144  }
  0x1c   :  { %6425 = vsyncadd [#allocation9], 4294961152 }
  0x1d   :  { %6426 = dma.done.wait [#allocation12], 6144  }
  0x1e   :  { %6427 = vsyncadd [#allocation12], 4294961152  ;;  %v163_v0 = vld [vmem:[%s8409_s1 + $0x8] sm:$0xff]  ;;  %v162_v1 = vld [vmem:[%s8409_s1] sm:$0xff]  ;;  %vm168_vm0 = vcmask 130048   ;;  %vm206_vm1 = vcmask 523264  }
  0x1f   :  { %189 = vmatpush.msra.mxu0 %v163_v0  ;;  %v160_v2 = vld [vmem:[%s8408_s0] sm:$0xff]  ;;  %v161_v3 = vld [vmem:[%s8408_s0 + $0x8] sm:$0xff]  ;;  %v6439_v13 = vmov 64.0   ;;  %v258_v15 = vld [vmem:[#allocation2 + $0x38] sm:$0xff]  ;;  %s6441_s28 = smov 80   ;;  %s6442_s29 = smov 96  }
  0x20   :  { %v6061_v4 = vld [vmem:[%s8410_s2] ss:$0 sm:$0xff]  ;;  %6070 = vrcp.f32 %v6439_v13  ;;  %v297_v16 = vld [vmem:[#allocation5 + $0x38] sm:$0xff]  ;;  %273 = vmatpush.msra.mxu1 %v258_v15  ;;  %v257_v18 = vld [vmem:[#allocation2 + $0x30] sm:$0xff]  ;;  %s6440_s2 = smov 112   ;;  %vm373_vm9 = vcmask 1047556  }
  0x21   :  { %190 = vmatpush.msra.mxu0 %v162_v1  ;;  %v328_v17 = vld [vmem:[#allocation7 + $0x38] sm:$0xff]  ;;  %306 = vmatpush.msra.mxu2 %v297_v16  ;;  %v296_v19 = vld [vmem:[#allocation5 + $0x30] sm:$0xff]  ;;  %v256_v22 = vld [vmem:[#allocation2 + $0x28] sm:$0xff]  ;;  %v6443_v15 = vmov 1983009808   ;;  %vm1291_vm11 = vcmask 64512  }
  0x22   :  { %5859 = vmatmul.msk.f32.vlgmr.msra.gmra.mxu0 %vm168_vm0, %v160_v2  ;;  %v327_v20 = vld [vmem:[#allocation7 + $0x30] sm:$0xff]  ;;  %5989 = vmatpush.msra.mxu3 %v328_v17  ;;  %v295_v23 = vld [vmem:[#allocation5 + $0x28] sm:$0xff]  ;;  %v255_v25 = vld [vmem:[#allocation2 + $0x20] sm:$0xff]  ;;  %v378_v16 = vunpack.c.l.s4 %v6443_v15  ;;  %s6445_s30 = smov 48   ;;  %s6446_s16 = smov 32   ;;  %vm1810_vm12 = vcmask 261120  }
  0x23   :  { %337 = vmatpush.msrb.mxu0 %v328_v17  ;;  %274 = vmatpush.msra.mxu1 %v257_v18  ;;  %v326_v24 = vld [vmem:[#allocation7 + $0x28] sm:$0xff]  ;;  %v294_v26 = vld [vmem:[#allocation5 + $0x20] sm:$0xff]  ;;  %v254_v29 = vld [vmem:[#allocation2 + $0x18] sm:$0xff]  ;;  %s6447_s7 = smov 16   ;;  %vm1813_vm13 = vcmask 392192   ;;  %s5843_s19 = sshll.u32 %s8423_s15, 4  ;;  %s5844_s19 = int_to_ptr.hbm [resolvable:$true] %s5843_s19 }
  0x24   :  { %307 = vmatpush.msra.mxu2 %v296_v19  ;;  %5990 = vmatpush.msra.mxu3 %v327_v20  ;;  %v325_v27 = vld [vmem:[#allocation7 + $0x20] sm:$0xff]  ;;  %v293_v30 = vld [vmem:[#allocation5 + $0x18] sm:$0xff]  ;;  %v253_v32 = vld [vmem:[#allocation2 + $0x10] sm:$0xff] }
  0x25   :  { %338 = vmatpush.msrb.mxu0 %v327_v20  ;;  %275 = vmatpush.msra.mxu1 %v256_v22  ;;  %v324_v31 = vld [vmem:[#allocation7 + $0x18] sm:$0xff]  ;;  %v292_v33 = vld [vmem:[#allocation5 + $0x10] sm:$0xff]  ;;  %v252_v36 = vld [vmem:[#allocation2 + $0x8] sm:$0xff]  ;;  %v6649_v20 = vunpack.c.0.s8 %v378_v16 }
  0x26   :  { %v6598_v14 = vpop.eup %6070  ;;  %308 = vmatpush.msra.mxu2 %v295_v23  ;;  %5991 = vmatpush.msra.mxu3 %v326_v24  ;;  %v323_v34 = vld [vmem:[#allocation7 + $0x10] sm:$0xff]  ;;  %v291_v37 = vld [vmem:[#allocation5 + $0x8] sm:$0xff]  ;;  %v251_v39 = vld [vmem:[#allocation2] sm:$0xff]  ;;  %v6444_v23 = vmov 1934713408  }
  0x27   :  { %v214_v21 = vmul.f32 64.0, %v6598_v14  ;;  %339 = vmatpush.msrb.mxu0 %v326_v24  ;;  %276 = vmatpush.msra.mxu1 %v255_v25  ;;  %v322_v38 = vld [vmem:[#allocation7 + $0x8] sm:$0xff]  ;;  %v290_v40 = vld [vmem:[#allocation5] sm:$0xff]  ;;  %vm218_vm2 = vweird.f32 %v6598_v14  ;;  %v402_v24 = vunpack.c.l.s4 %v6444_v23 }
  0x28   :  { %309 = vmatpush.msra.mxu2 %v294_v26  ;;  %5992 = vmatpush.msra.mxu3 %v325_v27  ;;  %v321_v41 = vld [vmem:[#allocation7] sm:$0xff] }
  0x29   :  { %v215_v28 = vsub.f32 1.0, %v214_v21  ;;  %340 = vmatpush.msrb.mxu0 %v325_v27  ;;  %277 = vmatpush.msra.mxu1 %v254_v29  ;;  %v6062_v58 = vld [vmem:[%s8411_s3] ss:$0 sm:$0xff] }
  0x2a   :  { %5860 = vmatmul.msk.f32.gmra.mxu0 %vm168_vm0, %v161_v3  ;;  %310 = vmatpush.msra.mxu2 %v293_v30 }
  0x2b   :  { %341 = vmatpush.msrb.mxu0 %v324_v31  ;;  %5993 = vmatpush.msra.mxu3 %v324_v31  ;;  %v216_v35 = vmul.f32 %v6598_v14, %v215_v28 }
  0x2c   :  { %278 = vmatpush.msra.mxu1 %v253_v32  ;;  %311 = vmatpush.msra.mxu2 %v292_v33 }
  0x2d   :  { %342 = vmatpush.msrb.mxu0 %v323_v34  ;;  %5994 = vmatpush.msra.mxu3 %v323_v34  ;;  %v217_v42 = vadd.f32 %v6598_v14, %v216_v35  ;;  %v6655_v34 = vunpack.c.0.s8 %v402_v24 }
  0x2e   :  { %279 = vmatpush.msra.mxu1 %v252_v36  ;;  %312 = vmatpush.msra.mxu2 %v291_v37 }
  0x2f   :  { %343 = vmatpush.msrb.mxu0 %v322_v38  ;;  %5995 = vmatpush.msra.mxu3 %v322_v38  ;;  %v6605_v43 = vsel %vm218_vm2, %v6598_v14, %v217_v42 }
  0x30   :  { %280 = vmatpush.msra.mxu1 %v251_v39  ;;  %313 = vmatpush.msra.mxu2 %v290_v40 }
  0x31   :  { %344 = vmatpush.msrb.mxu0 %v321_v41  ;;  %5996 = vmatpush.msra.mxu3 %v321_v41 }
  0x9f   :  { %v192_v5 = vpop.f32.mrf.mxu0 }
  0xa0   :  { %v6588_v6 = vadd.f32 %v6061_v4, %v192_v5 }
  0xa2   :  { %v204_v7 = vmul.f32 %v6588_v6, %v6588_v6 }
  0xa4   :  { %v207_v8 = vsel %vm206_vm1, %v204_v7, 0.0 }
  0xa5   :  { %208 = vadd.xlane.f32.xlu0 %v207_v8 }
  0xa7   :  { %v195_v9 = vpop.f32.mrf.mxu0 }
  0xa8   :  { %v6593_v10 = vadd.f32 %v6061_v4, %v195_v9 }
  0xaa   :  { %v205_v11 = vmul.f32 %v6593_v10, %v6593_v10 }
  0xac   :  { %v210_v12 = vsel %vm206_vm1, %v205_v11, 0.0 }
  0xad   :  { %211 = vadd.xlane.f32.xlu0 %v210_v12 }
 0x118   :  { %v209_v44 = vpop.xlane.xlu0 %208 }
 0x119   :  { %v220_v45 = vmul.f32 %v6605_v43, %v209_v44 }
 0x11b   :  { %v222_v46 = vadd.f32 1e-06, %v220_v45 }
 0x11d   :  { %6072 = vrsqrt.f32 %v222_v46  ;;  %vm230_vm4 = vweird.f32 %v222_v46 }
 0x120   :  { %v212_v47 = vpop.xlane.xlu0 %211 }
 0x121   :  { %v221_v48 = vmul.f32 %v6605_v43, %v212_v47 }
 0x123   :  { %v6073_v49 = vpop.eup %6072  ;;  %v223_v50 = vadd.f32 1e-06, %v221_v48 }
 0x124   :  { %v225_v51 = vmul.f32 %v6073_v49, %v222_v46  ;;  %vm231_vm3 = vweird.f32 %v6073_v49 }
 0x125   :  { %6074 = vrsqrt.f32 %v223_v50  ;;  %vm232_vm5 = vmor %vm230_vm4, %vm231_vm3  ;;  %vm240_vm6 = vweird.f32 %v223_v50 }
 0x126   :  { %v226_v52 = vmul.f32 %v6073_v49, %v225_v51 }
 0x128   :  { %v227_v53 = vmul.f32 0.5, %v226_v52 }
 0x12a   :  { %v228_v54 = vsub.f32 1.5, %v227_v53 }
 0x12b   :  { %v6075_v55 = vpop.eup %6074 }
 0x12c   :  { %v229_v56 = vmul.f32 %v6073_v49, %v228_v54  ;;  %v235_v57 = vmul.f32 %v6075_v55, %v223_v50  ;;  %vm241_vm7 = vweird.f32 %v6075_v55 }
 0x12d   :  { %vm242_vm8 = vmor %vm240_vm6, %vm241_vm7 }
 0x12e   :  { %v236_v59 = vmul.f32 %v6075_v55, %v235_v57  ;;  %v233_v60 = vsel %vm232_vm5, %v6073_v49, %v229_v56 }
 0x12f   :  { %v244_v61 = vmul.f32 %v233_v60, %v6588_v6 }
 0x130   :  { %v237_v62 = vmul.f32 0.5, %v236_v59 }
 0x131   :  { %v249_v63 = vmul.f32 %v6062_v58, %v244_v61 }
 0x132   :  { %v238_v0 = vsub.f32 1.5, %v237_v62 }
 0x133   :  { %5861 = vmatmul.msk.f32.vlgmr.msra.gmra.mxu1 %vm206_vm1, %v249_v63  ;;  %5863 = vmatmul.msk.f32.vlgmr.msra.gmra.mxu2 %vm206_vm1, %v249_v63 }
 0x134   :  { %v239_v1 = vmul.f32 %v6075_v55, %v238_v0  ;;  %5865 = vmatmul.msk.f32.vlgmr.msrb.gmra.mxu0 %vm206_vm1, %v249_v63 }
 0x136   :  { %v243_v2 = vsel %vm242_vm8, %v6075_v55, %v239_v1 }
 0x137   :  { %v245_v3 = vmul.f32 %v243_v2, %v6593_v10 }
 0x139   :  { %v250_v4 = vmul.f32 %v6062_v58, %v245_v3 }
 0x13b   :  { %5862 = vmatmul.msk.f32.gmra.mxu1 %vm206_vm1, %v250_v4  ;;  %5864 = vmatmul.msk.f32.gmra.mxu2 %vm206_vm1, %v250_v4 }
 0x13c   :  { %5866 = vmatmul.msk.f32.vlgmr.msra.gmra.mxu3 %vm206_vm1, %v250_v4 }
 0x1b0   :  { %v282_v5 = vpop.f32.mrf.mxu1 }
 0x1b1   :  { %v288_v7 = vmul.f32 0.25, %v282_v5 }
 0x1b3   :  { %354 = vrot.lane.b32.xlu1 %v288_v7, %s6440_s2  ;;  %366 = vrot.lane.b32.xlu0 %v288_v7, %s6441_s28  ;;  %v375_v19 = vrot.slane %v288_v7, 4 }
 0x1b4   :  { %360 = vrot.lane.b32.xlu2 %v288_v7, %s6442_s29 }
 0x1b6   :  { %v6623_v9 = vpop.f32.mrf.mxu2 }
 0x1b7   :  { %v615_v50 = vrot.slane %v6623_v9, 4 }
 0x1b8   :  { %v285_v8 = vpop.f32.mrf.mxu1 }
 0x1b9   :  { %v6625_v11 = vmul.f32 0.25, %v285_v8 }
 0x1bb   :  { %601 = vrot.lane.b32.xlu1 %v6623_v9, %s6442_s29  ;;  %368 = vrot.lane.b32.xlu0 %v6625_v11, %s6441_s28  ;;  %v431_v51 = vrot.slane %v6625_v11, 4 }
 0x1bc   :  { %595 = vrot.lane.b32.xlu2 %v6623_v9, %s6440_s2 }
 0x1be   :  { %v6633_v12 = vpop.f32.mrf.mxu2 }
 0x1c3   :  { %607 = vrot.lane.b32.xlu1 %v6623_v9, %s6441_s28 }
 0x1c4   :  { %597 = vrot.lane.b32.xlu2 %v6633_v12, %s6440_s2 }
 0x1cb   :  { %603 = vrot.lane.b32.xlu1 %v6633_v12, %s6442_s29 }
 0x1cc   :  { %609 = vrot.lane.b32.xlu2 %v6633_v12, %s6441_s28 }
 0x1d3   :  { %356 = vrot.lane.b32.xlu1 %v6625_v11, %s6440_s2 }
 0x1d4   :  { %362 = vrot.lane.b32.xlu2 %v6625_v11, %s6442_s29 }
 0x20e   :  { %v361_v13 = vpop.permute.xlu2 %360 }
 0x20f   :  { %v372_v17 = vrot.slane %v361_v13, 4  ;;  %v376_v22 = vsel %vm373_vm9, %v361_v13, %v375_v19 }
 0x210   :  { %v384_v26 = vperm.slane %v376_v22, %v6649_v20 }
 0x211   :  { %v374_v21 = vsel %vm373_vm9, %v372_v17, %v288_v7 }
 0x212   :  { %v380_v25 = vperm.slane %v374_v21, %v6649_v20  ;;  %v411_v38 = vrot.slane %v384_v26, 4  ;;  %v671_v21 = vrot.slane %v6633_v12, 4 }
 0x214   :  { %v399_v37 = vrot.slane %v380_v25, 4 }
 0x216   :  { %v6647_v14 = vpop.permute.xlu2 %595 }
 0x217   :  { %v627_v16 = vrot.slane %v6647_v14, 4 }
 0x21e   :  { %v598_v18 = vpop.permute.xlu2 %597 }
 0x21f   :  { %v683_v33 = vrot.slane %v598_v18, 4 }
 0x225   :  { %v355_v27 = vpop.permute.xlu1 %354  ;;  %v367_v28 = vpop.permute.xlu0 %366 }
 0x226   :  { %v387_v29 = vrot.slane %v355_v27, 4  ;;  %v610_v30 = vpop.permute.xlu2 %609  ;;  %v385_v31 = vrot.slane %v367_v28, 4 }
 0x227   :  { %v681_v32 = vrot.slane %v610_v30, 4  ;;  %v684_v42 = vsel %vm373_vm9, %v610_v30, %v683_v33 }
 0x228   :  { %v386_v35 = vsel %vm373_vm9, %v385_v31, %v355_v27  ;;  %v388_v36 = vsel %vm373_vm9, %v367_v28, %v387_v29  ;;  %v6673_v53 = vperm.slane %v684_v42, %v6649_v20 }
 0x229   :  { %v392_v39 = vperm.slane %v386_v35, %v6649_v20  ;;  %v396_v40 = vperm.slane %v388_v36, %v6649_v20  ;;  %v682_v41 = vsel %vm373_vm9, %v681_v32, %v598_v18 }
 0x22a   :  { %v6670_v52 = vperm.slane %v682_v41, %v6649_v20  ;;  %v705_v23 = vrot.slane %v6673_v53, 4 }
 0x22b   :  { %v397_v44 = vrot.slane %v392_v39, 4  ;;  %v400_v45 = vsel %vm373_vm9, %v392_v39, %v399_v37  ;;  %v409_v46 = vrot.slane %v396_v40, 4  ;;  %v412_v47 = vsel %vm373_vm9, %v396_v40, %v411_v38 }
 0x22c   :  { %v408_v48 = vperm.slane %v400_v45, %v6655_v34  ;;  %v420_v49 = vperm.slane %v412_v47, %v6655_v34  ;;  %v693_v22 = vrot.slane %v6670_v52, 4 }
 0x22d   :  { %v398_v54 = vsel %vm373_vm9, %v397_v44, %v380_v25  ;;  %v410_v55 = vsel %vm373_vm9, %v409_v46, %v384_v26  ;;  %v602_v56 = vpop.permute.xlu1 %601  ;;  %v6689_v19 = vpop.permute.xlu0 %368 }
 0x22e   :  { %v404_v57 = vperm.slane %v398_v54, %v6655_v34  ;;  %v416_v58 = vperm.slane %v410_v55, %v6655_v34  ;;  %v423_v59 = vrot.slane %v408_v48, 4  ;;  %v427_v60 = vrot.slane %v420_v49, 4  ;;  %v363_v61 = vpop.permute.xlu2 %362 }
 0x22f   :  { %v613_v62 = vrot.slane %v602_v56, 4  ;;  %v616_v63 = vsel %vm373_vm9, %v602_v56, %v615_v50  ;;  %v429_v0 = vrot.slane %v363_v61, 4  ;;  %v432_v1 = vsel %vm373_vm9, %v363_v61, %v431_v51 }
 0x230   :  { %v421_v2 = vrot.slane %v404_v57, 4  ;;  %v424_v3 = vsel %vm373_vm9, 0.0, %v423_v59  ;;  %v425_v4 = vrot.slane %v416_v58, 4  ;;  %v428_v5 = vsel %vm373_vm9, 0.0, %v427_v60 }
 0x231   :  { %v490_v7 = vrot.slane %v424_v3, 4  ;;  %v496_v8 = vsel %vm373_vm9, %v427_v60, %v416_v58  ;;  %v501_v13 = vrot.slane %v428_v5, 4  ;;  %v614_v15 = vsel %vm373_vm9, %v613_v62, %v6623_v9 }
 0x232   :  { %v426_v17 = vsel %vm373_vm9, 0.0, %v425_v4  ;;  %v624_v18 = vperm.slane %v616_v63, %v6649_v20  ;;  %v500_v24 = vperm.slane %v496_v8, %v6649_v20  ;;  %v620_v9 = vperm.slane %v614_v15, %v6649_v20 }
 0x233   :  { %v502_v25 = vsel %vm373_vm9, %v501_v13, %v426_v17  ;;  %v430_v26 = vsel %vm373_vm9, %v429_v0, %v6625_v11  ;;  %v6700_v27 = vperm.slane %v432_v1, %v6649_v20  ;;  %v422_v28 = vsel %vm373_vm9, 0.0, %v421_v2 }
 0x234   :  { %v441_v29 = vrot.slane %v6689_v19, 4  ;;  %v485_v31 = vsel %vm373_vm9, %v423_v59, %v404_v57  ;;  %v491_v32 = vsel %vm373_vm9, %v490_v7, %v422_v28  ;;  %v506_v33 = vperm.slane %v502_v25, %v6649_v20 }
 0x235   :  { %v608_v30 = vpop.permute.xlu1 %607  ;;  %v651_v35 = vrot.slane %v624_v18, 4  ;;  %v489_v11 = vperm.slane %v485_v31, %v6649_v20  ;;  %v495_v39 = vperm.slane %v491_v32, %v6649_v20  ;;  %v521_v41 = vrot.slane %v500_v24, 4 }
 0x236   :  { %v625_v36 = vrot.slane %v608_v30, 4  ;;  %v628_v37 = vsel %vm373_vm9, %v608_v30, %v627_v16  ;;  %v519_v40 = vrot.slane %v506_v33, 4  ;;  %v639_v42 = vrot.slane %v620_v9, 4 }
 0x237   :  { %v636_v38 = vperm.slane %v628_v37, %v6649_v20  ;;  %v6712_v44 = vperm.slane %v430_v26, %v6649_v20  ;;  %v509_v46 = vrot.slane %v489_v11, 4  ;;  %v507_v50 = vrot.slane %v495_v39, 4 }
 0x238   :  { %v626_v45 = vsel %vm373_vm9, %v625_v36, %v6647_v14  ;;  %v467_v51 = vrot.slane %v6700_v27, 4  ;;  %v522_v56 = vsel %vm373_vm9, %v506_v33, %v521_v41  ;;  %v520_v59 = vsel %vm373_vm9, %v519_v40, %v500_v24 }
 0x239   :  { %v632_v47 = vperm.slane %v626_v45, %v6649_v20  ;;  %v649_v48 = vrot.slane %v636_v38, 4  ;;  %v652_v49 = vsel %vm373_vm9, %v636_v38, %v651_v35  ;;  %v510_v55 = vsel %vm373_vm9, %v495_v39, %v509_v46 }
 0x23a   :  { %v660_v54 = vperm.slane %v652_v49, %v6655_v34  ;;  %v6728_v63 = vperm.slane %v510_v55, %v6655_v34  ;;  %v455_v0 = vrot.slane %v6712_v44, 4  ;;  %v6733_v3 = vperm.slane %v522_v56, %v6655_v34 }
 0x23b   :  { %v637_v57 = vrot.slane %v632_v47, 4  ;;  %v640_v58 = vsel %vm373_vm9, %v632_v47, %v639_v42  ;;  %v650_v14 = vsel %vm373_vm9, %v649_v48, %v624_v18  ;;  %v6736_v4 = vsel %vm373_vm9, %v507_v50, %v489_v11 }
 0x23c   :  { %v648_v60 = vperm.slane %v640_v58, %v6655_v34  ;;  %v656_v61 = vperm.slane %v650_v14, %v6655_v34  ;;  %v667_v62 = vrot.slane %v660_v54, 4  ;;  %v6742_v18 = vperm.slane %v520_v59, %v6655_v34 }
 0x23d   :  { %v638_v1 = vsel %vm373_vm9, %v637_v57, %v620_v9  ;;  %v604_v2 = vpop.permute.xlu1 %603  ;;  %v537_v26 = vrot.slane %v6728_v63, 4 }
 0x23e   :  { %v644_v5 = vperm.slane %v638_v1, %v6655_v34  ;;  %v663_v7 = vrot.slane %v648_v60, 4  ;;  %v665_v8 = vrot.slane %v656_v61, 4  ;;  %v668_v13 = vsel %vm373_vm9, 0.0, %v667_v62 }
 0x23f   :  { %v741_v15 = vrot.slane %v668_v13, 4  ;;  %v669_v16 = vrot.slane %v604_v2, 4  ;;  %v672_v17 = vsel %vm373_vm9, %v604_v2, %v671_v21  ;;  %v736_v37 = vsel %vm373_vm9, %v667_v62, %v656_v61 }
 0x240   :  { %v661_v24 = vrot.slane %v644_v5, 4  ;;  %v664_v25 = vsel %vm373_vm9, 0.0, %v663_v7  ;;  %v666_v9 = vsel %vm373_vm9, 0.0, %v665_v8  ;;  %v680_v31 = vperm.slane %v672_v17, %v6649_v20 }
 0x241   :  { %v730_v28 = vrot.slane %v664_v25, 4  ;;  %v670_v30 = vsel %vm373_vm9, %v669_v16, %v6633_v12  ;;  %v725_v32 = vsel %vm373_vm9, %v663_v7, %v644_v5  ;;  %v742_v36 = vsel %vm373_vm9, %v741_v15, %v666_v9 }
 0x242   :  { %v676_v21 = vperm.slane %v670_v30, %v6649_v20  ;;  %v662_v33 = vsel %vm373_vm9, 0.0, %v661_v24  ;;  %v729_v35 = vperm.slane %v725_v32, %v6649_v20  ;;  %v706_v11 = vsel %vm373_vm9, %v705_v23, %v680_v31 }
 0x243   :  { %v707_v38 = vrot.slane %v680_v31, 4  ;;  %v731_v12 = vsel %vm373_vm9, %v730_v28, %v662_v33  ;;  %v712_v41 = vperm.slane %v706_v11, %v6655_v34  ;;  %v6765_v42 = vperm.slane %v742_v36, %v6649_v20 }
 0x244   :  { %v694_v39 = vsel %vm373_vm9, %v693_v22, %v676_v21  ;;  %v695_v40 = vrot.slane %v676_v21, 4  ;;  %v735_v23 = vperm.slane %v731_v12, %v6649_v20  ;;  %v749_v48 = vrot.slane %v729_v35, 4 }
 0x245   :  { %v700_v45 = vperm.slane %v694_v39, %v6655_v34  ;;  %v708_v46 = vsel %vm373_vm9, %v6673_v53, %v707_v38  ;;  %v357_v47 = vpop.permute.xlu1 %356  ;;  %v721_v50 = vrot.slane %v712_v41, 4  ;;  %v740_v58 = vperm.slane %v736_v37, %v6649_v20 }
 0x246   :  { %v696_v49 = vsel %vm373_vm9, %v6670_v52, %v695_v40  ;;  %v716_v22 = vperm.slane %v708_v46, %v6655_v34  ;;  %v442_v54 = vsel %vm373_vm9, %v441_v29, %v357_v47  ;;  %v443_v57 = vrot.slane %v357_v47, 4 }
 0x247   :  { %v704_v55 = vperm.slane %v696_v49, %v6655_v34  ;;  %v717_v56 = vrot.slane %v700_v45, 4  ;;  %v448_v53 = vperm.slane %v442_v54, %v6649_v20  ;;  %v722_v14 = vsel %vm373_vm9, 0.0, %v721_v50 }
 0x248   :  { %v723_v59 = vrot.slane %v716_v22, 4  ;;  %v759_v52 = vrot.slane %v6765_v42, 4  ;;  %v444_v61 = vsel %vm373_vm9, %v6689_v19, %v443_v57  ;;  %v747_v1 = vrot.slane %v735_v23, 4 }
 0x249   :  { %v719_v60 = vrot.slane %v704_v55, 4  ;;  %v453_v62 = vrot.slane %v448_v53, 4  ;;  %v452_v5 = vperm.slane %v444_v61, %v6649_v20  ;;  %v456_v7 = vsel %vm373_vm9, %v448_v53, %v455_v0 }
 0x24a   :  { %v724_v29 = vsel %vm373_vm9, 0.0, %v723_v59  ;;  %v790_v2 = vsel %vm373_vm9, %v723_v59, %v712_v41  ;;  %v718_v8 = vsel %vm373_vm9, 0.0, %v717_v56  ;;  %v750_v16 = vsel %vm373_vm9, %v735_v23, %v749_v48 }
 0x24b   :  { %v720_v13 = vsel %vm373_vm9, 0.0, %v719_v60  ;;  %v795_v15 = vrot.slane %v724_v29, 4  ;;  %v779_v17 = vsel %vm373_vm9, %v719_v60, %v700_v45  ;;  %v454_v19 = vsel %vm373_vm9, %v453_v62, %v6712_v44 }
 0x24c   :  { %v464_v24 = vperm.slane %v456_v7, %v6655_v34  ;;  %v465_v25 = vrot.slane %v452_v5, 4  ;;  %v784_v9 = vrot.slane %v720_v13, 4  ;;  %v6796_v28 = vperm.slane %v790_v2, %v6649_v20 }
 0x24d   :  { %v460_v0 = vperm.slane %v454_v19, %v6655_v34  ;;  %v468_v30 = vsel %vm373_vm9, %v452_v5, %v467_v51  ;;  %v796_v31 = vsel %vm373_vm9, %v795_v15, %v722_v14  ;;  %v758_v37 = vperm.slane %v750_v16, %v6655_v34 }
 0x24e   :  { %v466_v32 = vsel %vm373_vm9, %v465_v25, %v6700_v27  ;;  %v476_v44 = vperm.slane %v468_v30, %v6655_v34  ;;  %v479_v21 = vrot.slane %v464_v24, 4  ;;  %v761_v11 = vrot.slane %v740_v58, 4 }
 0x24f   :  { %v472_v33 = vperm.slane %v466_v32, %v6655_v34  ;;  %v477_v36 = vrot.slane %v460_v0, 4  ;;  %v748_v51 = vsel %vm373_vm9, %v747_v1, %v729_v35  ;;  %v815_v46 = vrot.slane %v6796_v28, 4 }
 0x250   :  { %v480_v38 = vsel %vm373_vm9, 0.0, %v479_v21  ;;  %v483_v12 = vrot.slane %v476_v44, 4  ;;  %v539_v39 = vsel %vm373_vm9, %v479_v21, %v460_v0  ;;  %v762_v23 = vsel %vm373_vm9, %v6765_v42, %v761_v11 }
 0x251   :  { %v478_v40 = vsel %vm373_vm9, 0.0, %v477_v36  ;;  %v481_v41 = vrot.slane %v472_v33, 4  ;;  %v6813_v27 = vperm.slane %v539_v39, %v6649_v20  ;;  %v544_v45 = vrot.slane %v480_v38, 4 }
 0x252   :  { %v484_v47 = vsel %vm373_vm9, 0.0, %v483_v12  ;;  %v754_v48 = vperm.slane %v748_v51, %v6655_v34  ;;  %v800_v49 = vperm.slane %v796_v31, %v6649_v20  ;;  %v550_v50 = vsel %vm373_vm9, %v483_v12, %v472_v33 }
 0x253   :  { %v482_v35 = vsel %vm373_vm9, 0.0, %v481_v41  ;;  %v545_v22 = vsel %vm373_vm9, %v544_v45, %v478_v40  ;;  %v555_v54 = vrot.slane %v484_v47, 4  ;;  %v770_v55 = vperm.slane %v762_v23, %v6655_v34 }
 0x254   :  { %v760_v56 = vsel %vm373_vm9, %v759_v52, %v740_v58  ;;  %v777_v57 = vrot.slane %v758_v37, 4  ;;  %v549_v53 = vperm.slane %v545_v22, %v6649_v20  ;;  %v563_v42 = vrot.slane %v6813_v27, 4 }
 0x255   :  { %v766_v14 = vperm.slane %v760_v56, %v6655_v34  ;;  %v773_v59 = vrot.slane %v754_v48, 4  ;;  %v775_v60 = vrot.slane %v770_v55, 4  ;;  %v535_v62 = vrot.slane %v6733_v3, 4 }
 0x256   :  { %v778_v61 = vsel %vm373_vm9, %v770_v55, %v777_v57  ;;  %v514_v1 = vperm.slane %v6736_v4, %v6655_v34  ;;  %v531_v58 = vrot.slane %v6742_v18, 4  ;;  %v538_v52 = vsel %vm373_vm9, %v6733_v3, %v537_v26 }
 0x257   :  { %v771_v29 = vrot.slane %v766_v14, 4  ;;  %5873 = vmatpush.xpose.msk.msrb.mxu2 %vm168_vm0, %v778_v61  ;;  %v783_v2 = vperm.slane %v779_v17, %v6649_v20  ;;  %v776_v5 = vsel %vm373_vm9, %v775_v60, %v758_v37  ;;  %v774_v7 = vsel %vm373_vm9, %v766_v14, %v773_v59  ;;  %v6894_v60 = vpop.f32.mrf.mxu0 }
 0x258   :  { %v785_v13 = vsel %vm373_vm9, %v784_v9, %v718_v8  ;;  %v816_v4 = vsel %vm373_vm9, %v800_v49, %v815_v46  ;;  %5871 = vmatpush.xpose.msk.msrb.mxu1 %vm168_vm0, %v776_v5  ;;  %v536_v3 = vsel %vm373_vm9, %v535_v62, %v6728_v63  ;;  %v813_v26 = vrot.slane %v800_v49, 4 }
 0x259   :  { %v772_v15 = vsel %vm373_vm9, %v771_v29, %v754_v48  ;;  %v789_v16 = vperm.slane %v785_v13, %v6649_v20  ;;  %v803_v19 = vrot.slane %v783_v2, 4  ;;  %v824_v24 = vperm.slane %v816_v4, %v6655_v34 }
 0x25a   :  { %5867 = vmatpush.xpose.msk.msra.mxu0 %vm168_vm0, %v772_v15  ;;  %5874 = vmatmul.msk.f32.vlgmr.msrb.gmra.mxu2 %vm168_vm0, %v538_v52  ;;  %v554_v8 = vperm.slane %v550_v50, %v6649_v20  ;;  %v556_v17 = vsel %vm373_vm9, %v555_v54, %v482_v35  ;;  %v532_v31 = vsel %vm373_vm9, %v531_v58, %v514_v1  ;;  %v561_v39 = vrot.slane %v549_v53, 4 }
 0x25b   :  { %v804_v25 = vsel %vm373_vm9, %v789_v16, %v803_v19  ;;  %v829_v9 = vrot.slane %v824_v24, 4  ;;  %v801_v0 = vrot.slane %v789_v16, 4  ;;  %v560_v30 = vperm.slane %v556_v17, %v6649_v20  ;;  %5872 = vmatmul.msk.f32.vlgmr.msrb.gmra.mxu1 %vm168_vm0, %v536_v3  ;;  %v6909_v16 = vpop.f32.mrf.mxu3 }
 0x25c   :  { %v812_v63 = vperm.slane %v804_v25, %v6655_v34  ;;  %v814_v32 = vsel %vm373_vm9, %v813_v26, %v6796_v28  ;;  %v564_v44 = vsel %vm373_vm9, %v549_v53, %v563_v42  ;;  %v575_v37 = vrot.slane %v554_v8, 4 }
 0x25d   :  { %5868 = vmatmul.msk.f32.vlgmr.msra.gmra.mxu0 %vm168_vm0, %v532_v31  ;;  %v802_v21 = vsel %vm373_vm9, %v801_v0, %v783_v2  ;;  %v820_v33 = vperm.slane %v814_v32, %v6655_v34  ;;  %v572_v36 = vperm.slane %v564_v44, %v6655_v34  ;;  %v573_v41 = vrot.slane %v560_v30, 4 }
 0x25e   :  { %5869 = vmatpush.xpose.msk.msrb.mxu0 %vm168_vm0, %v774_v7  ;;  %v830_v11 = vsel %vm373_vm9, %v829_v9, %v812_v63  ;;  %v808_v38 = vperm.slane %v802_v21, %v6655_v34  ;;  %v831_v12 = vrot.slane %v812_v63, 4  ;;  %v576_v51 = vsel %vm373_vm9, %v560_v30, %v575_v37 }
 0x25f   :  { %5879 = vmatpush.xpose.msk.msra.mxu1 %vm168_vm0, %v830_v11  ;;  %v825_v28 = vrot.slane %v820_v33, 4  ;;  %v591_v40 = vrot.slane %v572_v36, 4  ;;  %v533_v47 = vrot.slane %v514_v1, 4  ;;  %v584_v23 = vperm.slane %v576_v51, %v6655_v34 }
 0x260   :  { %v827_v45 = vrot.slane %v808_v38, 4  ;;  %v832_v46 = vsel %vm373_vm9, %v824_v24, %v831_v12  ;;  %v562_v49 = vsel %vm373_vm9, %v561_v39, %v6813_v27  ;;  %v574_v35 = vsel %vm373_vm9, %v573_v41, %v554_v8 }
 0x261   :  { %v826_v48 = vsel %vm373_vm9, %v825_v28, %v808_v38  ;;  %5881 = vmatpush.xpose.msk.msra.mxu2 %vm168_vm0, %v832_v46  ;;  %v592_v50 = vsel %vm373_vm9, %v584_v23, %v591_v40  ;;  %v589_v54 = vrot.slane %v584_v23, 4  ;;  %v580_v55 = vperm.slane %v574_v35, %v6655_v34 }
 0x262   :  { %5875 = vmatpush.xpose.msk.msrb.mxu3 %vm168_vm0, %v826_v48  ;;  %v828_v22 = vsel %vm373_vm9, %v820_v33, %v827_v45  ;;  %v534_v56 = vsel %vm373_vm9, %v6742_v18, %v533_v47  ;;  %v568_v57 = vperm.slane %v562_v49, %v6655_v34  ;;  %v198_v18 = vlaneseq }
 0x263   :  { %5877 = vmatpush.xpose.msk.msra.mxu0 %vm168_vm0, %v828_v22  ;;  %v590_v27 = vsel %vm373_vm9, %v589_v54, %v572_v36  ;;  %v585_v53 = vrot.slane %v580_v55, 4  ;;  %v6016_v33 = vpack.i.bf16 %v6909_v16, %v6894_v60 }
 0x264   :  { %5882 = vmatmul.msk.f32.vlgmr.msra.gmra.mxu2 %vm168_vm0, %v592_v50  ;;  %5880 = vmatmul.msk.f32.vlgmr.msra.gmra.mxu1 %vm168_vm0, %v590_v27  ;;  %v587_v14 = vrot.slane %v568_v57, 4  ;;  %v199_v61 = vshrl.u32 %v198_v18, 7  ;;  %v201_v62 = vand.u32 127, %v198_v18 }
 0x265   :  { %5870 = vmatmul.msk.f32.vlgmr.msrb.gmra.mxu0 %vm168_vm0, %v534_v56  ;;  %v586_v42 = vsel %vm373_vm9, %v585_v53, %v568_v57 }
 0x266   :  { %5876 = vmatmul.msk.f32.vlgmr.msrb.gmra.mxu3 %vm168_vm0, %v586_v42  ;;  %v588_v59 = vsel %vm373_vm9, %v580_v55, %v587_v14  ;;  %vm6896_vm10 = vcmp.le.s32.totalorder %v201_v62, %v199_v61 }
 0x26d   :  { %5878 = vmatmul.msk.f32.vlgmr.msra.gmra.mxu0 %vm168_vm0, %v588_v59 }
 0x2d8   :  { %v1148_v29 = vpop.f32.mrf.mxu1 }
 0x2d9   :  { %v1285_v58 = vsel %vm6896_vm10, %v1148_v29, -1e+30 }
 0x2da   :  { %v1096_v52 = vpop.f32.mrf.mxu0  ;;  %v1298_v5 = vsel %vm1291_vm11, %v1285_v58, -inf }
 0x2db   :  { %v1283_v2 = vsel %vm6896_vm10, %v1096_v52, -1e+30  ;;  %1299 = vmax.xlane.f32.xlu0 %v1298_v5 }
 0x2dc   :  { %v1292_v7 = vsel %vm1291_vm11, %v1283_v2, -inf }
 0x2dd   :  { %1293 = vmax.xlane.f32.xlu1 %v1292_v7  ;;  %v1174_v13 = vpop.f32.mrf.mxu2 }
 0x2de   :  { %v1286_v4 = vsel %vm6896_vm10, %v1174_v13, -1e+30 }
 0x2df   :  { %v1301_v15 = vsel %vm1291_vm11, %v1286_v4, -inf }
 0x2e0   :  { %1302 = vmax.xlane.f32.xlu2 %v1301_v15 }
 0x2e1   :  { %v1252_v19 = vpop.f32.mrf.mxu1 }
 0x2e2   :  { %v1289_v24 = vsel %vm6896_vm10, %v1252_v19, -1e+30  ;;  %v1122_v3 = vpop.f32.mrf.mxu0 }
 0x2e3   :  { %v1310_v26 = vsel %vm1291_vm11, %v1289_v24, -inf  ;;  %v1284_v30 = vsel %vm6896_vm10, %v1122_v3, -1e+30 }
 0x2e4   :  { %v1295_v32 = vsel %vm1291_vm11, %v1284_v30, -inf }
 0x2e7   :  { %v1278_v8 = vpop.f32.mrf.mxu2 }
 0x2e8   :  { %v1290_v17 = vsel %vm6896_vm10, %v1278_v8, -1e+30  ;;  %1311 = vmax.xlane.f32.xlu2 %v1310_v26  ;;  %v911_v8 = vrot.slane %v6909_v16, 4 }
 0x2e9   :  { %v1313_v25 = vsel %vm1291_vm11, %v1290_v17, -inf  ;;  %v1200_v9 = vpop.f32.mrf.mxu3 }
 0x2ea   :  { %1314 = vmax.xlane.f32.xlu0 %v1313_v25  ;;  %v1287_v0 = vsel %vm6896_vm10, %v1200_v9, -1e+30  ;;  %v1226_v63 = vpop.f32.mrf.mxu0  ;;  %v855_v25 = vrot.slane %v6894_v60, 4 }
 0x2eb   :  { %v1304_v31 = vsel %vm1291_vm11, %v1287_v0, -inf  ;;  %v1288_v44 = vsel %vm6896_vm10, %v1226_v63, -1e+30 }
 0x2ec   :  { %1305 = vmax.xlane.f32.xlu1 %v1304_v31  ;;  %v1307_v21 = vsel %vm1291_vm11, %v1288_v44, -inf }
 0x2f0   :  { %1296 = vmax.xlane.f32.xlu2 %v1295_v32 }
 0x2f4   :  { %1308 = vmax.xlane.f32.xlu1 %v1307_v21 }
 0x2fe   :  { %6017 = vrot.lane.b32.xlu0 %v6016_v33, %s6440_s2 }
 0x308   :  { %6022 = vrot.lane.b32.xlu2 %v6016_v33, %s6442_s29 }
 0x30d   :  { %6027 = vrot.lane.b32.xlu1 %v6016_v33, %s6441_s28 }
 0x34e   :  { %v1300_v36 = vpop.xlane.xlu0 %1299 }
 0x34f   :  { %v1318_v37 = vsub.f32 %v1285_v58, %v1300_v36 }
 0x350   :  { %v1294_v11 = vpop.xlane.xlu1 %1293 }
 0x351   :  { %v1316_v38 = vsub.f32 %v1283_v2, %v1294_v11  ;;  %v1328_v12 = vmul.f32 1.442695, %v1318_v37 }
 0x353   :  { %v1324_v39 = vmul.f32 1.442695, %v1316_v38  ;;  %v1303_v28 = vpop.xlane.xlu2 %1302  ;;  %6076 = vpow2.f32 %v1328_v12 }
 0x354   :  { %v1319_v51 = vsub.f32 %v1286_v4, %v1303_v28 }
 0x355   :  { %6078 = vpow2.f32 %v1324_v39 }
 0x356   :  { %v1330_v40 = vmul.f32 1.442695, %v1319_v51 }
 0x358   :  { %6080 = vpow2.f32 %v1330_v40 }
 0x359   :  { %v6931_v41 = vpop.eup %6076 }
 0x35a   :  { %v1346_v46 = vsel %vm1291_vm11, %v6931_v41, 0.0 }
 0x35b   :  { %v6933_v45 = vpop.eup %6078  ;;  %v1312_v47 = vpop.xlane.xlu2 %1311  ;;  %1347 = vadd.xlane.f32.xlu1 %v1346_v46 }
 0x35c   :  { %v1340_v23 = vsel %vm1291_vm11, %v6933_v45, 0.0  ;;  %v1322_v48 = vsub.f32 %v1289_v24, %v1312_v47 }
 0x35d   :  { %1341 = vadd.xlane.f32.xlu0 %v1340_v23  ;;  %v1315_v55 = vpop.xlane.xlu0 %1314 }
 0x35e   :  { %v6939_v49 = vpop.eup %6080  ;;  %v1336_v35 = vmul.f32 1.442695, %v1322_v48  ;;  %v1323_v42 = vsub.f32 %v1290_v17, %v1315_v55 }
 0x35f   :  { %v1349_v22 = vsel %vm1291_vm11, %v6939_v49, 0.0  ;;  %v1306_v50 = vpop.xlane.xlu1 %1305 }
 0x360   :  { %6082 = vpow2.f32 %v1336_v35  ;;  %1350 = vadd.xlane.f32.xlu2 %v1349_v22  ;;  %v1320_v54 = vsub.f32 %v1287_v0, %v1306_v50  ;;  %v1338_v62 = vmul.f32 1.442695, %v1323_v42 }
 0x362   :  { %v1332_v56 = vmul.f32 1.442695, %v1320_v54 }
 0x363   :  { %v1297_v27 = vpop.xlane.xlu2 %1296 }
 0x364   :  { %v1317_v57 = vsub.f32 %v1284_v30, %v1297_v27  ;;  %6084 = vpow2.f32 %v1332_v56 }
 0x366   :  { %v6943_v53 = vpop.eup %6082  ;;  %v1326_v14 = vmul.f32 1.442695, %v1317_v57 }
 0x367   :  { %v1358_v59 = vsel %vm1291_vm11, %v6943_v53, 0.0  ;;  %v1309_v18 = vpop.xlane.xlu1 %1308 }
 0x368   :  { %6086 = vpow2.f32 %v1326_v14  ;;  %1359 = vadd.xlane.f32.xlu1 %v1358_v59  ;;  %v1321_v61 = vsub.f32 %v1288_v44, %v1309_v18 }
 0x36a   :  { %v6947_v29 = vpop.eup %6084  ;;  %v1334_v58 = vmul.f32 1.442695, %v1321_v61 }
 0x36b   :  { %v1352_v52 = vsel %vm1291_vm11, %v6947_v29, 0.0  ;;  %v6023_v7 = vpop.permute.xlu2 %6022 }
 0x36c   :  { %6088 = vpow2.f32 %v1334_v58  ;;  %1353 = vadd.xlane.f32.xlu2 %v1352_v52  ;;  %v6024_v19 = vunpack.i.l.bf16 %v6023_v7  ;;  %v6025_v24 = vunpack.i.h.bf16 %v6023_v7 }
 0x36d   :  { %6090 = vpow2.f32 %v1338_v62 }
 0x36e   :  { %v6951_v2 = vpop.eup %6086  ;;  %v853_v26 = vrot.slane %v6024_v19, 4  ;;  %v909_v9 = vrot.slane %v6025_v24, 4  ;;  %v912_v0 = vsel %vm373_vm9, %v6025_v24, %v911_v8  ;;  %v856_v31 = vsel %vm373_vm9, %v6024_v19, %v855_v25 }
 0x36f   :  { %v1343_v5 = vsel %vm1291_vm11, %v6951_v2, 0.0  ;;  %v920_v21 = vperm.slane %v912_v0, %v6649_v20  ;;  %v864_v36 = vperm.slane %v856_v31, %v6649_v20 }
 0x370   :  { %1344 = vadd.xlane.f32.xlu0 %v1343_v5  ;;  %v6018_v17 = vpop.permute.xlu0 %6017  ;;  %v854_v30 = vsel %vm373_vm9, %v853_v26, %v6894_v60  ;;  %v910_v44 = vsel %vm373_vm9, %v909_v9, %v6909_v16 }
 0x371   :  { %v6020_v63 = vunpack.i.h.bf16 %v6018_v17  ;;  %v6019_v32 = vunpack.i.l.bf16 %v6018_v17  ;;  %v860_v33 = vperm.slane %v854_v30, %v6649_v20  ;;  %v916_v60 = vperm.slane %v910_v44, %v6649_v20 }
 0x372   :  { %v6955_v13 = vpop.eup %6088  ;;  %v891_v16 = vrot.slane %v864_v36, 4  ;;  %v947_v48 = vrot.slane %v920_v21, 4 }
 0x373   :  { %v6957_v4 = vpop.eup %6090  ;;  %v1355_v15 = vsel %vm1291_vm11, %v6955_v13, 0.0  ;;  %v923_v11 = vrot.slane %v6020_v63, 4  ;;  %v867_v38 = vrot.slane %v6019_v32, 4  ;;  %v879_v35 = vrot.slane %v860_v33, 4 }
 0x374   :  { %1356 = vadd.xlane.f32.xlu2 %v1355_v15  ;;  %v1361_v3 = vsel %vm1291_vm11, %v6957_v4, 0.0  ;;  %v935_v57 = vrot.slane %v916_v60, 4 }
 0x378   :  { %1362 = vadd.xlane.f32.xlu0 %v1361_v3 }
 0x37f   :  { %v6028_v37 = vpop.permute.xlu1 %6027 }
 0x380   :  { %v6030_v12 = vunpack.i.h.bf16 %v6028_v37  ;;  %v6029_v39 = vunpack.i.l.bf16 %v6028_v37 }
 0x382   :  { %v921_v28 = vrot.slane %v6030_v12, 4  ;;  %v865_v51 = vrot.slane %v6029_v39, 4  ;;  %v868_v40 = vsel %vm373_vm9, %v6029_v39, %v867_v38  ;;  %v924_v46 = vsel %vm373_vm9, %v6030_v12, %v923_v11 }
 0x383   :  { %v876_v47 = vperm.slane %v868_v40, %v6649_v20  ;;  %v932_v23 = vperm.slane %v924_v46, %v6649_v20 }
 0x384   :  { %v866_v22 = vsel %vm373_vm9, %v865_v51, %v6019_v32  ;;  %v922_v50 = vsel %vm373_vm9, %v921_v28, %v6020_v63 }
 0x385   :  { %v872_v54 = vperm.slane %v866_v22, %v6649_v20  ;;  %v889_v55 = vrot.slane %v876_v47, 4  ;;  %v892_v56 = vsel %vm373_vm9, %v876_v47, %v891_v16  ;;  %v928_v27 = vperm.slane %v922_v50, %v6649_v20 }
 0x386   :  { %v900_v42 = vperm.slane %v892_v56, %v6655_v34  ;;  %v945_v14 = vrot.slane %v932_v23, 4  ;;  %v948_v59 = vsel %vm373_vm9, %v932_v23, %v947_v48 }
 0x387   :  { %v877_v18 = vrot.slane %v872_v54, 4  ;;  %v880_v61 = vsel %vm373_vm9, %v872_v54, %v879_v35  ;;  %v890_v62 = vsel %vm373_vm9, %v889_v55, %v864_v36  ;;  %v933_v58 = vrot.slane %v928_v27, 4 }
 0x388   :  { %v888_v52 = vperm.slane %v880_v61, %v6655_v34  ;;  %v896_v5 = vperm.slane %v890_v62, %v6655_v34  ;;  %v907_v7 = vrot.slane %v900_v42, 4  ;;  %v936_v15 = vsel %vm373_vm9, %v928_v27, %v935_v57 }
 0x389   :  { %v878_v19 = vsel %vm373_vm9, %v877_v18, %v860_v33  ;;  %v934_v24 = vsel %vm373_vm9, %v933_v58, %v916_v60  ;;  %v944_v3 = vperm.slane %v936_v15, %v6655_v34  ;;  %v946_v26 = vsel %vm373_vm9, %v945_v14, %v920_v21 }
 0x38a   :  { %v884_v8 = vperm.slane %v878_v19, %v6655_v34  ;;  %v903_v17 = vrot.slane %v888_v52, 4  ;;  %v905_v25 = vrot.slane %v896_v5, 4  ;;  %v908_v9 = vsel %vm373_vm9, 0.0, %v907_v7 }
 0x38b   :  { %v940_v0 = vperm.slane %v934_v24, %v6655_v34  ;;  %v952_v30 = vperm.slane %v946_v26, %v6655_v34  ;;  %v956_v31 = vperm.slane %v948_v59, %v6655_v34  ;;  %v959_v63 = vrot.slane %v944_v3, 4 }
 0x38c   :  { %v904_v32 = vsel %vm373_vm9, 0.0, %v903_v17  ;;  %v976_v44 = vsel %vm373_vm9, %v907_v7, %v896_v5  ;;  %v981_v33 = vrot.slane %v908_v9, 4  ;;  %v901_v36 = vrot.slane %v884_v8, 4 }
 0x38d   :  { %v960_v21 = vsel %vm373_vm9, 0.0, %v959_v63  ;;  %v961_v37 = vrot.slane %v952_v30, 4  ;;  %v963_v11 = vrot.slane %v956_v31, 4  ;;  %v970_v38 = vrot.slane %v904_v32, 4 }
 0x38e   :  { %v1024_v12 = vrot.slane %v960_v21, 4  ;;  %v902_v39 = vsel %vm373_vm9, 0.0, %v901_v36  ;;  %v906_v60 = vsel %vm373_vm9, 0.0, %v905_v25  ;;  %v965_v28 = vsel %vm373_vm9, %v903_v17, %v884_v8 }
 0x38f   :  { %v964_v51 = vsel %vm373_vm9, 0.0, %v963_v11  ;;  %v1030_v40 = vsel %vm373_vm9, %v963_v11, %v952_v30  ;;  %v969_v46 = vperm.slane %v965_v28, %v6649_v20  ;;  %v971_v16 = vsel %vm373_vm9, %v970_v38, %v902_v39 }
 0x390   :  { %v1035_v47 = vrot.slane %v964_v51, 4  ;;  %v975_v23 = vperm.slane %v971_v16, %v6649_v20  ;;  %v980_v48 = vperm.slane %v976_v44, %v6649_v20  ;;  %v982_v35 = vsel %vm373_vm9, %v981_v33, %v906_v60 }
 0x391   :  { %v986_v22 = vperm.slane %v982_v35, %v6649_v20  ;;  %v989_v50 = vrot.slane %v969_v46, 4  ;;  %v957_v54 = vrot.slane %v940_v0, 4  ;;  %v962_v55 = vsel %vm373_vm9, 0.0, %v961_v37 }
 0x392   :  { %v1001_v56 = vrot.slane %v980_v48, 4  ;;  %v1019_v27 = vsel %vm373_vm9, %v959_v63, %v940_v0  ;;  %v1034_v57 = vperm.slane %v1030_v40, %v6649_v20  ;;  %v1036_v42 = vsel %vm373_vm9, %v1035_v47, %v962_v55 }
 0x393   :  { %v990_v14 = vsel %vm373_vm9, %v975_v23, %v989_v50  ;;  %v958_v59 = vsel %vm373_vm9, 0.0, %v957_v54  ;;  %v1023_v18 = vperm.slane %v1019_v27, %v6649_v20  ;;  %v1040_v61 = vperm.slane %v1036_v42, %v6649_v20 }
 0x394   :  { %v998_v62 = vperm.slane %v990_v14, %v6655_v34  ;;  %v1002_v58 = vsel %vm373_vm9, %v986_v22, %v1001_v56  ;;  %v1025_v52 = vsel %vm373_vm9, %v1024_v12, %v958_v59  ;;  %v1055_v5 = vrot.slane %v1034_v57, 4 }
 0x395   :  { %v1010_v7 = vperm.slane %v1002_v58, %v6655_v34  ;;  %v1029_v15 = vperm.slane %v1025_v52, %v6649_v20  ;;  %v1043_v19 = vrot.slane %v1023_v18, 4  ;;  %v987_v24 = vrot.slane %v975_v23, 4 }
 0x396   :  { %v1056_v3 = vsel %vm373_vm9, %v1040_v61, %v1055_v5  ;;  %v999_v26 = vrot.slane %v986_v22, 4  ;;  %v1017_v8 = vrot.slane %v998_v62, 4  ;;  %v1053_v17 = vrot.slane %v1040_v61, 4 }
 0x397   :  { %v1015_v25 = vrot.slane %v1010_v7, 4  ;;  %v1044_v9 = vsel %vm373_vm9, %v1029_v15, %v1043_v19  ;;  %v1064_v0 = vperm.slane %v1056_v3, %v6655_v34  ;;  %v988_v30 = vsel %vm373_vm9, %v987_v24, %v969_v46 }
 0x398   :  { %v1052_v31 = vperm.slane %v1044_v9, %v6655_v34  ;;  %v994_v63 = vperm.slane %v988_v30, %v6655_v34  ;;  %v1000_v32 = vsel %vm373_vm9, %v999_v26, %v980_v48  ;;  %v1018_v44 = vsel %vm373_vm9, %v1010_v7, %v1017_v8 }
 0x399   :  { %v1016_v33 = vsel %vm373_vm9, %v1015_v25, %v998_v62  ;;  %v1069_v36 = vrot.slane %v1064_v0, 4  ;;  %v1006_v21 = vperm.slane %v1000_v32, %v6655_v34  ;;  %1467 = vmatpush.msrb.mxu2 %v1018_v44  ;;  %v1041_v37 = vrot.slane %v1029_v15, 4 }
 0x39a   :  { %1444 = vmatpush.msrb.mxu1 %v1016_v33  ;;  %v1054_v11 = vsel %vm373_vm9, %v1053_v17, %v1034_v57  ;;  %v1071_v38 = vrot.slane %v1052_v31, 4  ;;  %v1013_v12 = vrot.slane %v994_v63, 4 }
 0x39b   :  { %v1070_v39 = vsel %vm373_vm9, %v1069_v36, %v1052_v31  ;;  %v1011_v60 = vrot.slane %v1006_v21, 4  ;;  %v1042_v28 = vsel %vm373_vm9, %v1041_v37, %v1023_v18  ;;  %v1060_v51 = vperm.slane %v1054_v11, %v6655_v34 }
 0x39c   :  { %1536 = vmatpush.msra.mxu1 %v1070_v39  ;;  %v1048_v40 = vperm.slane %v1042_v28, %v6655_v34  ;;  %v1072_v46 = vsel %vm373_vm9, %v1064_v0, %v1071_v38  ;;  %v1014_v16 = vsel %vm373_vm9, %v1006_v21, %v1013_v12 }
 0x39d   :  { %v1012_v47 = vsel %vm373_vm9, %v1011_v60, %v994_v63  ;;  %v1065_v23 = vrot.slane %v1060_v51, 4  ;;  %1559 = vmatpush.msra.mxu2 %v1072_v46  ;;  %1421 = vmatpush.msrb.mxu0 %v1014_v16 }
 0x39e   :  { %1398 = vmatpush.msra.mxu3 %v1012_v47  ;;  %v1067_v48 = vrot.slane %v1048_v40, 4 }
 0x39f   :  { %v1066_v35 = vsel %vm373_vm9, %v1065_v23, %v1048_v40 }
 0x3a0   :  { %1490 = vmatpush.msrb.mxu3 %v1066_v35  ;;  %v1068_v22 = vsel %vm373_vm9, %v1060_v51, %v1067_v48 }
 0x3a1   :  { %1513 = vmatpush.msra.mxu0 %v1068_v22 }
 0x3ce   :  { %v1348_v50 = vpop.xlane.xlu1 %1347 }
 0x3cf   :  { %6092 = vrcp.f32 %v1348_v50 }
 0x3d0   :  { %v1342_v54 = vpop.xlane.xlu0 %1341 }
 0x3d1   :  { %6094 = vrcp.f32 %v1342_v54 }
 0x3d3   :  { %v1351_v55 = vpop.xlane.xlu2 %1350 }
 0x3d4   :  { %6096 = vrcp.f32 %v1351_v55 }
 0x3d5   :  { %v6093_v56 = vpop.eup %6092 }
 0x3d6   :  { %v1374_v57 = vmul.f32 %v6093_v56, %v6931_v41 }
 0x3d7   :  { %v6095_v27 = vpop.eup %6094 }
 0x3d8   :  { %v1372_v42 = vmul.f32 %v6095_v27, %v6933_v45  ;;  %5885 = vmatmul.msk.f32.vlgmr.msrb.gmra.mxu1 %vm1291_vm11, %v1374_v57 }
 0x3da   :  { %v6097_v14 = vpop.eup %6096  ;;  %5883 = vmatmul.msk.f32.vlgmr.msra.gmra.mxu3 %vm1291_vm11, %v1372_v42 }
 0x3db   :  { %v1375_v59 = vmul.f32 %v6097_v14, %v6939_v49  ;;  %v1360_v18 = vpop.xlane.xlu1 %1359 }
 0x3dc   :  { %6098 = vrcp.f32 %v1360_v18 }
 0x3dd   :  { %5886 = vmatmul.msk.f32.vlgmr.msrb.gmra.mxu2 %vm1291_vm11, %v1375_v59 }
 0x3df   :  { %v1354_v61 = vpop.xlane.xlu2 %1353 }
 0x3e0   :  { %6100 = vrcp.f32 %v1354_v61 }
 0x3e2   :  { %v6099_v62 = vpop.eup %6098 }
 0x3e3   :  { %v1378_v58 = vmul.f32 %v6099_v62, %v6943_v53  ;;  %v1345_v52 = vpop.xlane.xlu0 %1344 }
 0x3e4   :  { %6102 = vrcp.f32 %v1345_v52 }
 0x3e5   :  { %5889 = vmatmul.msk.f32.vlgmr.msra.gmra.mxu1 %vm1291_vm11, %v1378_v58 }
 0x3e6   :  { %v6101_v41 = vpop.eup %6100 }
 0x3e7   :  { %v1376_v45 = vmul.f32 %v6101_v41, %v6947_v29  ;;  %v1357_v5 = vpop.xlane.xlu2 %1356 }
 0x3e8   :  { %6104 = vrcp.f32 %v1357_v5 }
 0x3e9   :  { %5887 = vmatmul.msk.f32.vlgmr.msrb.gmra.mxu3 %vm1291_vm11, %v1376_v45 }
 0x3ea   :  { %v6103_v7 = vpop.eup %6102 }
 0x3eb   :  { %v1373_v49 = vmul.f32 %v6103_v7, %v6951_v2  ;;  %v1363_v15 = vpop.xlane.xlu0 %1362 }
 0x3ec   :  { %6106 = vrcp.f32 %v1363_v15 }
 0x3ed   :  { %5884 = vmatmul.msk.f32.vlgmr.msrb.gmra.mxu0 %vm1291_vm11, %v1373_v49 }
 0x3ee   :  { %v6105_v19 = vpop.eup %6104 }
 0x3ef   :  { %v1377_v53 = vmul.f32 %v6105_v19, %v6955_v13 }
 0x3f2   :  { %v6107_v24 = vpop.eup %6106 }
 0x3f3   :  { %v1379_v3 = vmul.f32 %v6107_v24, %v6957_v4 }
 0x3f5   :  { %5888 = vmatmul.msk.f32.vlgmr.msra.gmra.mxu0 %vm1291_vm11, %v1377_v53  ;;  %5890 = vmatmul.msk.f32.vlgmr.msra.gmra.mxu2 %vm1291_vm11, %v1379_v3 }
 0x455   :  { %v1446_v26 = vpop.f32.mrf.mxu1 }
 0x456   :  { %v1564_v17 = vrot.slane %v1446_v26, 4 }
 0x45d   :  { %v1400_v29 = vpop.f32.mrf.mxu3 }
 0x45e   :  { %v1566_v8 = vrot.slane %v1400_v29, 4  ;;  %v1565_v2 = vsel %vm373_vm9, %v1564_v17, %v1400_v29 }
 0x45f   :  { %v1571_v0 = vperm.slane %v1565_v2, %v6649_v20 }
 0x460   :  { %v1567_v25 = vsel %vm373_vm9, %v1446_v26, %v1566_v8  ;;  %v1469_v9 = vpop.f32.mrf.mxu2 }
 0x461   :  { %v1575_v13 = vperm.slane %v1567_v25, %v6649_v20  ;;  %v1576_v30 = vrot.slane %v1469_v9, 4  ;;  %v1590_v44 = vrot.slane %v1571_v0, 4 }
 0x462   :  { %v1538_v4 = vpop.f32.mrf.mxu1 }
 0x463   :  { %v1602_v36 = vrot.slane %v1575_v13, 4  ;;  %v1620_v11 = vrot.slane %v1538_v4, 4 }
 0x46a   :  { %v1423_v31 = vpop.f32.mrf.mxu0 }
 0x46b   :  { %v1577_v63 = vsel %vm373_vm9, %v1576_v30, %v1423_v31  ;;  %v1578_v32 = vrot.slane %v1423_v31, 4 }
 0x46c   :  { %v1583_v33 = vperm.slane %v1577_v63, %v6649_v20  ;;  %v1492_v37 = vpop.f32.mrf.mxu3 }
 0x46d   :  { %v1579_v21 = vsel %vm373_vm9, %v1469_v9, %v1578_v32  ;;  %v1622_v28 = vrot.slane %v1492_v37, 4  ;;  %v1621_v16 = vsel %vm373_vm9, %v1620_v11, %v1492_v37 }
 0x46e   :  { %v1587_v38 = vperm.slane %v1579_v21, %v6649_v20  ;;  %v1588_v12 = vrot.slane %v1583_v33, 4  ;;  %v1591_v39 = vsel %vm373_vm9, %v1583_v33, %v1590_v44  ;;  %v1627_v14 = vperm.slane %v1621_v16, %v6649_v20 }
 0x46f   :  { %v1599_v60 = vperm.slane %v1591_v39, %v6655_v34  ;;  %v1623_v35 = vsel %vm373_vm9, %v1538_v4, %v1622_v28 }
 0x470   :  { %v1589_v51 = vsel %vm373_vm9, %v1588_v12, %v1571_v0  ;;  %v1600_v40 = vrot.slane %v1587_v38, 4  ;;  %v1603_v46 = vsel %vm373_vm9, %v1587_v38, %v1602_v36  ;;  %v1631_v59 = vperm.slane %v1623_v35, %v6649_v20 }
 0x471   :  { %v1595_v47 = vperm.slane %v1589_v51, %v6655_v34  ;;  %v1611_v23 = vperm.slane %v1603_v46, %v6655_v34  ;;  %v1614_v48 = vrot.slane %v1599_v60, 4 }
 0x472   :  { %v1601_v22 = vsel %vm373_vm9, %v1600_v40, %v1575_v13  ;;  %v1515_v27 = vpop.f32.mrf.mxu0  ;;  %v1658_v53 = vrot.slane %v1631_v59, 4  ;;  %v1646_v13 = vrot.slane %v1627_v14, 4 }
 0x473   :  { %v1607_v50 = vperm.slane %v1601_v22, %v6655_v34  ;;  %v1612_v54 = vrot.slane %v1595_v47, 4  ;;  %v1615_v55 = vsel %vm373_vm9, 0.0, %v1614_v48  ;;  %v1618_v56 = vrot.slane %v1611_v23, 4 }
 0x474   :  { %v1676_v57 = vsel %vm373_vm9, %v1614_v48, %v1595_v47  ;;  %v1681_v42 = vrot.slane %v1615_v55, 4  ;;  %v1634_v41 = vrot.slane %v1515_v27, 4 }
 0x475   :  { %v1613_v18 = vsel %vm373_vm9, 0.0, %v1612_v54  ;;  %v1616_v61 = vrot.slane %v1607_v50, 4  ;;  %v1619_v62 = vsel %vm373_vm9, 0.0, %v1618_v56  ;;  %v1680_v58 = vperm.slane %v1676_v57, %v6649_v20 }
 0x476   :  { %v1692_v52 = vrot.slane %v1619_v62, 4  ;;  %v1682_v45 = vsel %vm373_vm9, %v1681_v42, %v1613_v18  ;;  %v1687_v5 = vsel %vm373_vm9, %v1618_v56, %v1607_v50 }
 0x477   :  { %v1617_v7 = vsel %vm373_vm9, 0.0, %v1616_v61  ;;  %v1686_v49 = vperm.slane %v1682_v45, %v6649_v20  ;;  %v1691_v15 = vperm.slane %v1687_v5, %v6649_v20  ;;  %v1700_v19 = vrot.slane %v1680_v58, 4 }
 0x478   :  { %v1561_v24 = vpop.f32.mrf.mxu2  ;;  %v1693_v3 = vsel %vm373_vm9, %v1692_v52, %v1617_v7 }
 0x479   :  { %v1632_v29 = vrot.slane %v1561_v24, 4  ;;  %v1635_v26 = vsel %vm373_vm9, %v1561_v24, %v1634_v41  ;;  %v1697_v8 = vperm.slane %v1693_v3, %v6649_v20  ;;  %v1701_v17 = vsel %vm373_vm9, %v1686_v49, %v1700_v19 }
 0x47a   :  { %v1643_v2 = vperm.slane %v1635_v26, %v6649_v20  ;;  %v1709_v25 = vperm.slane %v1701_v17, %v6655_v34  ;;  %v1712_v9 = vrot.slane %v1691_v15, 4  ;;  %v1698_v0 = vrot.slane %v1686_v49, 4 }
 0x47b   :  { %v1633_v30 = vsel %vm373_vm9, %v1632_v29, %v1515_v27  ;;  %v1710_v31 = vrot.slane %v1697_v8, 4 }
 0x47c   :  { %v1639_v4 = vperm.slane %v1633_v30, %v6649_v20  ;;  %v1656_v63 = vrot.slane %v1643_v2, 4  ;;  %v1659_v32 = vsel %vm373_vm9, %v1643_v2, %v1658_v53  ;;  %v1713_v44 = vsel %vm373_vm9, %v1697_v8, %v1712_v9 }
 0x47d   :  { %v1667_v33 = vperm.slane %v1659_v32, %v6655_v34  ;;  %v1721_v36 = vperm.slane %v1713_v44, %v6655_v34  ;;  %v1728_v21 = vrot.slane %v1709_v25, 4  ;;  %v1699_v37 = vsel %vm373_vm9, %v1698_v0, %v1680_v58 }
 0x47e   :  { %v1644_v11 = vrot.slane %v1639_v4, 4  ;;  %v1647_v38 = vsel %vm373_vm9, %v1639_v4, %v1646_v13  ;;  %v1657_v12 = vsel %vm373_vm9, %v1656_v63, %v1631_v59  ;;  %v1705_v39 = vperm.slane %v1699_v37, %v6655_v34  ;;  %v1821_v37 = vld [vmem:[#allocation8 + $0x28] sm:$0xff] }
 0x47f   :  { %v1655_v60 = vperm.slane %v1647_v38, %v6655_v34  ;;  %v1663_v28 = vperm.slane %v1657_v12, %v6655_v34  ;;  %v1674_v51 = vrot.slane %v1667_v33, 4  ;;  %v1729_v40 = vsel %vm373_vm9, %v1721_v36, %v1728_v21  ;;  %v1822_v21 = vld [vmem:[#allocation8 + $0x30] sm:$0xff]  ;;  %v1819_v38 = vld [vmem:[#allocation8 + $0x18] sm:$0xff] }
 0x480   :  { %v1645_v46 = vsel %vm373_vm9, %v1644_v11, %v1627_v14  ;;  %1802 = vrot.lane.b32.xlu2 %v1729_v40, %s6445_s30  ;;  %v1726_v16 = vrot.slane %v1721_v36, 4  ;;  %v1711_v47 = vsel %vm373_vm9, %v1710_v31, %v1691_v15  ;;  %v1724_v23 = vrot.slane %v1705_v39, 4  ;;  %v1823_v36 = vld [vmem:[#allocation8 + $0x38] sm:$0xff]  ;;  %v1820_v11 = vld [vmem:[#allocation8 + $0x20] sm:$0xff]  ;;  %v1818_v12 = vld [vmem:[#allocation8 + $0x10] sm:$0xff] }
 0x481   :  { %v1651_v48 = vperm.slane %v1645_v46, %v6655_v34  ;;  %v1670_v35 = vrot.slane %v1655_v60, 4  ;;  %v1672_v22 = vrot.slane %v1663_v28, 4  ;;  %v1675_v50 = vsel %vm373_vm9, 0.0, %v1674_v51  ;;  %1838 = vmatpush.msra.mxu3 %v1823_v36  ;;  %v1816_v60 = vld [vmem:[#allocation8] sm:$0xff] }
 0x482   :  { %v1741_v54 = vsel %vm373_vm9, %v1674_v51, %v1663_v28  ;;  %v1746_v55 = vrot.slane %v1675_v50, 4  ;;  %v1727_v56 = vsel %vm373_vm9, %v1726_v16, %v1709_v25  ;;  %v1717_v27 = vperm.slane %v1711_v47, %v6655_v34 }
 0x483   :  { %v1668_v57 = vrot.slane %v1651_v48, 4  ;;  %v1671_v42 = vsel %vm373_vm9, 0.0, %v1670_v35  ;;  %v1673_v14 = vsel %vm373_vm9, 0.0, %v1672_v22  ;;  %v1745_v59 = vperm.slane %v1741_v54, %v6649_v20  ;;  %1794 = vrot.lane.b32.xlu1 %v1727_v56, %s6446_s16  ;;  %1839 = vmatpush.msra.mxu3 %v1822_v21 }
 0x484   :  { %v1735_v18 = vrot.slane %v1671_v42, 4  ;;  %v1722_v61 = vrot.slane %v1717_v27, 4  ;;  %v1725_v62 = vsel %vm373_vm9, %v1717_v27, %v1724_v23  ;;  %v1730_v58 = vsel %vm373_vm9, %v1670_v35, %v1651_v48 }
 0x485   :  { %1786 = vrot.lane.b32.xlu0 %v1725_v62, %s6447_s7  ;;  %v1669_v52 = vsel %vm373_vm9, 0.0, %v1668_v57  ;;  %v1734_v41 = vperm.slane %v1730_v58, %v6649_v20  ;;  %v1747_v45 = vsel %vm373_vm9, %v1746_v55, %v1673_v14  ;;  %v1766_v5 = vrot.slane %v1745_v59, 4  ;;  %1840 = vmatpush.msra.mxu3 %v1821_v37  ;;  %v1939_v62 = vld [vmem:[#allocation13 + $0x38] sm:$0xff]  ;;  %v1938_v58 = vld [vmem:[#allocation13 + $0x30] sm:$0xff] }
 0x486   :  { %v1736_v7 = vsel %vm373_vm9, %v1735_v18, %v1669_v52  ;;  %v1751_v49 = vperm.slane %v1747_v45, %v6649_v20  ;;  %v1723_v15 = vsel %vm373_vm9, %v1722_v61, %v1705_v39  ;;  %v1817_v39 = vld [vmem:[#allocation8 + $0x8] sm:$0xff]  ;;  %v1902_v61 = vld [vmem:[#allocation10 + $0x38] sm:$0xff]  ;;  %1948 = vmatpush.msrb.mxu1 %v1939_v62  ;;  %v1899_v45 = vld [vmem:[#allocation10 + $0x20] sm:$0xff] }
 0x487   :  { %v1740_v19 = vperm.slane %v1736_v7, %v6649_v20  ;;  %v1754_v53 = vrot.slane %v1734_v41, 4  ;;  %1841 = vmatpush.msra.mxu3 %v1820_v11  ;;  %1917 = vmatpush.msrb.mxu0 %v1902_v61  ;;  %v1900_v52 = vld [vmem:[#allocation10 + $0x28] sm:$0xff]  ;;  %v1935_v7 = vld [vmem:[#allocation13 + $0x18] sm:$0xff] }
 0x488   :  { %v1767_v24 = vsel %vm373_vm9, %v1751_v49, %v1766_v5  ;;  %v1764_v3 = vrot.slane %v1751_v49, 4  ;;  %1949 = vmatpush.msrb.mxu1 %v1938_v58  ;;  %v1936_v5 = vld [vmem:[#allocation13 + $0x20] sm:$0xff] }
 0x489   :  { %v1755_v29 = vsel %vm373_vm9, %v1740_v19, %v1754_v53  ;;  %v1775_v26 = vperm.slane %v1767_v24, %v6655_v34  ;;  %v1752_v8 = vrot.slane %v1740_v19, 4  ;;  %1842 = vmatpush.msra.mxu3 %v1819_v38  ;;  %v1897_v19 = vld [vmem:[#allocation10 + $0x10] sm:$0xff] }
 0x48a   :  { %v1763_v17 = vperm.slane %v1755_v29, %v6655_v34  ;;  %v1765_v2 = vsel %vm373_vm9, %v1764_v3, %v1745_v59  ;;  %v1934_v53 = vld [vmem:[#allocation13 + $0x10] sm:$0xff]  ;;  %v1896_v3 = vld [vmem:[#allocation10 + $0x8] sm:$0xff] }
 0x48b   :  { %v1780_v25 = vrot.slane %v1775_v26, 4  ;;  %v1753_v9 = vsel %vm373_vm9, %v1752_v8, %v1734_v41  ;;  %v1771_v0 = vperm.slane %v1765_v2, %v6655_v34  ;;  %1843 = vmatpush.msra.mxu3 %v1818_v12  ;;  %v1937_v41 = vld [vmem:[#allocation13 + $0x28] sm:$0xff]  ;;  %v1932_v8 = vld [vmem:[#allocation13] sm:$0xff] }
 0x48c   :  { %v1759_v13 = vperm.slane %v1753_v9, %v6655_v34  ;;  %v1782_v44 = vrot.slane %v1763_v17, 4  ;;  %1950 = vmatpush.msrb.mxu1 %v1937_v41  ;;  %v1933_v29 = vld [vmem:[#allocation13 + $0x8] sm:$0xff] }
 0x48d   :  { %v1781_v30 = vsel %vm373_vm9, %v1780_v25, %v1763_v17  ;;  %v1776_v31 = vrot.slane %v1771_v0, 4  ;;  %1844 = vmatpush.msra.mxu3 %v1817_v39 }
 0x48e   :  { %1796 = vrot.lane.b32.xlu1 %v1781_v30, %s6446_s16  ;;  %v1778_v4 = vrot.slane %v1759_v13, 4  ;;  %v1783_v33 = vsel %vm373_vm9, %v1775_v26, %v1782_v44  ;;  %1951 = vmatpush.msrb.mxu1 %v1936_v5  ;;  %v1895_v26 = vld [vmem:[#allocation10] sm:$0xff] }
 0x48f   :  { %v1777_v63 = vsel %vm373_vm9, %v1776_v31, %v1759_v13  ;;  %1845 = vmatpush.msra.mxu3 %v1816_v60 }
 0x490   :  { %v1779_v32 = vsel %vm373_vm9, %v1771_v0, %v1778_v4  ;;  %1952 = vmatpush.msrb.mxu1 %v1935_v7  ;;  %v6063_v4 = vld [vmem:[%s8412_s4] ss:$0 sm:$0xff] }
 0x491   :  { %1788 = vrot.lane.b32.xlu0 %v1779_v32, %s6447_s7 }
 0x492   :  { %1953 = vmatpush.msrb.mxu1 %v1934_v53 }
 0x494   :  { %1954 = vmatpush.msrb.mxu1 %v1933_v29 }
 0x496   :  { %1955 = vmatpush.msrb.mxu1 %v1932_v8 }
 0x499   :  { %1804 = vrot.lane.b32.xlu0 %v1783_v33, %s6445_s30 }
 0x4da   :  { %v1803_v46 = vpop.permute.xlu2 %1802 }
 0x4f5   :  { %v1795_v28 = vpop.permute.xlu1 %1794 }
 0x4f7   :  { %v1787_v51 = vpop.permute.xlu0 %1786 }
 0x4f8   :  { %v1808_v40 = vsel %vm168_vm0, %v1723_v15, %v1787_v51  ;;  %v2012_v51 = vld [vmem:[#allocation11 + $0x38] sm:$0xff] }
 0x4f9   :  { %v1811_v16 = vsel %vm1810_vm12, %v1808_v40, %v1795_v28  ;;  %v2011_v40 = vld [vmem:[#allocation11 + $0x30] sm:$0xff]  ;;  %2027 = vmatpush.msrb.mxu2 %v2012_v51  ;;  %v2130_v51 = vld [vmem:[#allocation5 + $0x60] sm:$0xff] }
 0x4fa   :  { %v1814_v47 = vsel %vm1813_vm13, %v1811_v16, %v1803_v46 }
 0x4fb   :  { %5891 = vmatmul.msk.f32.vlgmr.msra.gmra.mxu3 %vm206_vm1, %v1814_v47  ;;  %2028 = vmatpush.msrb.mxu2 %v2011_v40  ;;  %v2010_v47 = vld [vmem:[#allocation11 + $0x28] sm:$0xff]  ;;  %v2162_v40 = vld [vmem:[#allocation7 + $0x60] sm:$0xff] }
 0x4fd   :  { %2029 = vmatpush.msrb.mxu2 %v2010_v47 }
 0x500   :  { %v1797_v35 = vpop.permute.xlu1 %1796 }
 0x503   :  { %v1789_v23 = vpop.permute.xlu0 %1788 }
 0x504   :  { %v1809_v48 = vsel %vm168_vm0, %v1777_v63, %v1789_v23  ;;  %v2009_v23 = vld [vmem:[#allocation11 + $0x20] sm:$0xff] }
 0x505   :  { %v1812_v50 = vsel %vm1810_vm12, %v1809_v48, %v1797_v35  ;;  %2030 = vmatpush.msrb.mxu2 %v2009_v23  ;;  %v2008_v35 = vld [vmem:[#allocation11 + $0x18] sm:$0xff] }
 0x506   :  { %v2161_v23 = vld [vmem:[#allocation7 + $0x58] sm:$0xff] }
 0x507   :  { %2031 = vmatpush.msrb.mxu2 %v2008_v35  ;;  %v2088_v35 = vld [vmem:[#allocation2 + $0x50] sm:$0xff] }
 0x50b   :  { %v1805_v22 = vpop.permute.xlu0 %1804 }
 0x50c   :  { %v1815_v54 = vsel %vm1813_vm13, %v1812_v50, %v1805_v22  ;;  %v2007_v50 = vld [vmem:[#allocation11 + $0x10] sm:$0xff] }
 0x50d   :  { %5892 = vmatmul.msk.f32.gmra.mxu3 %vm206_vm1, %v1815_v54  ;;  %2032 = vmatpush.msrb.mxu2 %v2007_v50  ;;  %v2006_v54 = vld [vmem:[#allocation11 + $0x8] sm:$0xff]  ;;  %v2160_v50 = vld [vmem:[#allocation7 + $0x50] sm:$0xff] }
 0x50f   :  { %2033 = vmatpush.msrb.mxu2 %v2006_v54 }
 0x57e   :  { %v1847_v55 = vpop.f32.mrf.mxu3 }
 0x57f   :  { %v7158_v56 = vadd.f32 %v1847_v55, %v6588_v6  ;;  %v1901_v6 = vld [vmem:[#allocation10 + $0x30] sm:$0xff]  ;;  %v2005_v55 = vld [vmem:[#allocation11] sm:$0xff] }
 0x580   :  { %1918 = vmatpush.msrb.mxu0 %v1901_v6  ;;  %2034 = vmatpush.msrb.mxu2 %v2005_v55  ;;  %v2087_v55 = vld [vmem:[#allocation2 + $0x48] sm:$0xff] }
 0x581   :  { %v1856_v27 = vmul.f32 %v7158_v56, %v7158_v56 }
 0x582   :  { %1919 = vmatpush.msrb.mxu0 %v1900_v52 }
 0x583   :  { %v1858_v57 = vsel %vm206_vm1, %v1856_v27, 0.0 }
 0x584   :  { %1859 = vadd.xlane.f32.xlu2 %v1858_v57  ;;  %1920 = vmatpush.msrb.mxu0 %v1899_v45 }
 0x590   :  { %v1850_v42 = vpop.f32.mrf.mxu3 }
 0x591   :  { %v7164_v14 = vadd.f32 %v1850_v42, %v6593_v10  ;;  %v1898_v10 = vld [vmem:[#allocation10 + $0x18] sm:$0xff] }
 0x592   :  { %1921 = vmatpush.msrb.mxu0 %v1898_v10 }
 0x593   :  { %v1857_v59 = vmul.f32 %v7164_v14, %v7164_v14 }
 0x594   :  { %1922 = vmatpush.msrb.mxu0 %v1897_v19 }
 0x595   :  { %v1861_v18 = vsel %vm206_vm1, %v1857_v59, 0.0 }
 0x596   :  { %1862 = vadd.xlane.f32.xlu1 %v1861_v18  ;;  %1923 = vmatpush.msrb.mxu0 %v1896_v3 }
 0x598   :  { %1924 = vmatpush.msrb.mxu0 %v1895_v26 }
 0x5f7   :  { %v1860_v49 = vpop.xlane.xlu2 %1859 }
 0x5f8   :  { %v1864_v15 = vmul.f32 %v1860_v49, %v6605_v43 }
 0x5fa   :  { %v1866_v24 = vadd.f32 1e-06, %v1864_v15 }
 0x5fc   :  { %6108 = vrsqrt.f32 %v1866_v24  ;;  %vm1874_vm15 = vweird.f32 %v1866_v24 }
 0x602   :  { %v6109_v17 = vpop.eup %6108 }
 0x603   :  { %v1869_v2 = vmul.f32 %v6109_v17, %v1866_v24  ;;  %vm1875_vm14 = vweird.f32 %v6109_v17 }
 0x604   :  { %vm1876_vm2 = vmor %vm1874_vm15, %vm1875_vm14 }
 0x605   :  { %v1870_v25 = vmul.f32 %v6109_v17, %v1869_v2 }
 0x607   :  { %v1871_v9 = vmul.f32 0.5, %v1870_v25 }
 0x609   :  { %v1872_v0 = vsub.f32 1.5, %v1871_v9  ;;  %v1863_v13 = vpop.xlane.xlu1 %1862 }
 0x60a   :  { %v1865_v30 = vmul.f32 %v1863_v13, %v6605_v43 }
 0x60b   :  { %v1873_v31 = vmul.f32 %v6109_v17, %v1872_v0 }
 0x60c   :  { %v1867_v63 = vadd.f32 1e-06, %v1865_v30 }
 0x60d   :  { %v1877_v32 = vsel %vm1876_vm2, %v6109_v17, %v1873_v31 }
 0x60e   :  { %v1888_v44 = vmul.f32 %v1877_v32, %v7158_v56  ;;  %6110 = vrsqrt.f32 %v1867_v63  ;;  %vm1884_vm4 = vweird.f32 %v1867_v63 }
 0x610   :  { %v1893_v33 = vmul.f32 %v6063_v4, %v1888_v44 }
 0x612   :  { %5893 = vmatmul.msk.f32.vlgmr.msrb.gmra.mxu0 %vm206_vm1, %v1893_v33  ;;  %5895 = vmatmul.msk.f32.vlgmr.msrb.gmra.mxu1 %vm206_vm1, %v1893_v33 }
 0x614   :  { %v6111_v36 = vpop.eup %6110 }
 0x615   :  { %v1879_v21 = vmul.f32 %v6111_v36, %v1867_v63  ;;  %vm1885_vm3 = vweird.f32 %v6111_v36 }
 0x616   :  { %vm1886_vm5 = vmor %vm1884_vm4, %vm1885_vm3 }
 0x617   :  { %v1880_v37 = vmul.f32 %v6111_v36, %v1879_v21  ;;  %v2093_v21 = vld [vmem:[#allocation2 + $0x78] sm:$0xff] }
 0x618   :  { %2108 = vmatpush.msrb.mxu3 %v2093_v21 }
 0x619   :  { %v1881_v11 = vmul.f32 0.5, %v1880_v37  ;;  %v2133_v37 = vld [vmem:[#allocation5 + $0x78] sm:$0xff] }
 0x61a   :  { %2142 = vmatpush.msra.mxu0 %v2133_v37 }
 0x61b   :  { %v1882_v38 = vsub.f32 1.5, %v1881_v11  ;;  %v2092_v11 = vld [vmem:[#allocation2 + $0x70] sm:$0xff] }
 0x61c   :  { %2109 = vmatpush.msrb.mxu3 %v2092_v11 }
 0x61d   :  { %v1883_v12 = vmul.f32 %v6111_v36, %v1882_v38  ;;  %v2132_v38 = vld [vmem:[#allocation5 + $0x70] sm:$0xff] }
 0x61e   :  { %2143 = vmatpush.msra.mxu0 %v2132_v38 }
 0x61f   :  { %v1887_v39 = vsel %vm1886_vm5, %v6111_v36, %v1883_v12  ;;  %v2164_v12 = vld [vmem:[#allocation7 + $0x70] sm:$0xff] }
 0x620   :  { %v1889_v60 = vmul.f32 %v1887_v39, %v7164_v14  ;;  %v2091_v39 = vld [vmem:[#allocation2 + $0x68] sm:$0xff] }
 0x621   :  { %2110 = vmatpush.msrb.mxu3 %v2091_v39 }
 0x622   :  { %v1894_v28 = vmul.f32 %v6063_v4, %v1889_v60  ;;  %v2131_v60 = vld [vmem:[#allocation5 + $0x68] sm:$0xff] }
 0x623   :  { %2144 = vmatpush.msra.mxu0 %v2131_v60 }
 0x624   :  { %5894 = vmatmul.msk.f32.gmra.mxu0 %vm206_vm1, %v1894_v28  ;;  %5896 = vmatmul.msk.f32.gmra.mxu1 %vm206_vm1, %v1894_v28  ;;  %v2090_v28 = vld [vmem:[#allocation2 + $0x60] sm:$0xff] }
 0x625   :  { %2111 = vmatpush.msrb.mxu3 %v2090_v28  ;;  %2145 = vmatpush.msra.mxu0 %v2130_v51 }
 0x68f   :  { %v1926_v46 = vpop.f32.mrf.mxu0  ;;  %v1957_v49 = vpop.f32.mrf.mxu1 }
 0x690   :  { %v5897_v16 = vmul.f32 -1.442695, %v1926_v46 }
 0x692   :  { %6112 = vpow2.f32 %v5897_v16  ;;  %v2129_v16 = vld [vmem:[#allocation5 + $0x58] sm:$0xff] }
 0x693   :  { %2146 = vmatpush.msra.mxu0 %v2129_v16 }
 0x698   :  { %v6113_v48 = vpop.eup %6112 }
 0x699   :  { %v1969_v22 = vadd.f32 1.0, %v6113_v48 }
 0x69b   :  { %6114 = vrcp.f32 %v1969_v22  ;;  %v1982_v61 = vand.u32 2147483648, %v1969_v22  ;;  %v1980_v6 = vand.u32 2147483647, %v1969_v22  ;;  %vm1976_vm7 = vweird.f32 %v1969_v22 }
 0x69d   :  { %v1983_v52 = vor.u32 1.1754944e-38, %v1982_v61  ;;  %vm1981_vm14 = vcmp.eq.f32.partialorder %v1980_v6, 8.507059e+37 }
 0x6a1   :  { %v6115_v27 = vpop.eup %6114  ;;  %v1929_v57 = vpop.f32.mrf.mxu0 }
 0x6a2   :  { %v1972_v42 = vmul.f32 %v6115_v27, %v1969_v22  ;;  %v5898_v59 = vmul.f32 -1.442695, %v1929_v57  ;;  %vm1977_vm6 = vweird.f32 %v6115_v27  ;;  %v1960_v0 = vpop.f32.mrf.mxu1  ;;  %v2128_v22 = vld [vmem:[#allocation5 + $0x50] sm:$0xff] }
 0x6a3   :  { %vm1978_vm8 = vmor %vm1976_vm7, %vm1977_vm6  ;;  %2147 = vmatpush.msra.mxu0 %v2128_v22 }
 0x6a4   :  { %v1973_v18 = vsub.f32 1.0, %v1972_v42  ;;  %6116 = vpow2.f32 %v5898_v59  ;;  %v2086_v42 = vld [vmem:[#allocation2 + $0x40] sm:$0xff] }
 0x6a5   :  { %v2126_v59 = vld [vmem:[#allocation5 + $0x40] sm:$0xff] }
 0x6a6   :  { %v1974_v62 = vmul.f32 %v6115_v27, %v1973_v18  ;;  %v2158_v18 = vld [vmem:[#allocation7 + $0x40] sm:$0xff] }
 0x6a8   :  { %v1975_v58 = vadd.f32 %v6115_v27, %v1974_v62 }
 0x6aa   :  { %v6117_v41 = vpop.eup %6116  ;;  %v1979_v45 = vsel %vm1978_vm8, %v6115_v27, %v1975_v58  ;;  %v2127_v27 = vld [vmem:[#allocation5 + $0x48] sm:$0xff] }
 0x6ab   :  { %v1984_v5 = vsel %vm1981_vm14, %v1983_v52, %v1979_v45  ;;  %v1970_v10 = vadd.f32 1.0, %v6117_v41  ;;  %2148 = vmatpush.msra.mxu0 %v2127_v27 }
 0x6ac   :  { %v2001_v7 = vmul.f32 %v1984_v5, %v1926_v46  ;;  %v2089_v46 = vld [vmem:[#allocation2 + $0x58] sm:$0xff] }
 0x6ad   :  { %6118 = vrcp.f32 %v1970_v10  ;;  %v1997_v3 = vand.u32 2147483648, %v1970_v10  ;;  %v1995_v26 = vand.u32 2147483647, %v1970_v10  ;;  %vm1991_vm2 = vweird.f32 %v1970_v10  ;;  %2112 = vmatpush.msrb.mxu3 %v2089_v46  ;;  %2149 = vmatpush.msra.mxu0 %v2126_v59 }
 0x6ae   :  { %v2003_v15 = vmul.f32 %v2001_v7, %v1957_v49 }
 0x6af   :  { %v1998_v17 = vor.u32 1.1754944e-38, %v1997_v3  ;;  %vm1996_vm4 = vcmp.eq.f32.partialorder %v1995_v26, 8.507059e+37  ;;  %2113 = vmatpush.msrb.mxu3 %v2088_v35 }
 0x6b0   :  { %5899 = vmatmul.msk.f32.vlgmr.msrb.gmra.mxu2 %vm206_vm1, %v2003_v15 }
 0x6b1   :  { %2114 = vmatpush.msrb.mxu3 %v2087_v55 }
 0x6b3   :  { %v6119_v19 = vpop.eup %6118  ;;  %2115 = vmatpush.msrb.mxu3 %v2086_v42 }
 0x6b4   :  { %v1987_v53 = vmul.f32 %v6119_v19, %v1970_v10  ;;  %vm1992_vm15 = vweird.f32 %v6119_v19  ;;  %v6064_v10 = vld [vmem:[%s8411_s3 + $0x1] ss:$0 sm:$0xff] }
 0x6b5   :  { %vm1993_vm3 = vmor %vm1991_vm2, %vm1992_vm15 }
 0x6b6   :  { %v1988_v24 = vsub.f32 1.0, %v1987_v53 }
 0x6b8   :  { %v1989_v29 = vmul.f32 %v6119_v19, %v1988_v24 }
 0x6ba   :  { %v1990_v8 = vadd.f32 %v6119_v19, %v1989_v29 }
 0x6bc   :  { %v1994_v2 = vsel %vm1993_vm3, %v6119_v19, %v1990_v8 }
 0x6bd   :  { %v1999_v25 = vsel %vm1996_vm4, %v1998_v17, %v1994_v2 }
 0x6be   :  { %v2002_v9 = vmul.f32 %v1999_v25, %v1929_v57  ;;  %v2159_v57 = vld [vmem:[#allocation7 + $0x48] sm:$0xff] }
 0x6c0   :  { %v2004_v13 = vmul.f32 %v2002_v9, %v1960_v0 }
 0x6c2   :  { %5900 = vmatmul.msk.f32.gmra.mxu2 %vm206_vm1, %v2004_v13 }
 0x733   :  { %v2036_v30 = vpop.f32.mrf.mxu2 }
 0x734   :  { %v7183_v31 = vadd.f32 %v2036_v30, %v7158_v56  ;;  %v2165_v56 = vld [vmem:[#allocation7 + $0x78] sm:$0xff] }
 0x735   :  { %2174 = vmatpush.msra.mxu1 %v2165_v56 }
 0x736   :  { %v2046_v4 = vmul.f32 %v7183_v31, %v7183_v31 }
 0x737   :  { %2175 = vmatpush.msra.mxu1 %v2164_v12 }
 0x738   :  { %v2048_v63 = vsel %vm206_vm1, %v2046_v4, 0.0 }
 0x739   :  { %2049 = vadd.xlane.f32.xlu0 %v2048_v63 }
 0x745   :  { %v2039_v32 = vpop.f32.mrf.mxu2 }
 0x746   :  { %v7189_v44 = vadd.f32 %v2039_v32, %v7164_v14  ;;  %v2163_v14 = vld [vmem:[#allocation7 + $0x68] sm:$0xff] }
 0x747   :  { %2176 = vmatpush.msra.mxu1 %v2163_v14 }
 0x748   :  { %v2047_v33 = vmul.f32 %v7189_v44, %v7189_v44 }
 0x749   :  { %2177 = vmatpush.msra.mxu1 %v2162_v40 }
 0x74a   :  { %v2051_v36 = vsel %vm206_vm1, %v2047_v33, 0.0 }
 0x74b   :  { %2052 = vadd.xlane.f32.xlu2 %v2051_v36  ;;  %2178 = vmatpush.msra.mxu1 %v2161_v23 }
 0x74d   :  { %2179 = vmatpush.msra.mxu1 %v2160_v50 }
 0x74f   :  { %2180 = vmatpush.msra.mxu1 %v2159_v57 }
 0x751   :  { %2181 = vmatpush.msra.mxu1 %v2158_v18 }
 0x7ac   :  { %v2050_v47 = vpop.xlane.xlu0 %2049 }
 0x7ad   :  { %v2054_v48 = vmul.f32 %v2050_v47, %v6605_v43 }
 0x7af   :  { %v2056_v54 = vadd.f32 1e-06, %v2054_v48 }
 0x7b1   :  { %6120 = vrsqrt.f32 %v2056_v54  ;;  %vm2064_vm6 = vweird.f32 %v2056_v54 }
 0x7b7   :  { %v6121_v61 = vpop.eup %6120 }
 0x7b8   :  { %v2059_v62 = vmul.f32 %v6121_v61, %v2056_v54  ;;  %vm2065_vm5 = vweird.f32 %v6121_v61 }
 0x7b9   :  { %vm2066_vm7 = vmor %vm2064_vm6, %vm2065_vm5 }
 0x7ba   :  { %v2060_v6 = vmul.f32 %v6121_v61, %v2059_v62 }
 0x7bc   :  { %v2061_v58 = vmul.f32 0.5, %v2060_v6 }
 0x7be   :  { %v2062_v52 = vsub.f32 1.5, %v2061_v58  ;;  %v2053_v41 = vpop.xlane.xlu2 %2052 }
 0x7bf   :  { %v2055_v45 = vmul.f32 %v2053_v41, %v6605_v43 }
 0x7c0   :  { %v2063_v5 = vmul.f32 %v6121_v61, %v2062_v52 }
 0x7c1   :  { %v2057_v7 = vadd.f32 1e-06, %v2055_v45 }
 0x7c2   :  { %v2067_v49 = vsel %vm2066_vm7, %v6121_v61, %v2063_v5 }
 0x7c3   :  { %v2078_v15 = vmul.f32 %v2067_v49, %v7183_v31  ;;  %6122 = vrsqrt.f32 %v2057_v7  ;;  %vm2074_vm14 = vweird.f32 %v2057_v7 }
 0x7c5   :  { %v2083_v19 = vmul.f32 %v6064_v10, %v2078_v15 }
 0x7c7   :  { %5902 = vmatmul.msk.f32.vlgmr.msrb.gmra.mxu3 %vm206_vm1, %v2083_v19  ;;  %5904 = vmatmul.msk.f32.vlgmr.msra.gmra.mxu0 %vm206_vm1, %v2083_v19 }
 0x7c8   :  { %5906 = vmatmul.msk.f32.vlgmr.msra.gmra.mxu1 %vm206_vm1, %v2083_v19 }
 0x7c9   :  { %v6123_v53 = vpop.eup %6122 }
 0x7ca   :  { %v2069_v24 = vmul.f32 %v6123_v53, %v2057_v7  ;;  %vm2075_vm8 = vweird.f32 %v6123_v53 }
 0x7cb   :  { %vm2076_vm15 = vmor %vm2074_vm14, %vm2075_vm8 }
 0x7cc   :  { %v2070_v3 = vmul.f32 %v6123_v53, %v2069_v24 }
 0x7ce   :  { %v2071_v29 = vmul.f32 0.5, %v2070_v3 }
 0x7d0   :  { %v2072_v26 = vsub.f32 1.5, %v2071_v29 }
 0x7d2   :  { %v2073_v8 = vmul.f32 %v6123_v53, %v2072_v26 }
 0x7d4   :  { %v2077_v17 = vsel %vm2076_vm15, %v6123_v53, %v2073_v8 }
 0x7d5   :  { %v2079_v2 = vmul.f32 %v2077_v17, %v7189_v44 }
 0x7d7   :  { %v2084_v25 = vmul.f32 %v6064_v10, %v2079_v2 }
 0x7d9   :  { %5903 = vmatmul.msk.f32.gmra.mxu3 %vm206_vm1, %v2084_v25  ;;  %5905 = vmatmul.msk.f32.gmra.mxu0 %vm206_vm1, %v2084_v25 }
 0x7da   :  { %5907 = vmatmul.msk.f32.gmra.mxu1 %vm206_vm1, %v2084_v25 }
 0x844   :  { %v2151_v9 = vpop.f32.mrf.mxu0 }
 0x845   :  { %2437 = vrot.lane.b32.xlu0 %v2151_v9, %s6442_s29  ;;  %2431 = vrot.lane.b32.xlu1 %v2151_v9, %s6440_s2  ;;  %v2451_v21 = vrot.slane %v2151_v9, 4 }
 0x846   :  { %2443 = vrot.lane.b32.xlu2 %v2151_v9, %s6441_s28 }
 0x84a   :  { %v2117_v0 = vpop.f32.mrf.mxu3 }
 0x84b   :  { %v7210_v13 = vmul.f32 0.25, %v2117_v0 }
 0x84d   :  { %2191 = vrot.lane.b32.xlu0 %v7210_v13, %s6440_s2  ;;  %2197 = vrot.lane.b32.xlu1 %v7210_v13, %s6442_s29  ;;  %v2211_v27 = vrot.slane %v7210_v13, 4 }
 0x84e   :  { %2203 = vrot.lane.b32.xlu2 %v7210_v13, %s6441_s28 }
 0x856   :  { %v7218_v30 = vpop.f32.mrf.mxu0 }
 0x857   :  { %2445 = vrot.lane.b32.xlu2 %v7218_v30, %s6441_s28  ;;  %2439 = vrot.lane.b32.xlu1 %v7218_v30, %s6442_s29  ;;  %v2507_v57 = vrot.slane %v7218_v30, 4 }
 0x858   :  { %2433 = vrot.lane.b32.xlu0 %v7218_v30, %s6440_s2 }
 0x85c   :  { %v2120_v4 = vpop.f32.mrf.mxu3 }
 0x85d   :  { %v7226_v63 = vmul.f32 0.25, %v2120_v4 }
 0x85f   :  { %2205 = vrot.lane.b32.xlu2 %v7226_v63, %s6441_s28  ;;  %2199 = vrot.lane.b32.xlu1 %v7226_v63, %s6442_s29  ;;  %v2267_v6 = vrot.slane %v7226_v63, 4 }
 0x860   :  { %2193 = vrot.lane.b32.xlu0 %v7226_v63, %s6440_s2 }
 0x8a0   :  { %v2444_v32 = vpop.permute.xlu2 %2443 }
 0x8a1   :  { %v2461_v36 = vrot.slane %v2444_v32, 4 }
 0x8a8   :  { %v2204_v33 = vpop.permute.xlu2 %2203 }
 0x8a9   :  { %v2221_v42 = vrot.slane %v2204_v33, 4 }
 0x8b1   :  { %v7238_v28 = vpop.permute.xlu2 %2445 }
 0x8b2   :  { %v2517_v58 = vrot.slane %v7238_v28, 4 }
 0x8b7   :  { %v2438_v37 = vpop.permute.xlu0 %2437  ;;  %v2432_v56 = vpop.permute.xlu1 %2431 }
 0x8b8   :  { %v2449_v11 = vrot.slane %v2438_v37, 4  ;;  %v2452_v38 = vsel %vm373_vm9, %v2438_v37, %v2451_v21  ;;  %v2462_v12 = vsel %vm373_vm9, %v2461_v36, %v2432_v56  ;;  %v2463_v39 = vrot.slane %v2432_v56, 4 }
 0x8b9   :  { %v2460_v60 = vperm.slane %v2452_v38, %v6649_v20  ;;  %v2468_v14 = vperm.slane %v2462_v12, %v6649_v20  ;;  %v7268_v0 = vpop.permute.xlu2 %2205 }
 0x8ba   :  { %v2450_v51 = vsel %vm373_vm9, %v2449_v11, %v2151_v9  ;;  %v2464_v40 = vsel %vm373_vm9, %v2444_v32, %v2463_v39  ;;  %v2277_v12 = vrot.slane %v7268_v0, 4 }
 0x8bb   :  { %v2456_v46 = vperm.slane %v2450_v51, %v6649_v20  ;;  %v2487_v16 = vrot.slane %v2460_v60, 4  ;;  %v2472_v47 = vperm.slane %v2464_v40, %v6649_v20  ;;  %v2473_v23 = vrot.slane %v2468_v14, 4 }
 0x8bd   :  { %v2475_v48 = vrot.slane %v2456_v46, 4  ;;  %v2474_v35 = vsel %vm373_vm9, %v2473_v23, %v2456_v46  ;;  %v2485_v22 = vrot.slane %v2472_v47, 4  ;;  %v2488_v50 = vsel %vm373_vm9, %v2472_v47, %v2487_v16 }
 0x8be   :  { %v2480_v54 = vperm.slane %v2474_v35, %v6655_v34  ;;  %v2496_v55 = vperm.slane %v2488_v50, %v6655_v34 }
 0x8bf   :  { %v2476_v59 = vsel %vm373_vm9, %v2468_v14, %v2475_v48  ;;  %v2486_v18 = vsel %vm373_vm9, %v2485_v22, %v2460_v60  ;;  %v2192_v61 = vpop.permute.xlu0 %2191  ;;  %v2198_v62 = vpop.permute.xlu1 %2197 }
 0x8c0   :  { %v2484_v52 = vperm.slane %v2476_v59, %v6655_v34  ;;  %v2492_v41 = vperm.slane %v2486_v18, %v6655_v34  ;;  %v2503_v45 = vrot.slane %v2496_v55, 4  ;;  %v2497_v5 = vrot.slane %v2480_v54, 4 }
 0x8c1   :  { %v2222_v10 = vsel %vm373_vm9, %v2221_v42, %v2192_v61  ;;  %v2223_v7 = vrot.slane %v2192_v61, 4  ;;  %v2209_v49 = vrot.slane %v2198_v62, 4  ;;  %v2212_v24 = vsel %vm373_vm9, %v2198_v62, %v2211_v27 }
 0x8c2   :  { %v2499_v15 = vrot.slane %v2484_v52, 4  ;;  %v2501_v19 = vrot.slane %v2492_v41, 4  ;;  %v2504_v53 = vsel %vm373_vm9, 0.0, %v2503_v45  ;;  %v2572_v3 = vsel %vm373_vm9, %v2503_v45, %v2492_v41 }
 0x8c3   :  { %v2577_v29 = vrot.slane %v2504_v53, 4  ;;  %v2224_v26 = vsel %vm373_vm9, %v2204_v33, %v2223_v7  ;;  %v2228_v8 = vperm.slane %v2222_v10, %v6649_v20  ;;  %v7266_v9 = vperm.slane %v2572_v3, %v6649_v20 }
 0x8c4   :  { %v2500_v17 = vsel %vm373_vm9, 0.0, %v2499_v15  ;;  %v2502_v2 = vsel %vm373_vm9, 0.0, %v2501_v19  ;;  %v2561_v25 = vsel %vm373_vm9, %v2499_v15, %v2480_v54  ;;  %v2232_v36 = vperm.slane %v2224_v26, %v6649_v20 }
 0x8c5   :  { %v7271_v4 = vperm.slane %v2561_v25, %v6649_v20  ;;  %v2566_v32 = vrot.slane %v2500_v17, 4  ;;  %v2233_v33 = vrot.slane %v2228_v8, 4  ;;  %v2498_v21 = vsel %vm373_vm9, 0.0, %v2497_v5 }
 0x8c6   :  { %v2210_v37 = vsel %vm373_vm9, %v2209_v49, %v7210_v13  ;;  %v2220_v56 = vperm.slane %v2212_v24, %v6649_v20  ;;  %v2578_v11 = vsel %vm373_vm9, %v2577_v29, %v2502_v2  ;;  %v2245_v39 = vrot.slane %v2232_v36, 4 }
 0x8c7   :  { %v2567_v38 = vsel %vm373_vm9, %v2566_v32, %v2498_v21  ;;  %v2216_v60 = vperm.slane %v2210_v37, %v6649_v20  ;;  %v7286_v40 = vperm.slane %v2578_v11, %v6649_v20  ;;  %v2597_v13 = vrot.slane %v7266_v9, 4 }
 0x8c8   :  { %v2247_v14 = vrot.slane %v2220_v56, 4  ;;  %v7283_v51 = vperm.slane %v2567_v38, %v6649_v20  ;;  %v2246_v47 = vsel %vm373_vm9, %v2245_v39, %v2220_v56  ;;  %v2585_v48 = vrot.slane %v7271_v4, 4 }
 0x8c9   :  { %v2234_v46 = vsel %vm373_vm9, %v2233_v33, %v2216_v60  ;;  %v2235_v16 = vrot.slane %v2216_v60, 4  ;;  %v2440_v23 = vpop.permute.xlu1 %2439  ;;  %v2252_v50 = vperm.slane %v2246_v47, %v6655_v34 }
 0x8ca   :  { %v2240_v35 = vperm.slane %v2234_v46, %v6655_v34  ;;  %v2248_v22 = vsel %vm373_vm9, %v2232_v36, %v2247_v14  ;;  %v2505_v54 = vrot.slane %v2440_v23, 4  ;;  %v2434_v55 = vpop.permute.xlu0 %2433  ;;  %v2508_v59 = vsel %vm373_vm9, %v2440_v23, %v2507_v57 }
 0x8cb   :  { %v2236_v27 = vsel %vm373_vm9, %v2228_v8, %v2235_v16  ;;  %v2256_v42 = vperm.slane %v2248_v22, %v6655_v34  ;;  %v2518_v18 = vsel %vm373_vm9, %v2517_v58, %v2434_v55  ;;  %v2261_v52 = vrot.slane %v2252_v50, 4 }
 0x8cc   :  { %v2244_v61 = vperm.slane %v2236_v27, %v6655_v34  ;;  %v2257_v62 = vrot.slane %v2240_v35, 4  ;;  %v2506_v41 = vsel %vm373_vm9, %v2505_v54, %v7218_v30  ;;  %v2516_v10 = vperm.slane %v2508_v59, %v6649_v20 }
 0x8cd   :  { %v2263_v45 = vrot.slane %v2256_v42, 4  ;;  %v2512_v5 = vperm.slane %v2506_v41, %v6649_v20  ;;  %v2519_v7 = vrot.slane %v2434_v55, 4  ;;  %v2524_v57 = vperm.slane %v2518_v18, %v6649_v20 }
 0x8ce   :  { %v7305_v49 = vsel %vm373_vm9, 0.0, %v2257_v62  ;;  %v2259_v15 = vrot.slane %v2244_v61, 4  ;;  %v2598_v58 = vsel %vm373_vm9, %v7286_v40, %v2597_v13  ;;  %v2262_v19 = vsel %vm373_vm9, 0.0, %v2261_v52 }
 0x8cf   :  { %v2264_v53 = vsel %vm373_vm9, 0.0, %v2263_v45  ;;  %v2332_v30 = vsel %vm373_vm9, %v2263_v45, %v2252_v50  ;;  %v2531_v24 = vrot.slane %v2512_v5, 4  ;;  %v2543_v8 = vrot.slane %v2516_v10, 4 }
 0x8d0   :  { %v7314_v3 = vsel %vm373_vm9, 0.0, %v2259_v15  ;;  %v2321_v29 = vsel %vm373_vm9, %v2259_v15, %v2240_v35  ;;  %v2337_v26 = vrot.slane %v2264_v53, 4  ;;  %v7318_v17 = vperm.slane %v2332_v30, %v6649_v20 }
 0x8d1   :  { %v2520_v2 = vsel %vm373_vm9, %v7238_v28, %v2519_v7  ;;  %v2529_v25 = vrot.slane %v2524_v57, 4  ;;  %v2532_v32 = vsel %vm373_vm9, %v2524_v57, %v2531_v24  ;;  %v2326_v36 = vrot.slane %v7314_v3, 4 }
 0x8d2   :  { %v2338_v33 = vsel %vm373_vm9, %v2337_v26, %v2262_v19  ;;  %v2528_v21 = vperm.slane %v2520_v2, %v6649_v20  ;;  %v2540_v37 = vperm.slane %v2532_v32, %v6655_v34  ;;  %v2586_v38 = vsel %vm373_vm9, %v7283_v51, %v2585_v48  ;;  %v2194_v7 = vpop.permute.xlu0 %2193 }
 0x8d3   :  { %v7328_v56 = vperm.slane %v2338_v33, %v6649_v20  ;;  %v2530_v11 = vsel %vm373_vm9, %v2529_v25, %v2512_v5  ;;  %v2606_v28 = vperm.slane %v2598_v58, %v6655_v34  ;;  %v2357_v46 = vrot.slane %v7318_v17, 4 }
 0x8d4   :  { %v2536_v39 = vperm.slane %v2530_v11, %v6655_v34  ;;  %v2541_v60 = vrot.slane %v2528_v21, 4  ;;  %v2544_v14 = vsel %vm373_vm9, %v2528_v21, %v2543_v8  ;;  %v2555_v13 = vrot.slane %v2540_v37, 4 }
 0x8d5   :  { %v2552_v16 = vperm.slane %v2544_v14, %v6655_v34  ;;  %v2594_v47 = vperm.slane %v2586_v38, %v6655_v34  ;;  %v2611_v23 = vrot.slane %v2606_v28, 4  ;;  %v2355_v54 = vrot.slane %v7328_v56, 4 }
 0x8d6   :  { %v2542_v35 = vsel %vm373_vm9, %v2541_v60, %v2516_v10  ;;  %v2553_v22 = vrot.slane %v2536_v39, 4  ;;  %v2556_v48 = vsel %vm373_vm9, 0.0, %v2555_v13  ;;  %v2615_v50 = vsel %vm373_vm9, %v2555_v13, %v2536_v39  ;;  %v2200_v10 = vpop.permute.xlu1 %2199 }
 0x8d7   :  { %v7344_v55 = vperm.slane %v2542_v35, %v6655_v34  ;;  %v2559_v27 = vrot.slane %v2552_v16, 4  ;;  %v2620_v42 = vrot.slane %v2556_v48, 4  ;;  %v7347_v59 = vperm.slane %v2615_v50, %v6649_v20 }
 0x8d8   :  { %v2612_v18 = vsel %vm373_vm9, %v2611_v23, %v2594_v47  ;;  %v2583_v61 = vrot.slane %v7283_v51, 4  ;;  %v2595_v62 = vrot.slane %v7286_v40, 4  ;;  %v2554_v52 = vsel %vm373_vm9, 0.0, %v2553_v22 }
 0x8d9   :  { %v2557_v41 = vrot.slane %v7344_v55, 4  ;;  %v7355_v45 = vsel %vm373_vm9, 0.0, %v2559_v27  ;;  %v2626_v5 = vsel %vm373_vm9, %v2559_v27, %v7344_v55  ;;  %5912 = vmatpush.xpose.msk.msra.mxu3 %vm168_vm0, %v2612_v18  ;;  %v7361_v15 = vsel %vm373_vm9, %v2620_v42, %v2554_v52 }
 0x8da   :  { %v7364_v51 = vperm.slane %v2626_v5, %v6649_v20  ;;  %v2584_v40 = vsel %vm373_vm9, %v2583_v61, %v7271_v4  ;;  %v2596_v57 = vsel %vm373_vm9, %v2595_v62, %v7266_v9  ;;  %v2631_v58 = vrot.slane %v7355_v45, 4 }
 0x8db   :  { %v2590_v19 = vperm.slane %v2584_v40, %v6655_v34  ;;  %v2602_v53 = vperm.slane %v2596_v57, %v6655_v34  ;;  %v2613_v30 = vrot.slane %v2594_v47, 4  ;;  %v2265_v24 = vrot.slane %v2200_v10, 4 }
 0x8dc   :  { %v2268_v26 = vsel %vm373_vm9, %v2200_v10, %v2267_v6  ;;  %v2278_v8 = vsel %vm373_vm9, %v2277_v12, %v2194_v7  ;;  %v2279_v4 = vrot.slane %v2194_v7, 4  ;;  %v2325_v37 = vperm.slane %v2321_v29, %v6649_v20 }
 0x8dd   :  { %v2607_v2 = vrot.slane %v2602_v53, 4  ;;  %v2614_v9 = vsel %vm373_vm9, %v2606_v28, %v2613_v30  ;;  %v2609_v25 = vrot.slane %v2590_v19, 4  ;;  %v2276_v32 = vperm.slane %v2268_v26, %v6649_v20 }
 0x8de   :  { %5914 = vmatpush.xpose.msk.msrb.mxu0 %vm168_vm0, %v2614_v9  ;;  %v2266_v33 = vsel %vm373_vm9, %v2265_v24, %v7226_v63  ;;  %v2280_v21 = vsel %vm373_vm9, %v7268_v0, %v2279_v4  ;;  %v2284_v6 = vperm.slane %v2278_v8, %v6649_v20  ;;  %v2327_v63 = vsel %vm373_vm9, %v2326_v36, %v7305_v49 }
 0x8df   :  { %v2608_v12 = vsel %vm373_vm9, %v2607_v2, %v2590_v19  ;;  %v2610_v11 = vsel %vm373_vm9, %v2602_v53, %v2609_v25  ;;  %v2272_v38 = vperm.slane %v2266_v33, %v6649_v20  ;;  %v2303_v28 = vrot.slane %v2276_v32, 4 }
 0x8e0   :  { %5908 = vmatpush.xpose.msk.msra.mxu2 %vm168_vm0, %v2608_v12  ;;  %v2288_v39 = vperm.slane %v2280_v21, %v6649_v20  ;;  %v2289_v60 = vrot.slane %v2284_v6, 4  ;;  %v2345_v0 = vrot.slane %v2325_v37, 4  ;;  %v2331_v14 = vperm.slane %v2327_v63, %v6649_v20 }
 0x8e1   :  { %v2291_v29 = vrot.slane %v2272_v38, 4  ;;  %v2358_v13 = vsel %vm373_vm9, %v7328_v56, %v2357_v46  ;;  %v2356_v16 = vsel %vm373_vm9, %v2355_v54, %v7318_v17  ;;  %v2558_v5 = vsel %vm373_vm9, 0.0, %v2557_v41 }
 0x8e2   :  { %v2290_v47 = vsel %vm373_vm9, %v2289_v60, %v2272_v38  ;;  %v2301_v23 = vrot.slane %v2288_v39, 4  ;;  %v2304_v35 = vsel %vm373_vm9, %v2288_v39, %v2303_v28  ;;  %v2366_v3 = vperm.slane %v2358_v13, %v6655_v34 }
 0x8e3   :  { %v2292_v49 = vsel %vm373_vm9, %v2284_v6, %v2291_v29  ;;  %v2296_v36 = vperm.slane %v2290_v47, %v6655_v34  ;;  %v2312_v22 = vperm.slane %v2304_v35, %v6655_v34  ;;  %v2346_v48 = vsel %vm373_vm9, %v2331_v14, %v2345_v0 }
 0x8e4   :  { %5910 = vmatpush.xpose.msk.msrb.mxu2 %vm168_vm0, %v2610_v11  ;;  %v2300_v56 = vperm.slane %v2292_v49, %v6655_v34  ;;  %v2302_v46 = vsel %vm373_vm9, %v2301_v23, %v2276_v32  ;;  %v2354_v17 = vperm.slane %v2346_v48, %v6655_v34  ;;  %v2371_v50 = vrot.slane %v2366_v3, 4 }
 0x8e5   :  { %v2308_v54 = vperm.slane %v2302_v46, %v6655_v34  ;;  %v2313_v55 = vrot.slane %v2296_v36, 4  ;;  %v2319_v27 = vrot.slane %v2312_v22, 4  ;;  %v2343_v42 = vrot.slane %v2331_v14, 4 }
 0x8e6   :  { %v2315_v18 = vrot.slane %v2300_v56, 4  ;;  %v2372_v61 = vsel %vm373_vm9, %v2371_v50, %v2354_v17  ;;  %v2362_v62 = vperm.slane %v2356_v16, %v6655_v34  ;;  %v2373_v52 = vrot.slane %v2354_v17, 4 }
 0x8e7   :  { %v2314_v10 = vsel %vm373_vm9, 0.0, %v2313_v55  ;;  %v2317_v7 = vrot.slane %v2308_v54, 4  ;;  %v2320_v40 = vsel %vm373_vm9, 0.0, %v2319_v27  ;;  %5913 = vmatmul.msk.f32.vlgmr.msra.gmra.mxu3 %vm168_vm0, %v2372_v61  ;;  %v2386_v53 = vsel %vm373_vm9, %v2319_v27, %v2308_v54 }
 0x8e8   :  { %v2316_v57 = vsel %vm373_vm9, 0.0, %v2315_v18  ;;  %v2375_v19 = vsel %vm373_vm9, %v2315_v18, %v2296_v36  ;;  %v2391_v30 = vrot.slane %v2320_v40, 4  ;;  %v2344_v41 = vsel %vm373_vm9, %v2343_v42, %v2325_v37 }
 0x8e9   :  { %v2318_v24 = vsel %vm373_vm9, 0.0, %v2317_v7  ;;  %v2379_v26 = vperm.slane %v2375_v19, %v6649_v20  ;;  %v2380_v8 = vrot.slane %v2316_v57, 4  ;;  %v2350_v4 = vperm.slane %v2344_v41, %v6655_v34 }
 0x8ea   :  { %v2367_v2 = vrot.slane %v2362_v62, 4  ;;  %v2374_v9 = vsel %vm373_vm9, %v2366_v3, %v2373_v52  ;;  %v2625_v25 = vperm.slane %v7361_v15, %v6649_v20  ;;  %v2632_v33 = vsel %vm373_vm9, %v2631_v58, %v2558_v5 }
 0x8eb   :  { %v2381_v32 = vsel %vm373_vm9, %v2380_v8, %v2314_v10  ;;  %5915 = vmatmul.msk.f32.vlgmr.msrb.gmra.mxu0 %vm168_vm0, %v2374_v9  ;;  %v2639_v21 = vrot.slane %v7347_v59, 4  ;;  %v2651_v6 = vrot.slane %v7364_v51, 4  ;;  %v2390_v37 = vperm.slane %v2386_v53, %v6649_v20 }
 0x8ec   :  { %v2368_v12 = vsel %vm373_vm9, %v2367_v2, %v2350_v4  ;;  %v2636_v11 = vperm.slane %v2632_v33, %v6649_v20  ;;  %v2637_v38 = vrot.slane %v2625_v25, 4  ;;  %v2385_v28 = vperm.slane %v2381_v32, %v6649_v20 }
 0x8ed   :  { %5909 = vmatmul.msk.f32.vlgmr.msra.gmra.mxu2 %vm168_vm0, %v2368_v12  ;;  %v2640_v15 = vsel %vm373_vm9, %v2625_v25, %v2639_v21  ;;  %v2392_v45 = vsel %vm373_vm9, %v2391_v30, %v2318_v24  ;;  %v2399_v58 = vrot.slane %v2379_v26, 4  ;;  %v2369_v39 = vrot.slane %v2350_v4, 4  ;;  %v7480_v24 = vpop.f32.mrf.mxu1 }
 0x8ee   :  { %v2648_v60 = vperm.slane %v2640_v15, %v6655_v34  ;;  %v2652_v63 = vsel %vm373_vm9, %v2636_v11, %v2651_v6  ;;  %v2638_v0 = vsel %vm373_vm9, %v2637_v38, %v7347_v59  ;;  %v2649_v13 = vrot.slane %v2636_v11, 4 }
 0x8ef   :  { %v2660_v29 = vperm.slane %v2652_v63, %v6655_v34  ;;  %v2644_v14 = vperm.slane %v2638_v0, %v6655_v34  ;;  %v2396_v16 = vperm.slane %v2392_v45, %v6649_v20  ;;  %v2400_v23 = vsel %vm373_vm9, %v2385_v28, %v2399_v58 }
 0x8f0   :  { %v2667_v47 = vrot.slane %v2648_v60, 4  ;;  %v2411_v35 = vrot.slane %v2390_v37, 4  ;;  %v2397_v3 = vrot.slane %v2385_v28, 4  ;;  %v2650_v36 = vsel %vm373_vm9, %v2649_v13, %v7364_v51 }
 0x8f1   :  { %v2665_v49 = vrot.slane %v2660_v29, 4  ;;  %v2663_v22 = vrot.slane %v2644_v14, 4  ;;  %v2408_v48 = vperm.slane %v2400_v23, %v6655_v34  ;;  %v2656_v59 = vperm.slane %v2650_v36, %v6655_v34 }
 0x8f2   :  { %v2668_v56 = vsel %vm373_vm9, %v2660_v29, %v2667_v47  ;;  %v2412_v46 = vsel %vm373_vm9, %v2396_v16, %v2411_v35  ;;  %v2398_v17 = vsel %vm373_vm9, %v2397_v3, %v2379_v26  ;;  %v2409_v51 = vrot.slane %v2396_v16, 4 }
 0x8f3   :  { %v2666_v50 = vsel %vm373_vm9, %v2665_v49, %v2648_v60  ;;  %5922 = vmatpush.xpose.msk.msra.mxu0 %vm168_vm0, %v2668_v56  ;;  %v2420_v54 = vperm.slane %v2412_v46, %v6655_v34  ;;  %v2404_v55 = vperm.slane %v2398_v17, %v6655_v34  ;;  %v2370_v27 = vsel %vm373_vm9, %v2362_v62, %v2369_v39 }
 0x8f4   :  { %5920 = vmatpush.xpose.msk.msrb.mxu3 %vm168_vm0, %v2666_v50  ;;  %v2661_v42 = vrot.slane %v2656_v59, 4  ;;  %v2664_v18 = vsel %vm373_vm9, %v2656_v59, %v2663_v22  ;;  %v2427_v61 = vrot.slane %v2408_v48, 4  ;;  %v2410_v5 = vsel %vm373_vm9, %v2409_v51, %v2390_v37 }
 0x8f5   :  { %5911 = vmatmul.msk.f32.vlgmr.msrb.gmra.mxu2 %vm168_vm0, %v2370_v27  ;;  %v2425_v52 = vrot.slane %v2420_v54, 4  ;;  %v2416_v7 = vperm.slane %v2410_v5, %v6655_v34  ;;  %v2423_v62 = vrot.slane %v2404_v55, 4  ;;  %v7487_v9 = vpop.f32.mrf.mxu1 }
 0x8f6   :  { %v2662_v10 = vsel %vm373_vm9, %v2661_v42, %v2644_v14  ;;  %5918 = vmatpush.xpose.msk.msra.mxu2 %vm168_vm0, %v2664_v18  ;;  %v2428_v40 = vsel %vm373_vm9, %v2420_v54, %v2427_v61  ;;  %v6036_v13 = vpack.i.bf16 %v7487_v9, %v7480_v24 }
 0x8f7   :  { %5916 = vmatpush.xpose.msk.msrb.mxu1 %vm168_vm0, %v2662_v10  ;;  %v2426_v57 = vsel %vm373_vm9, %v2425_v52, %v2408_v48  ;;  %5923 = vmatmul.msk.f32.vlgmr.msra.gmra.mxu0 %vm168_vm0, %v2428_v40  ;;  %v2421_v19 = vrot.slane %v2416_v7, 4  ;;  %v2424_v30 = vsel %vm373_vm9, %v2416_v7, %v2423_v62 }
 0x8f8   :  { %5921 = vmatmul.msk.f32.vlgmr.msrb.gmra.mxu3 %vm168_vm0, %v2426_v57 }
 0x8f9   :  { %v2422_v53 = vsel %vm373_vm9, %v2421_v19, %v2404_v55 }
 0x8fa   :  { %5917 = vmatmul.msk.f32.vlgmr.msrb.gmra.mxu1 %vm168_vm0, %v2422_v53 }
 0x8fd   :  { %5919 = vmatmul.msk.f32.vlgmr.msra.gmra.mxu2 %vm168_vm0, %v2424_v30 }
 0x968   :  { %v3010_v26 = vpop.f32.mrf.mxu0 }
 0x969   :  { %v3120_v8 = vsel %vm6896_vm10, %v3010_v26, -1e+30 }
 0x96a   :  { %v3134_v41 = vsel %vm1291_vm11, %v3120_v8, -inf  ;;  %v2984_v4 = vpop.f32.mrf.mxu3 }
 0x96b   :  { %3135 = vmax.xlane.f32.xlu0 %v3134_v41  ;;  %v3119_v2 = vsel %vm6896_vm10, %v2984_v4, -1e+30 }
 0x96c   :  { %v3131_v21 = vsel %vm1291_vm11, %v3119_v2, -inf }
 0x970   :  { %v2932_v25 = vpop.f32.mrf.mxu2 }
 0x971   :  { %v3117_v32 = vsel %vm6896_vm10, %v2932_v25, -1e+30 }
 0x972   :  { %v3125_v33 = vsel %vm1291_vm11, %v3117_v32, -inf }
 0x973   :  { %3126 = vmax.xlane.f32.xlu2 %v3125_v33  ;;  %3132 = vmax.xlane.f32.xlu0 %v3131_v21 }
 0x974   :  { %v3114_v6 = vpop.f32.mrf.mxu0 }
 0x975   :  { %v3124_v37 = vsel %vm6896_vm10, %v3114_v6, -1e+30 }
 0x976   :  { %v3146_v12 = vsel %vm1291_vm11, %v3124_v37, -inf }
 0x977   :  { %3147 = vmax.xlane.f32.xlu1 %v3146_v12  ;;  %v3036_v38 = vpop.f32.mrf.mxu1 }
 0x978   :  { %v2958_v11 = vpop.f32.mrf.mxu2  ;;  %v3121_v15 = vsel %vm6896_vm10, %v3036_v38, -1e+30  ;;  %v2691_v38 = vrot.slane %v7480_v24, 4 }
 0x979   :  { %v3137_v28 = vsel %vm1291_vm11, %v3121_v15, -inf  ;;  %v3118_v29 = vsel %vm6896_vm10, %v2958_v11, -1e+30 }
 0x97a   :  { %v3128_v14 = vsel %vm1291_vm11, %v3118_v29, -inf }
 0x97b   :  { %3138 = vmax.xlane.f32.xlu0 %v3137_v28  ;;  %v3088_v45 = vpop.f32.mrf.mxu3  ;;  %v2747_v28 = vrot.slane %v7487_v9, 4 }
 0x97c   :  { %v3123_v58 = vsel %vm6896_vm10, %v3088_v45, -1e+30 }
 0x97d   :  { %v3143_v39 = vsel %vm1291_vm11, %v3123_v58, -inf }
 0x97f   :  { %3144 = vmax.xlane.f32.xlu1 %v3143_v39 }
 0x980   :  { %v3062_v60 = vpop.f32.mrf.mxu2 }
 0x981   :  { %v3122_v63 = vsel %vm6896_vm10, %v3062_v60, -1e+30 }
 0x982   :  { %v3140_v0 = vsel %vm1291_vm11, %v3122_v63, -inf }
 0x983   :  { %3141 = vmax.xlane.f32.xlu2 %v3140_v0 }
 0x987   :  { %3129 = vmax.xlane.f32.xlu1 %v3128_v14 }
 0x98f   :  { %6037 = vrot.lane.b32.xlu0 %v6036_v13, %s6442_s29 }
 0x99b   :  { %6032 = vrot.lane.b32.xlu2 %v6036_v13, %s6440_s2 }
 0x9a0   :  { %6042 = vrot.lane.b32.xlu1 %v6036_v13, %s6441_s28 }
 0x9de   :  { %v3136_v16 = vpop.xlane.xlu0 %3135 }
 0x9df   :  { %v3152_v47 = vsub.f32 %v3120_v8, %v3136_v16 }
 0x9e1   :  { %v3163_v23 = vmul.f32 1.442695, %v3152_v47 }
 0x9e3   :  { %6124 = vpow2.f32 %v3163_v23 }
 0x9e6   :  { %v3127_v35 = vpop.xlane.xlu2 %3126  ;;  %v3133_v3 = vpop.xlane.xlu0 %3132 }
 0x9e7   :  { %v3149_v49 = vsub.f32 %v3117_v32, %v3127_v35  ;;  %v3151_v36 = vsub.f32 %v3119_v2, %v3133_v3 }
 0x9e9   :  { %v7513_v22 = vpop.eup %6124  ;;  %v3157_v48 = vmul.f32 1.442695, %v3149_v49  ;;  %v3161_v59 = vmul.f32 1.442695, %v3151_v36 }
 0x9ea   :  { %v3182_v56 = vsel %vm1291_vm11, %v7513_v22, 0.0  ;;  %v3148_v46 = vpop.xlane.xlu1 %3147 }
 0x9eb   :  { %6126 = vpow2.f32 %v3157_v48  ;;  %3183 = vadd.xlane.f32.xlu2 %v3182_v56  ;;  %v3156_v17 = vsub.f32 %v3124_v37, %v3148_v46 }
 0x9ec   :  { %6128 = vpow2.f32 %v3161_v59 }
 0x9ed   :  { %v3171_v50 = vmul.f32 1.442695, %v3156_v17 }
 0x9ee   :  { %v3139_v27 = vpop.xlane.xlu0 %3138 }
 0x9ef   :  { %6130 = vpow2.f32 %v3171_v50  ;;  %v3153_v5 = vsub.f32 %v3121_v15, %v3139_v27 }
 0x9f1   :  { %v7517_v54 = vpop.eup %6126  ;;  %v3165_v40 = vmul.f32 1.442695, %v3153_v5 }
 0x9f2   :  { %v7519_v55 = vpop.eup %6128  ;;  %v3173_v51 = vsel %vm1291_vm11, %v7517_v54, 0.0  ;;  %v3145_v42 = vpop.xlane.xlu1 %3144 }
 0x9f3   :  { %3174 = vadd.xlane.f32.xlu1 %v3173_v51  ;;  %v3179_v18 = vsel %vm1291_vm11, %v7519_v55, 0.0  ;;  %v3155_v61 = vsub.f32 %v3123_v58, %v3145_v42 }
 0x9f4   :  { %3180 = vadd.xlane.f32.xlu0 %v3179_v18 }
 0x9f5   :  { %v7525_v52 = vpop.eup %6130  ;;  %v3169_v10 = vmul.f32 1.442695, %v3155_v61 }
 0x9f6   :  { %v3194_v7 = vsel %vm1291_vm11, %v7525_v52, 0.0  ;;  %v3142_v62 = vpop.xlane.xlu2 %3141 }
 0x9f7   :  { %6132 = vpow2.f32 %v3169_v10  ;;  %v3154_v30 = vsub.f32 %v3122_v63, %v3142_v62 }
 0x9f8   :  { %6134 = vpow2.f32 %v3165_v40 }
 0x9f9   :  { %v3167_v41 = vmul.f32 1.442695, %v3154_v30 }
 0x9fa   :  { %v3130_v57 = vpop.xlane.xlu1 %3129 }
 0x9fb   :  { %3195 = vadd.xlane.f32.xlu1 %v3194_v7  ;;  %v3150_v19 = vsub.f32 %v3118_v29, %v3130_v57 }
 0x9fd   :  { %v7529_v53 = vpop.eup %6132  ;;  %v3159_v26 = vmul.f32 1.442695, %v3150_v19 }
 0x9fe   :  { %v3191_v8 = vsel %vm1291_vm11, %v7529_v53, 0.0  ;;  %v7533_v4 = vpop.eup %6134  ;;  %v6033_v12 = vpop.permute.xlu2 %6032 }
 0x9ff   :  { %6136 = vpow2.f32 %v3159_v26  ;;  %3192 = vadd.xlane.f32.xlu0 %v3191_v8  ;;  %v3185_v33 = vsel %vm1291_vm11, %v7533_v4, 0.0  ;;  %v6035_v45 = vunpack.i.h.bf16 %v6033_v12  ;;  %v6034_v58 = vunpack.i.l.bf16 %v6033_v12 }
 0xa00   :  { %6138 = vpow2.f32 %v3167_v41 }
 0xa01   :  { %v6038_v25 = vpop.permute.xlu0 %6037  ;;  %v2759_v14 = vrot.slane %v6035_v45, 4  ;;  %v2703_v13 = vrot.slane %v6034_v58, 4 }
 0xa02   :  { %v6039_v21 = vunpack.i.l.bf16 %v6038_v25  ;;  %v6040_v6 = vunpack.i.h.bf16 %v6038_v25 }
 0xa04   :  { %v2689_v11 = vrot.slane %v6039_v21, 4  ;;  %v2745_v15 = vrot.slane %v6040_v6, 4  ;;  %v2692_v60 = vsel %vm373_vm9, %v6039_v21, %v2691_v38  ;;  %v2748_v63 = vsel %vm373_vm9, %v6040_v6, %v2747_v28 }
 0xa05   :  { %v7535_v2 = vpop.eup %6136  ;;  %v2700_v16 = vperm.slane %v2692_v60, %v6649_v20  ;;  %v2756_v23 = vperm.slane %v2748_v63, %v6649_v20 }
 0xa06   :  { %v3176_v32 = vsel %vm1291_vm11, %v7535_v2, 0.0  ;;  %v7541_v37 = vpop.eup %6138  ;;  %v2690_v0 = vsel %vm373_vm9, %v2689_v11, %v7480_v24  ;;  %v2746_v29 = vsel %vm373_vm9, %v2745_v15, %v7487_v9 }
 0xa07   :  { %3177 = vadd.xlane.f32.xlu2 %v3176_v32  ;;  %3186 = vadd.xlane.f32.xlu0 %v3185_v33  ;;  %v3188_v39 = vsel %vm1291_vm11, %v7541_v37, 0.0  ;;  %v2696_v35 = vperm.slane %v2690_v0, %v6649_v20  ;;  %v2752_v36 = vperm.slane %v2746_v29, %v6649_v20  ;;  %v2727_v9 = vrot.slane %v2700_v16, 4 }
 0xa08   :  { %v2783_v50 = vrot.slane %v2756_v23, 4 }
 0xa09   :  { %v2715_v51 = vrot.slane %v2696_v35, 4  ;;  %v2771_v7 = vrot.slane %v2752_v36, 4 }
 0xa0f   :  { %3189 = vadd.xlane.f32.xlu2 %v3188_v39 }
 0xa12   :  { %v6043_v47 = vpop.permute.xlu1 %6042 }
 0xa13   :  { %v6045_v3 = vunpack.i.h.bf16 %v6043_v47  ;;  %v6044_v49 = vunpack.i.l.bf16 %v6043_v47 }
 0xa15   :  { %v2757_v48 = vrot.slane %v6045_v3, 4  ;;  %v2701_v59 = vrot.slane %v6044_v49, 4  ;;  %v2704_v24 = vsel %vm373_vm9, %v6044_v49, %v2703_v13  ;;  %v2760_v56 = vsel %vm373_vm9, %v6045_v3, %v2759_v14 }
 0xa16   :  { %v2712_v46 = vperm.slane %v2704_v24, %v6649_v20  ;;  %v2768_v17 = vperm.slane %v2760_v56, %v6649_v20 }
 0xa17   :  { %v2702_v27 = vsel %vm373_vm9, %v2701_v59, %v6034_v58  ;;  %v2758_v42 = vsel %vm373_vm9, %v2757_v48, %v6035_v45 }
 0xa18   :  { %v2708_v18 = vperm.slane %v2702_v27, %v6649_v20  ;;  %v2725_v61 = vrot.slane %v2712_v46, 4  ;;  %v2728_v5 = vsel %vm373_vm9, %v2712_v46, %v2727_v9  ;;  %v2764_v10 = vperm.slane %v2758_v42, %v6649_v20 }
 0xa19   :  { %v2736_v40 = vperm.slane %v2728_v5, %v6655_v34  ;;  %v2781_v62 = vrot.slane %v2768_v17, 4  ;;  %v2784_v57 = vsel %vm373_vm9, %v2768_v17, %v2783_v50 }
 0xa1a   :  { %v2713_v19 = vrot.slane %v2708_v18, 4  ;;  %v2716_v30 = vsel %vm373_vm9, %v2708_v18, %v2715_v51  ;;  %v2726_v26 = vsel %vm373_vm9, %v2725_v61, %v2700_v16  ;;  %v2769_v8 = vrot.slane %v2764_v10, 4 }
 0xa1b   :  { %v2724_v41 = vperm.slane %v2716_v30, %v6655_v34  ;;  %v2732_v25 = vperm.slane %v2726_v26, %v6655_v34  ;;  %v2743_v32 = vrot.slane %v2736_v40, 4  ;;  %v2772_v33 = vsel %vm373_vm9, %v2764_v10, %v2771_v7 }
 0xa1c   :  { %v2714_v21 = vsel %vm373_vm9, %v2713_v19, %v2696_v35  ;;  %v2770_v6 = vsel %vm373_vm9, %v2769_v8, %v2752_v36  ;;  %v2780_v12 = vperm.slane %v2772_v33, %v6655_v34  ;;  %v2782_v11 = vsel %vm373_vm9, %v2781_v62, %v2756_v23 }
 0xa1d   :  { %v2720_v38 = vperm.slane %v2714_v21, %v6655_v34  ;;  %v2739_v15 = vrot.slane %v2724_v41, 4  ;;  %v2741_v28 = vrot.slane %v2732_v25, 4  ;;  %v2744_v45 = vsel %vm373_vm9, 0.0, %v2743_v32 }
 0xa1e   :  { %v2776_v58 = vperm.slane %v2770_v6, %v6655_v34  ;;  %v2788_v39 = vperm.slane %v2782_v11, %v6655_v34  ;;  %v2792_v60 = vperm.slane %v2784_v57, %v6655_v34  ;;  %v2795_v63 = vrot.slane %v2780_v12, 4 }
 0xa1f   :  { %v2740_v0 = vsel %vm373_vm9, 0.0, %v2739_v15  ;;  %v2812_v29 = vsel %vm373_vm9, %v2743_v32, %v2732_v25  ;;  %v2817_v14 = vrot.slane %v2744_v45, 4  ;;  %v2737_v13 = vrot.slane %v2720_v38, 4 }
 0xa20   :  { %v2796_v16 = vsel %vm373_vm9, 0.0, %v2795_v63  ;;  %v2797_v47 = vrot.slane %v2788_v39, 4  ;;  %v2799_v23 = vrot.slane %v2792_v60, 4  ;;  %v2806_v35 = vrot.slane %v2740_v0, 4 }
 0xa21   :  { %v2860_v3 = vrot.slane %v2796_v16, 4  ;;  %v2738_v49 = vsel %vm373_vm9, 0.0, %v2737_v13  ;;  %v2742_v36 = vsel %vm373_vm9, 0.0, %v2741_v28  ;;  %v2801_v48 = vsel %vm373_vm9, %v2739_v15, %v2720_v38 }
 0xa22   :  { %v2800_v59 = vsel %vm373_vm9, 0.0, %v2799_v23  ;;  %v2866_v24 = vsel %vm373_vm9, %v2799_v23, %v2788_v39  ;;  %v2805_v56 = vperm.slane %v2801_v48, %v6649_v20  ;;  %v2807_v9 = vsel %vm373_vm9, %v2806_v35, %v2738_v49 }
 0xa23   :  { %v2871_v46 = vrot.slane %v2800_v59, 4  ;;  %v2811_v17 = vperm.slane %v2807_v9, %v6649_v20  ;;  %v2816_v50 = vperm.slane %v2812_v29, %v6649_v20  ;;  %v2818_v51 = vsel %vm373_vm9, %v2817_v14, %v2742_v36 }
 0xa24   :  { %v2822_v27 = vperm.slane %v2818_v51, %v6649_v20  ;;  %v2825_v42 = vrot.slane %v2805_v56, 4  ;;  %v2793_v18 = vrot.slane %v2776_v58, 4  ;;  %v2798_v61 = vsel %vm373_vm9, 0.0, %v2797_v47 }
 0xa25   :  { %v2837_v5 = vrot.slane %v2816_v50, 4  ;;  %v2855_v10 = vsel %vm373_vm9, %v2795_v63, %v2776_v58  ;;  %v2870_v7 = vperm.slane %v2866_v24, %v6649_v20  ;;  %v2872_v40 = vsel %vm373_vm9, %v2871_v46, %v2798_v61 }
 0xa26   :  { %v2826_v62 = vsel %vm373_vm9, %v2811_v17, %v2825_v42  ;;  %v2794_v57 = vsel %vm373_vm9, 0.0, %v2793_v18  ;;  %v2859_v19 = vperm.slane %v2855_v10, %v6649_v20  ;;  %v2876_v30 = vperm.slane %v2872_v40, %v6649_v20 }
 0xa27   :  { %v2834_v26 = vperm.slane %v2826_v62, %v6655_v34  ;;  %v2838_v8 = vsel %vm373_vm9, %v2822_v27, %v2837_v5  ;;  %v2861_v41 = vsel %vm373_vm9, %v2860_v3, %v2794_v57  ;;  %v2891_v25 = vrot.slane %v2870_v7, 4 }
 0xa28   :  { %v2846_v32 = vperm.slane %v2838_v8, %v6655_v34  ;;  %v2865_v33 = vperm.slane %v2861_v41, %v6649_v20  ;;  %v2879_v21 = vrot.slane %v2859_v19, 4  ;;  %v2823_v6 = vrot.slane %v2811_v17, 4 }
 0xa29   :  { %v2892_v12 = vsel %vm373_vm9, %v2876_v30, %v2891_v25  ;;  %v2835_v11 = vrot.slane %v2822_v27, 4  ;;  %v2853_v38 = vrot.slane %v2834_v26, 4  ;;  %v2889_v15 = vrot.slane %v2876_v30, 4 }
 0xa2a   :  { %v2851_v28 = vrot.slane %v2846_v32, 4  ;;  %v2880_v45 = vsel %vm373_vm9, %v2865_v33, %v2879_v21  ;;  %v2900_v58 = vperm.slane %v2892_v12, %v6655_v34  ;;  %v2824_v39 = vsel %vm373_vm9, %v2823_v6, %v2805_v56 }
 0xa2b   :  { %v2888_v60 = vperm.slane %v2880_v45, %v6655_v34  ;;  %v2830_v63 = vperm.slane %v2824_v39, %v6655_v34  ;;  %v2836_v0 = vsel %vm373_vm9, %v2835_v11, %v2816_v50  ;;  %v2854_v29 = vsel %vm373_vm9, %v2846_v32, %v2853_v38 }
 0xa2c   :  { %v2852_v14 = vsel %vm373_vm9, %v2851_v28, %v2834_v26  ;;  %v2905_v13 = vrot.slane %v2900_v58, 4  ;;  %v2842_v16 = vperm.slane %v2836_v0, %v6655_v34  ;;  %3300 = vmatpush.msrb.mxu0 %v2854_v29  ;;  %v2877_v47 = vrot.slane %v2865_v33, 4 }
 0xa2d   :  { %3277 = vmatpush.msra.mxu3 %v2852_v14  ;;  %v2890_v23 = vsel %vm373_vm9, %v2889_v15, %v2870_v7  ;;  %v2907_v35 = vrot.slane %v2888_v60, 4  ;;  %v2849_v3 = vrot.slane %v2830_v63, 4 }
 0xa2e   :  { %v2906_v49 = vsel %vm373_vm9, %v2905_v13, %v2888_v60  ;;  %v2847_v36 = vrot.slane %v2842_v16, 4  ;;  %v2878_v48 = vsel %vm373_vm9, %v2877_v47, %v2859_v19  ;;  %v2896_v59 = vperm.slane %v2890_v23, %v6655_v34 }
 0xa2f   :  { %3369 = vmatpush.msrb.mxu3 %v2906_v49  ;;  %v2884_v24 = vperm.slane %v2878_v48, %v6655_v34  ;;  %v2908_v56 = vsel %vm373_vm9, %v2900_v58, %v2907_v35  ;;  %v2850_v9 = vsel %vm373_vm9, %v2842_v16, %v2849_v3 }
 0xa30   :  { %v2848_v46 = vsel %vm373_vm9, %v2847_v36, %v2830_v63  ;;  %v2901_v17 = vrot.slane %v2896_v59, 4  ;;  %3392 = vmatpush.msra.mxu0 %v2908_v56  ;;  %3254 = vmatpush.msrb.mxu2 %v2850_v9 }
 0xa31   :  { %3231 = vmatpush.msra.mxu1 %v2848_v46  ;;  %v2903_v50 = vrot.slane %v2884_v24, 4 }
 0xa32   :  { %v2902_v51 = vsel %vm373_vm9, %v2901_v17, %v2884_v24 }
 0xa33   :  { %3323 = vmatpush.msrb.mxu1 %v2902_v51  ;;  %v2904_v27 = vsel %vm373_vm9, %v2896_v59, %v2903_v50 }
 0xa34   :  { %3346 = vmatpush.msra.mxu2 %v2904_v27 }
 0xa5e   :  { %v3184_v42 = vpop.xlane.xlu2 %3183 }
 0xa5f   :  { %6140 = vrcp.f32 %v3184_v42 }
 0xa65   :  { %v6141_v18 = vpop.eup %6140 }
 0xa66   :  { %v3208_v61 = vmul.f32 %v6141_v18, %v7513_v22  ;;  %v3175_v5 = vpop.xlane.xlu1 %3174 }
 0xa67   :  { %6142 = vrcp.f32 %v3175_v5  ;;  %v3181_v10 = vpop.xlane.xlu0 %3180 }
 0xa68   :  { %6144 = vrcp.f32 %v3181_v10  ;;  %5927 = vmatmul.msk.f32.vlgmr.msrb.gmra.mxu0 %vm1291_vm11, %v3208_v61 }
 0xa6d   :  { %v6143_v7 = vpop.eup %6142 }
 0xa6e   :  { %v6145_v40 = vpop.eup %6144  ;;  %v3205_v62 = vmul.f32 %v6143_v7, %v7517_v54  ;;  %v3196_v57 = vpop.xlane.xlu1 %3195 }
 0xa6f   :  { %v3207_v19 = vmul.f32 %v6145_v40, %v7519_v55  ;;  %6146 = vrcp.f32 %v3196_v57 }
 0xa70   :  { %5924 = vmatmul.msk.f32.vlgmr.msra.gmra.mxu1 %vm1291_vm11, %v3205_v62 }
 0xa71   :  { %5926 = vmatmul.msk.f32.vlgmr.msra.gmra.mxu3 %vm1291_vm11, %v3207_v19 }
 0xa72   :  { %v3193_v30 = vpop.xlane.xlu0 %3192 }
 0xa73   :  { %6148 = vrcp.f32 %v3193_v30 }
 0xa75   :  { %v6147_v22 = vpop.eup %6146 }
 0xa76   :  { %v3212_v26 = vmul.f32 %v6147_v22, %v7525_v52 }
 0xa78   :  { %5931 = vmatmul.msk.f32.vlgmr.msra.gmra.mxu0 %vm1291_vm11, %v3212_v26 }
 0xa79   :  { %v6149_v8 = vpop.eup %6148 }
 0xa7a   :  { %v3211_v41 = vmul.f32 %v6149_v8, %v7529_v53  ;;  %v3187_v25 = vpop.xlane.xlu0 %3186  ;;  %v3178_v54 = vpop.xlane.xlu2 %3177 }
 0xa7b   :  { %6150 = vrcp.f32 %v3187_v25 }
 0xa7c   :  { %6152 = vrcp.f32 %v3178_v54  ;;  %5930 = vmatmul.msk.f32.vlgmr.msrb.gmra.mxu3 %vm1291_vm11, %v3211_v41 }
 0xa81   :  { %v6151_v55 = vpop.eup %6150 }
 0xa82   :  { %v6153_v32 = vpop.eup %6152  ;;  %v3209_v33 = vmul.f32 %v6151_v55, %v7533_v4  ;;  %v3190_v21 = vpop.xlane.xlu2 %3189 }
 0xa83   :  { %v3206_v6 = vmul.f32 %v6153_v32, %v7535_v2  ;;  %6154 = vrcp.f32 %v3190_v21 }
 0xa84   :  { %5928 = vmatmul.msk.f32.vlgmr.msrb.gmra.mxu1 %vm1291_vm11, %v3209_v33 }
 0xa85   :  { %5925 = vmatmul.msk.f32.vlgmr.msrb.gmra.mxu2 %vm1291_vm11, %v3206_v6 }
 0xa89   :  { %v6155_v52 = vpop.eup %6154 }
 0xa8a   :  { %v3210_v53 = vmul.f32 %v6155_v52, %v7541_v37 }
 0xa8d   :  { %5929 = vmatmul.msk.f32.vlgmr.msra.gmra.mxu2 %vm1291_vm11, %v3210_v53 }
 0xae5   :  { %v3302_v58 = vpop.f32.mrf.mxu0 }
 0xae6   :  { %v3409_v0 = vrot.slane %v3302_v58, 4 }
 0xaed   :  { %v3233_v11 = vpop.f32.mrf.mxu1 }
 0xaee   :  { %v3399_v28 = vrot.slane %v3233_v11, 4 }
 0xaf4   :  { %v3279_v12 = vpop.f32.mrf.mxu3 }
 0xaf5   :  { %v3397_v38 = vrot.slane %v3279_v12, 4  ;;  %v3400_v2 = vsel %vm373_vm9, %v3279_v12, %v3399_v28  ;;  %v3394_v9 = vpop.f32.mrf.mxu0 }
 0xaf6   :  { %v3408_v37 = vperm.slane %v3400_v2, %v6649_v20  ;;  %v3465_v61 = vrot.slane %v3394_v9, 4 }
 0xaf7   :  { %v3398_v4 = vsel %vm373_vm9, %v3397_v38, %v3233_v11 }
 0xaf8   :  { %v3404_v63 = vperm.slane %v3398_v4, %v6649_v20  ;;  %v3435_v3 = vrot.slane %v3408_v37, 4 }
 0xafa   :  { %v3423_v23 = vrot.slane %v3404_v63, 4 }
 0xaff   :  { %v3371_v15 = vpop.f32.mrf.mxu3 }
 0xb00   :  { %v3453_v39 = vrot.slane %v3371_v15, 4 }
 0xb01   :  { %v3325_v45 = vpop.f32.mrf.mxu1 }
 0xb02   :  { %v3455_v60 = vrot.slane %v3325_v45, 4  ;;  %v3454_v29 = vsel %vm373_vm9, %v3453_v39, %v3325_v45 }
 0xb03   :  { %v3460_v49 = vperm.slane %v3454_v29, %v6649_v20 }
 0xb04   :  { %v3456_v13 = vsel %vm373_vm9, %v3371_v15, %v3455_v60 }
 0xb05   :  { %v3464_v48 = vperm.slane %v3456_v13, %v6649_v20  ;;  %v3479_v5 = vrot.slane %v3460_v49, 4 }
 0xb07   :  { %v3491_v10 = vrot.slane %v3464_v48, 4 }
 0xb08   :  { %v3256_v14 = vpop.f32.mrf.mxu2 }
 0xb09   :  { %v3410_v16 = vsel %vm373_vm9, %v3409_v0, %v3256_v14  ;;  %v3411_v47 = vrot.slane %v3256_v14, 4 }
 0xb0a   :  { %v3416_v35 = vperm.slane %v3410_v16, %v6649_v20 }
 0xb0b   :  { %v3412_v36 = vsel %vm373_vm9, %v3302_v58, %v3411_v47 }
 0xb0c   :  { %v3420_v59 = vperm.slane %v3412_v36, %v6649_v20  ;;  %v3421_v24 = vrot.slane %v3416_v35, 4  ;;  %v3424_v56 = vsel %vm373_vm9, %v3416_v35, %v3423_v23 }
 0xb0d   :  { %v3432_v46 = vperm.slane %v3424_v56, %v6655_v34 }
 0xb0e   :  { %v3422_v17 = vsel %vm373_vm9, %v3421_v24, %v3404_v63  ;;  %v3433_v50 = vrot.slane %v3420_v59, 4  ;;  %v3436_v51 = vsel %vm373_vm9, %v3420_v59, %v3435_v3 }
 0xb0f   :  { %v3428_v27 = vperm.slane %v3422_v17, %v6655_v34  ;;  %v3444_v42 = vperm.slane %v3436_v51, %v6655_v34  ;;  %v3447_v18 = vrot.slane %v3432_v46, 4 }
 0xb10   :  { %v3434_v7 = vsel %vm373_vm9, %v3433_v50, %v3408_v37  ;;  %v3348_v40 = vpop.f32.mrf.mxu2 }
 0xb11   :  { %v3440_v62 = vperm.slane %v3434_v7, %v6655_v34  ;;  %v3445_v57 = vrot.slane %v3428_v27, 4  ;;  %v3448_v19 = vsel %vm373_vm9, 0.0, %v3447_v18  ;;  %v3451_v30 = vrot.slane %v3444_v42, 4 }
 0xb12   :  { %v3509_v22 = vsel %vm373_vm9, %v3447_v18, %v3428_v27  ;;  %v3514_v26 = vrot.slane %v3448_v19, 4  ;;  %v3466_v8 = vsel %vm373_vm9, %v3465_v61, %v3348_v40  ;;  %v3467_v41 = vrot.slane %v3348_v40, 4 }
 0xb13   :  { %v3446_v25 = vsel %vm373_vm9, 0.0, %v3445_v57  ;;  %v3449_v54 = vrot.slane %v3440_v62, 4  ;;  %v3452_v55 = vsel %vm373_vm9, 0.0, %v3451_v30  ;;  %v3513_v32 = vperm.slane %v3509_v22, %v6649_v20 }
 0xb14   :  { %v3525_v33 = vrot.slane %v3452_v55, 4  ;;  %v3468_v21 = vsel %vm373_vm9, %v3394_v9, %v3467_v41  ;;  %v3472_v6 = vperm.slane %v3466_v8, %v6649_v20  ;;  %v3515_v52 = vsel %vm373_vm9, %v3514_v26, %v3446_v25 }
 0xb15   :  { %v3476_v53 = vperm.slane %v3468_v21, %v6649_v20  ;;  %v3450_v12 = vsel %vm373_vm9, 0.0, %v3449_v54  ;;  %v3519_v11 = vperm.slane %v3515_v52, %v6649_v20  ;;  %v3520_v38 = vsel %vm373_vm9, %v3451_v30, %v3440_v62 }
 0xb16   :  { %v3477_v15 = vrot.slane %v3472_v6, 4  ;;  %v3480_v28 = vsel %vm373_vm9, %v3472_v6, %v3479_v5  ;;  %v3524_v45 = vperm.slane %v3520_v38, %v6649_v20  ;;  %v3526_v4 = vsel %vm373_vm9, %v3525_v33, %v3450_v12 }
 0xb17   :  { %v3488_v58 = vperm.slane %v3480_v28, %v6655_v34  ;;  %v3489_v2 = vrot.slane %v3476_v53, 4  ;;  %v3492_v39 = vsel %vm373_vm9, %v3476_v53, %v3491_v10  ;;  %v3530_v60 = vperm.slane %v3526_v4, %v6649_v20 }
 0xb18   :  { %v3478_v63 = vsel %vm373_vm9, %v3477_v15, %v3460_v49  ;;  %v3500_v0 = vperm.slane %v3492_v39, %v6655_v34  ;;  %v3533_v37 = vrot.slane %v3513_v32, 4  ;;  %v3545_v29 = vrot.slane %v3524_v45, 4 }
 0xb19   :  { %v3484_v14 = vperm.slane %v3478_v63, %v6655_v34  ;;  %v3490_v13 = vsel %vm373_vm9, %v3489_v2, %v3464_v48  ;;  %v3503_v16 = vrot.slane %v3488_v58, 4  ;;  %v3531_v47 = vrot.slane %v3519_v11, 4 }
 0xb1a   :  { %v3496_v23 = vperm.slane %v3490_v13, %v6655_v34  ;;  %v3507_v35 = vrot.slane %v3500_v0, 4  ;;  %v3534_v3 = vsel %vm373_vm9, %v3519_v11, %v3533_v37  ;;  %v3546_v36 = vsel %vm373_vm9, %v3530_v60, %v3545_v29  ;;  %v3655_v13 = vld [vmem:[#allocation8 + $0x78] sm:$0xff] }
 0xb1b   :  { %v3501_v59 = vrot.slane %v3484_v14, 4  ;;  %v3504_v49 = vsel %vm373_vm9, 0.0, %v3503_v16  ;;  %v3563_v24 = vsel %vm373_vm9, %v3503_v16, %v3484_v14  ;;  %v3542_v56 = vperm.slane %v3534_v3, %v6655_v34  ;;  %v3654_v16 = vld [vmem:[#allocation8 + $0x70] sm:$0xff]  ;;  %3670 = vmatpush.msra.mxu1 %v3655_v13 }
 0xb1c   :  { %v3505_v9 = vrot.slane %v3496_v23, 4  ;;  %v3508_v46 = vsel %vm373_vm9, 0.0, %v3507_v35  ;;  %v3567_v48 = vperm.slane %v3563_v24, %v6649_v20  ;;  %v3568_v17 = vrot.slane %v3504_v49, 4  ;;  %v3650_v3 = vld [vmem:[#allocation8 + $0x50] sm:$0xff] }
 0xb1d   :  { %v3502_v50 = vsel %vm373_vm9, 0.0, %v3501_v59  ;;  %v3579_v51 = vrot.slane %v3508_v46, 4  ;;  %v3554_v27 = vperm.slane %v3546_v36, %v6655_v34  ;;  %v3561_v42 = vrot.slane %v3542_v56, 4  ;;  %3671 = vmatpush.msra.mxu1 %v3654_v16  ;;  %v3649_v36 = vld [vmem:[#allocation8 + $0x48] sm:$0xff]  ;;  %v3648_v59 = vld [vmem:[#allocation8 + $0x40] sm:$0xff] }
 0xb1e   :  { %v3532_v18 = vsel %vm373_vm9, %v3531_v47, %v3513_v32  ;;  %v3543_v61 = vrot.slane %v3530_v60, 4  ;;  %v3506_v5 = vsel %vm373_vm9, 0.0, %v3505_v9  ;;  %v3569_v10 = vsel %vm373_vm9, %v3568_v17, %v3502_v50  ;;  %v3653_v47 = vld [vmem:[#allocation8 + $0x68] sm:$0xff] }
 0xb1f   :  { %v3562_v7 = vsel %vm373_vm9, %v3554_v27, %v3561_v42  ;;  %v3559_v40 = vrot.slane %v3554_v27, 4  ;;  %v3538_v62 = vperm.slane %v3532_v18, %v6655_v34  ;;  %v3573_v57 = vperm.slane %v3569_v10, %v6649_v20  ;;  %3672 = vmatpush.msra.mxu1 %v3653_v47 }
 0xb20   :  { %3635 = vrot.lane.b32.xlu1 %v3562_v7, %s6445_s30  ;;  %v3544_v19 = vsel %vm373_vm9, %v3543_v61, %v3524_v45  ;;  %v3574_v30 = vsel %vm373_vm9, %v3507_v35, %v3496_v23  ;;  %v3580_v22 = vsel %vm373_vm9, %v3579_v51, %v3506_v5  ;;  %v3587_v26 = vrot.slane %v3567_v48, 4  ;;  %v3652_v23 = vld [vmem:[#allocation8 + $0x60] sm:$0xff]  ;;  %v3651_v35 = vld [vmem:[#allocation8 + $0x58] sm:$0xff] }
 0xb21   :  { %v3560_v8 = vsel %vm373_vm9, %v3559_v40, %v3542_v56  ;;  %v3550_v41 = vperm.slane %v3544_v19, %v6655_v34  ;;  %v3557_v25 = vrot.slane %v3538_v62, 4  ;;  %v3578_v54 = vperm.slane %v3574_v30, %v6649_v20  ;;  %3673 = vmatpush.msra.mxu1 %v3652_v23  ;;  %v3736_v30 = vld [vmem:[#allocation10 + $0x78] sm:$0xff] }
 0xb22   :  { %3627 = vrot.lane.b32.xlu0 %v3560_v8, %s6446_s16  ;;  %v3584_v55 = vperm.slane %v3580_v22, %v6649_v20  ;;  %v3588_v32 = vsel %vm373_vm9, %v3573_v57, %v3587_v26  ;;  %v3585_v33 = vrot.slane %v3573_v57, 4  ;;  %v3774_v22 = vld [vmem:[#allocation13 + $0x78] sm:$0xff]  ;;  %3751 = vmatpush.msrb.mxu2 %v3736_v30  ;;  %v3773_v26 = vld [vmem:[#allocation13 + $0x70] sm:$0xff]  ;;  %v3734_v8 = vld [vmem:[#allocation10 + $0x68] sm:$0xff] }
 0xb23   :  { %v3555_v21 = vrot.slane %v3550_v41, 4  ;;  %v3558_v6 = vsel %vm373_vm9, %v3550_v41, %v3557_v25  ;;  %v3596_v52 = vperm.slane %v3588_v32, %v6655_v34  ;;  %v3599_v53 = vrot.slane %v3578_v54, 4  ;;  %3674 = vmatpush.msra.mxu1 %v3651_v35  ;;  %3783 = vmatpush.msra.mxu3 %v3774_v22  ;;  %v3772_v41 = vld [vmem:[#allocation13 + $0x68] sm:$0xff]  ;;  %v3771_v25 = vld [vmem:[#allocation13 + $0x60] sm:$0xff]  ;;  %v3731_v32 = vld [vmem:[#allocation10 + $0x50] sm:$0xff] }
 0xb24   :  { %3619 = vrot.lane.b32.xlu2 %v3558_v6, %s6447_s7  ;;  %v3586_v12 = vsel %vm373_vm9, %v3585_v33, %v3567_v48  ;;  %v3597_v11 = vrot.slane %v3584_v55, 4  ;;  %v3769_v33 = vld [vmem:[#allocation13 + $0x50] sm:$0xff]  ;;  %v3768_v6 = vld [vmem:[#allocation13 + $0x48] sm:$0xff] }
 0xb25   :  { %v3600_v38 = vsel %vm373_vm9, %v3584_v55, %v3599_v53  ;;  %v3615_v15 = vrot.slane %v3596_v52, 4  ;;  %v3592_v28 = vperm.slane %v3586_v12, %v6655_v34  ;;  %v3556_v45 = vsel %vm373_vm9, %v3555_v21, %v3538_v62  ;;  %3675 = vmatpush.msra.mxu1 %v3650_v3  ;;  %3784 = vmatpush.msra.mxu3 %v3773_v26  ;;  %v3770_v55 = vld [vmem:[#allocation13 + $0x58] sm:$0xff]  ;;  %v3730_v21 = vld [vmem:[#allocation10 + $0x48] sm:$0xff]  ;;  %v3767_v53 = vld [vmem:[#allocation13 + $0x40] sm:$0xff] }
 0xb26   :  { %v3608_v4 = vperm.slane %v3600_v38, %v6655_v34  ;;  %v3598_v58 = vsel %vm373_vm9, %v3597_v11, %v3578_v54  ;;  %v3732_v54 = vld [vmem:[#allocation10 + $0x58] sm:$0xff] }
 0xb27   :  { %v3604_v2 = vperm.slane %v3598_v58, %v6655_v34  ;;  %v3611_v39 = vrot.slane %v3592_v28, 4  ;;  %3676 = vmatpush.msra.mxu1 %v3649_v36  ;;  %3785 = vmatpush.msra.mxu3 %v3772_v41 }
 0xb28   :  { %v3616_v60 = vsel %vm373_vm9, %v3608_v4, %v3615_v15  ;;  %v3613_v63 = vrot.slane %v3608_v4, 4 }
 0xb29   :  { %3637 = vrot.lane.b32.xlu1 %v3616_v60, %s6445_s30  ;;  %v3609_v0 = vrot.slane %v3604_v2, 4  ;;  %v3612_v37 = vsel %vm373_vm9, %v3604_v2, %v3611_v39  ;;  %3677 = vmatpush.msra.mxu1 %v3648_v59 }
 0xb2a   :  { %v3614_v29 = vsel %vm373_vm9, %v3613_v63, %v3596_v52  ;;  %3621 = vrot.lane.b32.xlu0 %v3612_v37, %s6447_s7  ;;  %3786 = vmatpush.msra.mxu3 %v3771_v25  ;;  %v3729_v52 = vld [vmem:[#allocation10 + $0x40] sm:$0xff] }
 0xb2b   :  { %v3610_v14 = vsel %vm373_vm9, %v3609_v0, %v3592_v28  ;;  %v6065_v37 = vld [vmem:[%s8412_s4 + $0x1] ss:$0 sm:$0xff] }
 0xb2c   :  { %3629 = vrot.lane.b32.xlu2 %v3614_v29, %s6446_s16  ;;  %3787 = vmatpush.msra.mxu3 %v3770_v55 }
 0xb2e   :  { %3788 = vmatpush.msra.mxu3 %v3769_v33 }
 0xb30   :  { %3789 = vmatpush.msra.mxu3 %v3768_v6 }
 0xb32   :  { %3790 = vmatpush.msra.mxu3 %v3767_v53 }
 0xb7e   :  { %v3620_v49 = vpop.permute.xlu2 %3619 }
 0xb7f   :  { %v3641_v24 = vsel %vm168_vm0, %v3556_v45, %v3620_v49 }
 0xb86   :  { %v3630_v50 = vpop.permute.xlu2 %3629 }
 0xb92   :  { %v3636_v56 = vpop.permute.xlu1 %3635 }
 0xb94   :  { %v3628_v9 = vpop.permute.xlu0 %3627 }
 0xb95   :  { %v3643_v46 = vsel %vm1810_vm12, %v3641_v24, %v3628_v9  ;;  %v3848_v24 = vld [vmem:[#allocation11 + $0x78] sm:$0xff]  ;;  %v3846_v9 = vld [vmem:[#allocation11 + $0x68] sm:$0xff] }
 0xb96   :  { %v3645_v48 = vsel %vm1813_vm13, %v3643_v46, %v3636_v56  ;;  %3863 = vmatpush.msrb.mxu0 %v3848_v24  ;;  %v3847_v56 = vld [vmem:[#allocation11 + $0x70] sm:$0xff]  ;;  %v3845_v46 = vld [vmem:[#allocation11 + $0x60] sm:$0xff] }
 0xb97   :  { %5932 = vmatmul.msk.f32.vlgmr.msra.gmra.mxu1 %vm206_vm1, %v3645_v48  ;;  %v3966_v24 = vld [vmem:[#allocation5 + $0xa0] sm:$0xff] }
 0xb98   :  { %3864 = vmatpush.msrb.mxu0 %v3847_v56  ;;  %v3998_v56 = vld [vmem:[#allocation7 + $0xa0] sm:$0xff] }
 0xb9a   :  { %3865 = vmatpush.msrb.mxu0 %v3846_v9  ;;  %v3925_v9 = vld [vmem:[#allocation2 + $0x98] sm:$0xff] }
 0xb9b   :  { %v3638_v27 = vpop.permute.xlu1 %3637 }
 0xb9c   :  { %v3622_v17 = vpop.permute.xlu0 %3621  ;;  %3866 = vmatpush.msrb.mxu0 %v3845_v46  ;;  %v3965_v46 = vld [vmem:[#allocation5 + $0x98] sm:$0xff] }
 0xb9d   :  { %v3642_v51 = vsel %vm168_vm0, %v3610_v14, %v3622_v17 }
 0xb9e   :  { %v3644_v42 = vsel %vm1810_vm12, %v3642_v51, %v3630_v50  ;;  %v3844_v50 = vld [vmem:[#allocation11 + $0x58] sm:$0xff]  ;;  %v3843_v51 = vld [vmem:[#allocation11 + $0x50] sm:$0xff] }
 0xb9f   :  { %v3646_v18 = vsel %vm1813_vm13, %v3644_v42, %v3638_v27  ;;  %3867 = vmatpush.msrb.mxu0 %v3844_v50  ;;  %v3842_v27 = vld [vmem:[#allocation11 + $0x48] sm:$0xff]  ;;  %v3841_v42 = vld [vmem:[#allocation11 + $0x40] sm:$0xff]  ;;  %v3964_v50 = vld [vmem:[#allocation5 + $0x90] sm:$0xff] }
 0xba0   :  { %5933 = vmatmul.msk.f32.gmra.mxu1 %vm206_vm1, %v3646_v18 }
 0xba1   :  { %3868 = vmatpush.msrb.mxu0 %v3843_v51  ;;  %v3996_v51 = vld [vmem:[#allocation7 + $0x90] sm:$0xff] }
 0xba3   :  { %3869 = vmatpush.msrb.mxu0 %v3842_v27  ;;  %v3923_v27 = vld [vmem:[#allocation2 + $0x88] sm:$0xff] }
 0xba5   :  { %3870 = vmatpush.msrb.mxu0 %v3841_v42  ;;  %v3963_v42 = vld [vmem:[#allocation5 + $0x88] sm:$0xff] }
 0xc14   :  { %v3679_v61 = vpop.f32.mrf.mxu1 }
 0xc15   :  { %v7740_v5 = vadd.f32 %v3679_v61, %v7183_v31  ;;  %v3735_v31 = vld [vmem:[#allocation10 + $0x70] sm:$0xff] }
 0xc16   :  { %3752 = vmatpush.msrb.mxu2 %v3735_v31 }
 0xc17   :  { %v3689_v10 = vmul.f32 %v7740_v5, %v7740_v5 }
 0xc18   :  { %3753 = vmatpush.msrb.mxu2 %v3734_v8 }
 0xc19   :  { %v3691_v7 = vsel %vm206_vm1, %v3689_v10, 0.0 }
 0xc1a   :  { %3692 = vadd.xlane.f32.xlu0 %v3691_v7 }
 0xc1d   :  { %v3682_v40 = vpop.f32.mrf.mxu1 }
 0xc1e   :  { %v7746_v62 = vadd.f32 %v3682_v40, %v7189_v44  ;;  %v3733_v44 = vld [vmem:[#allocation10 + $0x60] sm:$0xff] }
 0xc1f   :  { %3754 = vmatpush.msrb.mxu2 %v3733_v44 }
 0xc20   :  { %v3690_v57 = vmul.f32 %v7746_v62, %v7746_v62 }
 0xc21   :  { %3755 = vmatpush.msrb.mxu2 %v3732_v54 }
 0xc22   :  { %v3694_v19 = vsel %vm206_vm1, %v3690_v57, 0.0 }
 0xc23   :  { %3695 = vadd.xlane.f32.xlu2 %v3694_v19  ;;  %3756 = vmatpush.msrb.mxu2 %v3731_v32 }
 0xc25   :  { %3757 = vmatpush.msrb.mxu2 %v3730_v21 }
 0xc27   :  { %3758 = vmatpush.msrb.mxu2 %v3729_v52 }
 0xc8d   :  { %v3693_v12 = vpop.xlane.xlu0 %3692 }
 0xc8e   :  { %v3697_v11 = vmul.f32 %v3693_v12, %v6605_v43 }
 0xc90   :  { %v3699_v38 = vadd.f32 1e-06, %v3697_v11 }
 0xc92   :  { %6156 = vrsqrt.f32 %v3699_v38  ;;  %vm3707_vm3 = vweird.f32 %v3699_v38 }
 0xc96   :  { %v3696_v15 = vpop.xlane.xlu2 %3695 }
 0xc97   :  { %v3698_v28 = vmul.f32 %v3696_v15, %v6605_v43 }
 0xc98   :  { %v6157_v45 = vpop.eup %6156 }
 0xc99   :  { %v3702_v4 = vmul.f32 %v6157_v45, %v3699_v38  ;;  %v3700_v58 = vadd.f32 1e-06, %v3698_v28  ;;  %vm3708_vm2 = vweird.f32 %v6157_v45 }
 0xc9a   :  { %vm3709_vm4 = vmor %vm3707_vm3, %vm3708_vm2 }
 0xc9b   :  { %v3703_v2 = vmul.f32 %v6157_v45, %v3702_v4  ;;  %6158 = vrsqrt.f32 %v3700_v58  ;;  %vm3717_vm6 = vweird.f32 %v3700_v58 }
 0xc9d   :  { %v3704_v39 = vmul.f32 0.5, %v3703_v2 }
 0xc9f   :  { %v3705_v60 = vsub.f32 1.5, %v3704_v39 }
 0xca1   :  { %v6159_v63 = vpop.eup %6158  ;;  %v3706_v0 = vmul.f32 %v6157_v45, %v3705_v60 }
 0xca2   :  { %v3712_v29 = vmul.f32 %v6159_v63, %v3700_v58  ;;  %vm3718_vm5 = vweird.f32 %v6159_v63 }
 0xca3   :  { %v3710_v14 = vsel %vm3709_vm4, %v6157_v45, %v3706_v0  ;;  %vm3719_vm7 = vmor %vm3717_vm6, %vm3718_vm5 }
 0xca4   :  { %v3721_v13 = vmul.f32 %v3710_v14, %v7740_v5  ;;  %v3713_v16 = vmul.f32 %v6159_v63, %v3712_v29 }
 0xca6   :  { %v3726_v47 = vmul.f32 %v6065_v37, %v3721_v13  ;;  %v3714_v23 = vmul.f32 0.5, %v3713_v16  ;;  %v3929_v16 = vld [vmem:[#allocation2 + $0xb8] sm:$0xff] }
 0xca7   :  { %3944 = vmatpush.msrb.mxu1 %v3929_v16 }
 0xca8   :  { %v3715_v35 = vsub.f32 1.5, %v3714_v23  ;;  %5935 = vmatmul.msk.f32.vlgmr.msrb.gmra.mxu2 %vm206_vm1, %v3726_v47  ;;  %5937 = vmatmul.msk.f32.vlgmr.msra.gmra.mxu3 %vm206_vm1, %v3726_v47  ;;  %v3969_v47 = vld [vmem:[#allocation5 + $0xb8] sm:$0xff]  ;;  %v3928_v23 = vld [vmem:[#allocation2 + $0xb0] sm:$0xff] }
 0xca9   :  { %3978 = vmatpush.msra.mxu2 %v3969_v47  ;;  %3945 = vmatpush.msrb.mxu1 %v3928_v23 }
 0xcaa   :  { %v3716_v3 = vmul.f32 %v6159_v63, %v3715_v35  ;;  %v3968_v35 = vld [vmem:[#allocation5 + $0xb0] sm:$0xff] }
 0xcab   :  { %3979 = vmatpush.msra.mxu2 %v3968_v35 }
 0xcac   :  { %v3720_v36 = vsel %vm3719_vm7, %v6159_v63, %v3716_v3  ;;  %v4000_v3 = vld [vmem:[#allocation7 + $0xb0] sm:$0xff] }
 0xcad   :  { %v3722_v59 = vmul.f32 %v3720_v36, %v7746_v62  ;;  %v3967_v36 = vld [vmem:[#allocation5 + $0xa8] sm:$0xff] }
 0xcae   :  { %3980 = vmatpush.msra.mxu2 %v3967_v36 }
 0xcaf   :  { %v3727_v49 = vmul.f32 %v6065_v37, %v3722_v59  ;;  %v3999_v59 = vld [vmem:[#allocation7 + $0xa8] sm:$0xff] }
 0xcb0   :  { %3981 = vmatpush.msra.mxu2 %v3966_v24 }
 0xcb1   :  { %5936 = vmatmul.msk.f32.gmra.mxu2 %vm206_vm1, %v3727_v49  ;;  %5938 = vmatmul.msk.f32.gmra.mxu3 %vm206_vm1, %v3727_v49  ;;  %v3926_v49 = vld [vmem:[#allocation2 + $0xa0] sm:$0xff] }
 0xcb2   :  { %3982 = vmatpush.msra.mxu2 %v3965_v46 }
 0xcb4   :  { %3983 = vmatpush.msra.mxu2 %v3964_v50 }
 0xcb6   :  { %3984 = vmatpush.msra.mxu2 %v3963_v42 }
 0xd2b   :  { %v3760_v48 = vpop.f32.mrf.mxu2  ;;  %v3792_v21 = vpop.f32.mrf.mxu3 }
 0xd2c   :  { %v5939_v17 = vmul.f32 -1.442695, %v3760_v48 }
 0xd2e   :  { %6160 = vpow2.f32 %v5939_v17  ;;  %v3924_v17 = vld [vmem:[#allocation2 + $0x90] sm:$0xff] }
 0xd34   :  { %v6161_v18 = vpop.eup %6160  ;;  %v3763_v61 = vpop.f32.mrf.mxu2 }
 0xd35   :  { %v3804_v10 = vadd.f32 1.0, %v6161_v18  ;;  %v5940_v7 = vmul.f32 -1.442695, %v3763_v61  ;;  %v3795_v58 = vpop.f32.mrf.mxu3  ;;  %v3995_v18 = vld [vmem:[#allocation7 + $0x88] sm:$0xff] }
 0xd37   :  { %6162 = vrcp.f32 %v3804_v10  ;;  %v3817_v31 = vand.u32 2147483648, %v3804_v10  ;;  %v3815_v8 = vand.u32 2147483647, %v3804_v10  ;;  %vm3811_vm14 = vweird.f32 %v3804_v10 }
 0xd38   :  { %6164 = vpow2.f32 %v5940_v7 }
 0xd39   :  { %v3818_v44 = vor.u32 1.1754944e-38, %v3817_v31  ;;  %vm3816_vm2 = vcmp.eq.f32.partialorder %v3815_v8, 8.507059e+37 }
 0xd3d   :  { %v6163_v40 = vpop.eup %6162 }
 0xd3e   :  { %v6165_v57 = vpop.eup %6164  ;;  %v3807_v19 = vmul.f32 %v6163_v40, %v3804_v10  ;;  %vm3812_vm8 = vweird.f32 %v6163_v40  ;;  %v3962_v10 = vld [vmem:[#allocation5 + $0x80] sm:$0xff] }
 0xd3f   :  { %v3805_v30 = vadd.f32 1.0, %v6165_v57  ;;  %vm3813_vm15 = vmor %vm3811_vm14, %vm3812_vm8  ;;  %3985 = vmatpush.msra.mxu2 %v3962_v10 }
 0xd40   :  { %v3808_v22 = vsub.f32 1.0, %v3807_v19 }
 0xd41   :  { %6166 = vrcp.f32 %v3805_v30  ;;  %v3832_v53 = vand.u32 2147483648, %v3805_v30  ;;  %v3830_v11 = vand.u32 2147483647, %v3805_v30  ;;  %vm3826_vm4 = vweird.f32 %v3805_v30 }
 0xd42   :  { %v3809_v26 = vmul.f32 %v6163_v40, %v3808_v22 }
 0xd43   :  { %v3833_v15 = vor.u32 1.1754944e-38, %v3832_v53  ;;  %vm3831_vm6 = vcmp.eq.f32.partialorder %v3830_v11, 8.507059e+37 }
 0xd44   :  { %v3810_v41 = vadd.f32 %v6163_v40, %v3809_v26 }
 0xd46   :  { %v3814_v25 = vsel %vm3813_vm15, %v6163_v40, %v3810_v41  ;;  %v3994_v40 = vld [vmem:[#allocation7 + $0x80] sm:$0xff] }
 0xd47   :  { %v6167_v54 = vpop.eup %6166  ;;  %v3819_v55 = vsel %vm3816_vm2, %v3818_v44, %v3814_v25 }
 0xd48   :  { %v3836_v32 = vmul.f32 %v3819_v55, %v3760_v48  ;;  %v3822_v33 = vmul.f32 %v6167_v54, %v3805_v30  ;;  %vm3827_vm3 = vweird.f32 %v6167_v54  ;;  %v3997_v48 = vld [vmem:[#allocation7 + $0x98] sm:$0xff] }
 0xd49   :  { %vm3828_vm5 = vmor %vm3826_vm4, %vm3827_vm3 }
 0xd4a   :  { %v3838_v6 = vmul.f32 %v3836_v32, %v3792_v21  ;;  %v3823_v52 = vsub.f32 1.0, %v3822_v33  ;;  %v6066_v32 = vld [vmem:[%s8411_s3 + $0x2] ss:$0 sm:$0xff] }
 0xd4c   :  { %v3824_v12 = vmul.f32 %v6167_v54, %v3823_v52  ;;  %5941 = vmatmul.msk.f32.vlgmr.msrb.gmra.mxu0 %vm206_vm1, %v3838_v6 }
 0xd4e   :  { %v3825_v38 = vadd.f32 %v6167_v54, %v3824_v12 }
 0xd50   :  { %v3829_v28 = vsel %vm3828_vm5, %v6167_v54, %v3825_v38 }
 0xd51   :  { %v3834_v45 = vsel %vm3831_vm6, %v3833_v15, %v3829_v28 }
 0xd52   :  { %v3837_v4 = vmul.f32 %v3834_v45, %v3763_v61  ;;  %v3922_v61 = vld [vmem:[#allocation2 + $0x80] sm:$0xff] }
 0xd54   :  { %v3839_v2 = vmul.f32 %v3837_v4, %v3795_v58 }
 0xd56   :  { %5942 = vmatmul.msk.f32.gmra.mxu0 %vm206_vm1, %v3839_v2 }
 0xdc9   :  { %v3872_v39 = vpop.f32.mrf.mxu0 }
 0xdca   :  { %v7765_v60 = vadd.f32 %v3872_v39, %v7740_v5  ;;  %v4001_v5 = vld [vmem:[#allocation7 + $0xb8] sm:$0xff] }
 0xdcb   :  { %4010 = vmatpush.msrb.mxu3 %v4001_v5 }
 0xdcc   :  { %v3882_v63 = vmul.f32 %v7765_v60, %v7765_v60 }
 0xdcd   :  { %4011 = vmatpush.msrb.mxu3 %v4000_v3 }
 0xdce   :  { %v3884_v0 = vsel %vm206_vm1, %v3882_v63, 0.0 }
 0xdcf   :  { %3885 = vadd.xlane.f32.xlu1 %v3884_v0  ;;  %4012 = vmatpush.msrb.mxu3 %v3999_v59 }
 0xdd1   :  { %4013 = vmatpush.msrb.mxu3 %v3998_v56 }
 0xdd3   :  { %v3875_v37 = vpop.f32.mrf.mxu0  ;;  %4014 = vmatpush.msrb.mxu3 %v3997_v48 }
 0xdd4   :  { %v7771_v29 = vadd.f32 %v3875_v37, %v7746_v62  ;;  %v3927_v62 = vld [vmem:[#allocation2 + $0xa8] sm:$0xff] }
 0xdd5   :  { %3946 = vmatpush.msrb.mxu1 %v3927_v62  ;;  %4015 = vmatpush.msrb.mxu3 %v3996_v51 }
 0xdd6   :  { %v3883_v14 = vmul.f32 %v7771_v29, %v7771_v29 }
 0xdd7   :  { %3947 = vmatpush.msrb.mxu1 %v3926_v49  ;;  %4016 = vmatpush.msrb.mxu3 %v3995_v18 }
 0xdd8   :  { %v3887_v13 = vsel %vm206_vm1, %v3883_v14, 0.0 }
 0xdd9   :  { %3888 = vadd.xlane.f32.xlu0 %v3887_v13  ;;  %3948 = vmatpush.msrb.mxu1 %v3925_v9 }
 0xdda   :  { %4017 = vmatpush.msrb.mxu3 %v3994_v40 }
 0xddb   :  { %3949 = vmatpush.msrb.mxu1 %v3924_v17 }
 0xddd   :  { %3950 = vmatpush.msrb.mxu1 %v3923_v27 }
 0xddf   :  { %3951 = vmatpush.msrb.mxu1 %v3922_v61 }
 0xe42   :  { %v3886_v7 = vpop.xlane.xlu1 %3885 }
 0xe43   :  { %v3890_v57 = vmul.f32 %v3886_v7, %v6605_v43 }
 0xe45   :  { %v3892_v19 = vadd.f32 1e-06, %v3890_v57 }
 0xe47   :  { %6168 = vrsqrt.f32 %v3892_v19  ;;  %vm3900_vm8 = vweird.f32 %v3892_v19 }
 0xe4c   :  { %v3889_v30 = vpop.xlane.xlu0 %3888 }
 0xe4d   :  { %v6169_v22 = vpop.eup %6168  ;;  %v3891_v31 = vmul.f32 %v3889_v30, %v6605_v43 }
 0xe4e   :  { %v3895_v26 = vmul.f32 %v6169_v22, %v3892_v19  ;;  %vm3901_vm7 = vweird.f32 %v6169_v22 }
 0xe4f   :  { %v3893_v8 = vadd.f32 1e-06, %v3891_v31  ;;  %vm3902_vm14 = vmor %vm3900_vm8, %vm3901_vm7 }
 0xe50   :  { %v3896_v41 = vmul.f32 %v6169_v22, %v3895_v26 }
 0xe51   :  { %6170 = vrsqrt.f32 %v3893_v8  ;;  %vm3910_vm2 = vweird.f32 %v3893_v8 }
 0xe52   :  { %v3897_v44 = vmul.f32 0.5, %v3896_v41 }
 0xe54   :  { %v3898_v25 = vsub.f32 1.5, %v3897_v44 }
 0xe56   :  { %v3899_v54 = vmul.f32 %v6169_v22, %v3898_v25 }
 0xe57   :  { %v6171_v55 = vpop.eup %6170 }
 0xe58   :  { %v3903_v33 = vsel %vm3902_vm14, %v6169_v22, %v3899_v54  ;;  %v3905_v21 = vmul.f32 %v6171_v55, %v3893_v8  ;;  %vm3911_vm15 = vweird.f32 %v6171_v55 }
 0xe59   :  { %v3914_v6 = vmul.f32 %v3903_v33, %v7765_v60  ;;  %vm3912_vm3 = vmor %vm3910_vm2, %vm3911_vm15 }
 0xe5a   :  { %v3906_v52 = vmul.f32 %v6171_v55, %v3905_v21 }
 0xe5b   :  { %v3919_v53 = vmul.f32 %v6066_v32, %v3914_v6 }
 0xe5c   :  { %v3907_v12 = vmul.f32 0.5, %v3906_v52 }
 0xe5d   :  { %5944 = vmatmul.msk.f32.vlgmr.msrb.gmra.mxu1 %vm206_vm1, %v3919_v53  ;;  %5946 = vmatmul.msk.f32.vlgmr.msra.gmra.mxu2 %vm206_vm1, %v3919_v53 }
 0xe5e   :  { %v3908_v11 = vsub.f32 1.5, %v3907_v12  ;;  %5948 = vmatmul.msk.f32.vlgmr.msrb.gmra.mxu3 %vm206_vm1, %v3919_v53 }
 0xe60   :  { %v3909_v38 = vmul.f32 %v6171_v55, %v3908_v11 }
 0xe62   :  { %v3913_v15 = vsel %vm3912_vm3, %v6171_v55, %v3909_v38 }
 0xe63   :  { %v3915_v28 = vmul.f32 %v3913_v15, %v7771_v29 }
 0xe65   :  { %v3920_v45 = vmul.f32 %v6066_v32, %v3915_v28 }
 0xe67   :  { %5945 = vmatmul.msk.f32.gmra.mxu1 %vm206_vm1, %v3920_v45  ;;  %5947 = vmatmul.msk.f32.gmra.mxu2 %vm206_vm1, %v3920_v45 }
 0xe68   :  { %5949 = vmatmul.msk.f32.gmra.mxu3 %vm206_vm1, %v3920_v45 }
 0xeda   :  { %v3953_v4 = vpop.f32.mrf.mxu1 }
 0xedb   :  { %v3959_v58 = vmul.f32 0.25, %v3953_v4 }
 0xedd   :  { %4027 = vrot.lane.b32.xlu1 %v3959_v58, %s6440_s2  ;;  %4033 = vrot.lane.b32.xlu0 %v3959_v58, %s6442_s29  ;;  %v4047_v35 = vrot.slane %v3959_v58, 4 }
 0xee0   :  { %v3987_v2 = vpop.f32.mrf.mxu2 }
 0xee1   :  { %4273 = vrot.lane.b32.xlu2 %v3987_v2, %s6442_s29  ;;  %v4287_v5 = vrot.slane %v3987_v2, 4 }
 0xee4   :  { %v3956_v63 = vpop.f32.mrf.mxu1 }
 0xee5   :  { %4279 = vrot.lane.b32.xlu1 %v3987_v2, %s6441_s28  ;;  %4039 = vrot.lane.b32.xlu0 %v3959_v58, %s6441_s28  ;;  %v7803_v0 = vmul.f32 0.25, %v3956_v63 }
 0xee7   :  { %v4103_v42 = vrot.slane %v7803_v0, 4 }
 0xee9   :  { %4267 = vrot.lane.b32.xlu2 %v3987_v2, %s6440_s2 }
 0xeea   :  { %v7795_v39 = vpop.f32.mrf.mxu2 }
 0xeeb   :  { %v4343_v27 = vrot.slane %v7795_v39, 4 }
 0xeed   :  { %4281 = vrot.lane.b32.xlu1 %v7795_v39, %s6441_s28  ;;  %4275 = vrot.lane.b32.xlu0 %v7795_v39, %s6442_s29 }
 0xef1   :  { %4269 = vrot.lane.b32.xlu2 %v7795_v39, %s6440_s2 }
 0xef5   :  { %4041 = vrot.lane.b32.xlu1 %v7803_v0, %s6441_s28  ;;  %4035 = vrot.lane.b32.xlu0 %v7803_v0, %s6442_s29 }
 0xef9   :  { %4029 = vrot.lane.b32.xlu2 %v7803_v0, %s6440_s2 }
 0xf3b   :  { %v4274_v37 = vpop.permute.xlu2 %4273 }
 0xf3c   :  { %v4285_v13 = vrot.slane %v4274_v37, 4  ;;  %v4288_v62 = vsel %vm373_vm9, %v4274_v37, %v4287_v5 }
 0xf3d   :  { %v4296_v24 = vperm.slane %v4288_v62, %v6649_v20 }
 0xf3e   :  { %v4286_v3 = vsel %vm373_vm9, %v4285_v13, %v3987_v2 }
 0xf3f   :  { %v4292_v49 = vperm.slane %v4286_v3, %v6649_v20  ;;  %v4323_v57 = vrot.slane %v4296_v24, 4 }
 0xf41   :  { %v4311_v40 = vrot.slane %v4292_v49, 4 }
 0xf43   :  { %v4268_v14 = vpop.permute.xlu2 %4267 }
 0xf44   :  { %v4299_v9 = vrot.slane %v4268_v14, 4 }
 0xf4b   :  { %v7817_v56 = vpop.permute.xlu2 %4269 }
 0xf4c   :  { %v4355_v22 = vrot.slane %v7817_v56, 4 }
 0xf4f   :  { %v4028_v16 = vpop.permute.xlu1 %4027  ;;  %v4034_v47 = vpop.permute.xlu0 %4033 }
 0xf50   :  { %v4045_v23 = vrot.slane %v4034_v47, 4  ;;  %v4048_v36 = vsel %vm373_vm9, %v4034_v47, %v4047_v35  ;;  %v4059_v46 = vrot.slane %v4028_v16, 4 }
 0xf51   :  { %v4056_v48 = vperm.slane %v4048_v36, %v6649_v20 }
 0xf52   :  { %v4046_v59 = vsel %vm373_vm9, %v4045_v23, %v3959_v58 }
 0xf53   :  { %v4052_v17 = vperm.slane %v4046_v59, %v6649_v20  ;;  %v4083_v31 = vrot.slane %v4056_v48, 4  ;;  %v4030_v45 = vpop.permute.xlu2 %4029 }
 0xf54   :  { %v4115_v36 = vrot.slane %v4030_v45, 4 }
 0xf55   :  { %v4071_v55 = vrot.slane %v4052_v17, 4 }
 0xf57   :  { %v4280_v50 = vpop.permute.xlu1 %4279  ;;  %v4040_v51 = vpop.permute.xlu0 %4039 }
 0xf58   :  { %v4297_v18 = vrot.slane %v4280_v50, 4  ;;  %v4300_v61 = vsel %vm373_vm9, %v4280_v50, %v4299_v9  ;;  %v4057_v10 = vrot.slane %v4040_v51, 4  ;;  %v4060_v7 = vsel %vm373_vm9, %v4040_v51, %v4059_v46 }
 0xf59   :  { %v4308_v19 = vperm.slane %v4300_v61, %v6649_v20  ;;  %v4068_v30 = vperm.slane %v4060_v7, %v6649_v20 }
 0xf5a   :  { %v4298_v26 = vsel %vm373_vm9, %v4297_v18, %v4268_v14  ;;  %v4058_v8 = vsel %vm373_vm9, %v4057_v10, %v4028_v16 }
 0xf5b   :  { %v4304_v41 = vperm.slane %v4298_v26, %v6649_v20  ;;  %v4321_v44 = vrot.slane %v4308_v19, 4  ;;  %v4324_v25 = vsel %vm373_vm9, %v4308_v19, %v4323_v57  ;;  %v4064_v54 = vperm.slane %v4058_v8, %v6649_v20 }
 0xf5c   :  { %v4332_v32 = vperm.slane %v4324_v25, %v6655_v34  ;;  %v4081_v33 = vrot.slane %v4068_v30, 4  ;;  %v4084_v21 = vsel %vm373_vm9, %v4068_v30, %v4083_v31 }
 0xf5d   :  { %v4309_v6 = vrot.slane %v4304_v41, 4  ;;  %v4312_v52 = vsel %vm373_vm9, %v4304_v41, %v4311_v40  ;;  %v4322_v53 = vsel %vm373_vm9, %v4321_v44, %v4296_v24  ;;  %v4069_v12 = vrot.slane %v4064_v54, 4 }
 0xf5e   :  { %v4320_v11 = vperm.slane %v4312_v52, %v6655_v34  ;;  %v4328_v38 = vperm.slane %v4322_v53, %v6655_v34  ;;  %v4339_v15 = vrot.slane %v4332_v32, 4  ;;  %v4072_v28 = vsel %vm373_vm9, %v4064_v54, %v4071_v55 }
 0xf5f   :  { %v4310_v4 = vsel %vm373_vm9, %v4309_v6, %v4292_v49  ;;  %v4070_v58 = vsel %vm373_vm9, %v4069_v12, %v4052_v17  ;;  %v4080_v2 = vperm.slane %v4072_v28, %v6655_v34  ;;  %v4082_v63 = vsel %vm373_vm9, %v4081_v33, %v4056_v48  ;;  %v4282_v37 = vpop.permute.xlu1 %4281  ;;  %v4276_v5 = vpop.permute.xlu0 %4275 }
 0xf60   :  { %v4316_v14 = vperm.slane %v4310_v4, %v6655_v34  ;;  %v4335_v13 = vrot.slane %v4320_v11, 4  ;;  %v4337_v16 = vrot.slane %v4328_v38, 4  ;;  %v4340_v47 = vsel %vm373_vm9, 0.0, %v4339_v15 }
 0xf61   :  { %v4408_v23 = vsel %vm373_vm9, %v4339_v15, %v4328_v38  ;;  %v4413_v35 = vrot.slane %v4340_v47, 4  ;;  %v4076_v3 = vperm.slane %v4070_v58, %v6655_v34  ;;  %v4088_v62 = vperm.slane %v4082_v63, %v6655_v34 }
 0xf62   :  { %v4333_v59 = vrot.slane %v4316_v14, 4  ;;  %v7850_v49 = vsel %vm373_vm9, 0.0, %v4335_v13  ;;  %v4338_v24 = vsel %vm373_vm9, 0.0, %v4337_v16  ;;  %v7854_v9 = vsel %vm373_vm9, %v4335_v13, %v4316_v14 }
 0xf63   :  { %v7857_v46 = vperm.slane %v4408_v23, %v6649_v20  ;;  %v4414_v48 = vsel %vm373_vm9, %v4413_v35, %v4338_v24  ;;  %v4092_v17 = vperm.slane %v4084_v21, %v6655_v34  ;;  %v4402_v51 = vrot.slane %v7850_v49, 4 }
 0xf64   :  { %v7862_v50 = vsel %vm373_vm9, 0.0, %v4333_v59  ;;  %v4093_v18 = vrot.slane %v4076_v3, 4  ;;  %v4095_v61 = vrot.slane %v4080_v2, 4  ;;  %v7866_v10 = vperm.slane %v4414_v48, %v6649_v20 }
 0xf65   :  { %v4097_v7 = vrot.slane %v4088_v62, 4  ;;  %v4099_v40 = vrot.slane %v4092_v17, 4  ;;  %v4353_v57 = vrot.slane %v4282_v37, 4  ;;  %v4433_v19 = vrot.slane %v7857_v46, 4 }
 0xf66   :  { %v7870_v30 = vsel %vm373_vm9, 0.0, %v4093_v18  ;;  %v7873_v31 = vsel %vm373_vm9, 0.0, %v4095_v61  ;;  %v4356_v26 = vsel %vm373_vm9, %v4282_v37, %v4355_v22  ;;  %v7879_v44 = vsel %vm373_vm9, %v4095_v61, %v4076_v3 }
 0xf67   :  { %v4098_v8 = vsel %vm373_vm9, 0.0, %v4097_v7  ;;  %v4100_v41 = vsel %vm373_vm9, 0.0, %v4099_v40  ;;  %v4168_v25 = vsel %vm373_vm9, %v4099_v40, %v4088_v62  ;;  %v4042_v54 = vpop.permute.xlu1 %4041  ;;  %v4354_v33 = vsel %vm373_vm9, %v4353_v57, %v7817_v56  ;;  %v4036_v28 = vpop.permute.xlu0 %4035 }
 0xf68   :  { %v7883_v55 = vperm.slane %v4168_v25, %v6649_v20  ;;  %v4173_v32 = vrot.slane %v4100_v41, 4  ;;  %v4364_v21 = vperm.slane %v4356_v26, %v6649_v20  ;;  %v4360_v22 = vperm.slane %v4354_v33, %v6649_v20 }
 0xf69   :  { %v4341_v6 = vrot.slane %v4276_v5, 4  ;;  %v4344_v52 = vsel %vm373_vm9, %v4276_v5, %v4343_v27  ;;  %v4113_v53 = vrot.slane %v4042_v54, 4  ;;  %v4162_v12 = vrot.slane %v7873_v31, 4 }
 0xf6a   :  { %v4174_v11 = vsel %vm373_vm9, %v4173_v32, %v4098_v8  ;;  %v4377_v38 = vrot.slane %v4364_v21, 4  ;;  %v4352_v15 = vperm.slane %v4344_v52, %v6649_v20  ;;  %v4193_v56 = vrot.slane %v7883_v55, 4 }
 0xf6b   :  { %v4365_v4 = vrot.slane %v4360_v22, 4  ;;  %v4342_v58 = vsel %vm373_vm9, %v4341_v6, %v7795_v39  ;;  %v4114_v2 = vsel %vm373_vm9, %v4113_v53, %v4030_v45  ;;  %v4116_v14 = vsel %vm373_vm9, %v4042_v54, %v4115_v36 }
 0xf6c   :  { %v4348_v63 = vperm.slane %v4342_v58, %v6649_v20  ;;  %v4378_v27 = vsel %vm373_vm9, %v4377_v38, %v4352_v15  ;;  %v4379_v37 = vrot.slane %v4352_v15, 4  ;;  %v4120_v16 = vperm.slane %v4114_v2, %v6649_v20 }
 0xf6d   :  { %v4384_v13 = vperm.slane %v4378_v27, %v6655_v34  ;;  %v4124_v47 = vperm.slane %v4116_v14, %v6649_v20  ;;  %v4101_v5 = vrot.slane %v4036_v28, 4  ;;  %v4104_v45 = vsel %vm373_vm9, %v4036_v28, %v4103_v42 }
 0xf6e   :  { %v4366_v23 = vsel %vm373_vm9, %v4365_v4, %v4348_v63  ;;  %v4367_v35 = vrot.slane %v4348_v63, 4  ;;  %v4380_v39 = vsel %vm373_vm9, %v4364_v21, %v4379_v37  ;;  %v4125_v59 = vrot.slane %v4120_v16, 4 }
 0xf6f   :  { %v4372_v3 = vperm.slane %v4366_v23, %v6655_v34  ;;  %v4388_v62 = vperm.slane %v4380_v39, %v6655_v34  ;;  %v4393_v36 = vrot.slane %v4384_v13, 4  ;;  %v4137_v48 = vrot.slane %v4124_v47, 4 }
 0xf70   :  { %v4368_v24 = vsel %vm373_vm9, %v4360_v22, %v4367_v35  ;;  %v4102_v17 = vsel %vm373_vm9, %v4101_v5, %v7803_v0  ;;  %v4112_v18 = vperm.slane %v4104_v45, %v6649_v20  ;;  %v7917_v61 = vperm.slane %v4174_v11, %v6649_v20 }
 0xf71   :  { %v4376_v7 = vperm.slane %v4368_v24, %v6655_v34  ;;  %v4389_v42 = vrot.slane %v4372_v3, 4  ;;  %v4395_v40 = vrot.slane %v4388_v62, 4  ;;  %v4394_v57 = vsel %vm373_vm9, 0.0, %v4393_v36 }
 0xf72   :  { %v4108_v26 = vperm.slane %v4102_v17, %v6649_v20  ;;  %v4138_v8 = vsel %vm373_vm9, %v4137_v48, %v4112_v18  ;;  %v4139_v41 = vrot.slane %v4112_v18, 4  ;;  %v4401_v32 = vperm.slane %v7854_v9, %v6649_v20 }
 0xf73   :  { %v4391_v25 = vrot.slane %v4376_v7, 4  ;;  %v4396_v54 = vsel %vm373_vm9, 0.0, %v4395_v40  ;;  %v4462_v0 = vsel %vm373_vm9, %v4395_v40, %v4384_v13  ;;  %v7932_v52 = vsel %vm373_vm9, 0.0, %v4389_v42 }
 0xf74   :  { %v7928_v33 = vperm.slane %v4462_v0, %v6649_v20  ;;  %v4467_v21 = vrot.slane %v4396_v54, 4  ;;  %v4126_v22 = vsel %vm373_vm9, %v4125_v59, %v4108_v26  ;;  %v4127_v6 = vrot.slane %v4108_v26, 4 }
 0xf75   :  { %v7935_v53 = vsel %vm373_vm9, 0.0, %v4391_v25  ;;  %v7938_v11 = vperm.slane %v4126_v22, %v6655_v34  ;;  %v4140_v38 = vsel %vm373_vm9, %v4124_v47, %v4139_v41  ;;  %v4451_v9 = vsel %vm373_vm9, %v4391_v25, %v4372_v3 }
 0xf76   :  { %v4456_v15 = vrot.slane %v7935_v53, 4  ;;  %v4468_v28 = vsel %vm373_vm9, %v4467_v21, %v4394_v57  ;;  %v4128_v4 = vsel %vm373_vm9, %v4120_v16, %v4127_v6  ;;  %v4144_v63 = vperm.slane %v4138_v8, %v6655_v34 }
 0xf77   :  { %v7946_v58 = vperm.slane %v4468_v28, %v6649_v20  ;;  %v4136_v2 = vperm.slane %v4128_v4, %v6655_v34  ;;  %v4148_v27 = vperm.slane %v4140_v38, %v6655_v34  ;;  %v4487_v37 = vrot.slane %v7928_v33, 4 }
 0xf78   :  { %v4403_v14 = vsel %vm373_vm9, %v4402_v51, %v7862_v50  ;;  %v4421_v13 = vrot.slane %v4401_v32, 4  ;;  %v4434_v16 = vsel %vm373_vm9, %v7866_v10, %v4433_v19  ;;  %v4149_v47 = vrot.slane %v7938_v11, 4 }
 0xf79   :  { %v4151_v5 = vrot.slane %v4136_v2, 4  ;;  %v4153_v23 = vrot.slane %v4144_v63, 4  ;;  %v4155_v35 = vrot.slane %v4148_v27, 4  ;;  %v4485_v39 = vrot.slane %v7946_v58, 4 }
 0xf7a   :  { %v4407_v45 = vperm.slane %v4403_v14, %v6649_v20  ;;  %v4442_v3 = vperm.slane %v4434_v16, %v6655_v34  ;;  %v4431_v49 = vrot.slane %v7866_v10, 4  ;;  %v4161_v57 = vperm.slane %v7879_v44, %v6649_v20 }
 0xf7b   :  { %v7966_v50 = vsel %vm373_vm9, 0.0, %v4151_v5  ;;  %v4154_v51 = vsel %vm373_vm9, 0.0, %v4153_v23  ;;  %v4156_v19 = vsel %vm373_vm9, 0.0, %v4155_v35  ;;  %v4211_v62 = vsel %vm373_vm9, %v4151_v5, %v7938_v11 }
 0xf7c   :  { %v4216_v36 = vrot.slane %v7966_v50, 4  ;;  %v4222_v59 = vsel %vm373_vm9, %v4155_v35, %v4144_v63  ;;  %v4227_v24 = vrot.slane %v4156_v19, 4  ;;  %v4422_v48 = vsel %vm373_vm9, %v4407_v45, %v4421_v13 }
 0xf7d   :  { %v7976_v17 = vperm.slane %v4222_v59, %v6649_v20  ;;  %v4430_v10 = vperm.slane %v4422_v48, %v6655_v34  ;;  %v4447_v18 = vrot.slane %v4442_v3, 4  ;;  %v4419_v7 = vrot.slane %v4407_v45, 4 }
 0xf7e   :  { %v4228_v42 = vsel %vm373_vm9, %v4227_v24, %v4154_v51  ;;  %v4432_v40 = vsel %vm373_vm9, %v4431_v49, %v7857_v46  ;;  %v4163_v26 = vsel %vm373_vm9, %v4162_v12, %v7870_v30  ;;  %v4181_v12 = vrot.slane %v4161_v57, 4 }
 0xf7f   :  { %v7989_v8 = vperm.slane %v4228_v42, %v6649_v20  ;;  %v4247_v41 = vrot.slane %v7976_v17, 4  ;;  %v4448_v25 = vsel %vm373_vm9, %v4447_v18, %v4430_v10  ;;  %v4420_v54 = vsel %vm373_vm9, %v4419_v7, %v4401_v32 }
 0xf80   :  { %5954 = vmatpush.xpose.msk.msra.mxu1 %vm168_vm0, %v4448_v25  ;;  %v4426_v46 = vperm.slane %v4420_v54, %v6655_v34  ;;  %v4438_v44 = vperm.slane %v4432_v40, %v6655_v34  ;;  %v4449_v0 = vrot.slane %v4430_v10, 4  ;;  %v4167_v31 = vperm.slane %v4163_v26, %v6649_v20 }
 0xf81   :  { %v4245_v30 = vrot.slane %v7989_v8, 4  ;;  %v4194_v21 = vsel %vm373_vm9, %v7917_v61, %v4193_v56  ;;  %v4191_v22 = vrot.slane %v7917_v61, 4  ;;  %v4455_v27 = vperm.slane %v4451_v9, %v6649_v20 }
 0xf82   :  { %v4443_v32 = vrot.slane %v4438_v44, 4  ;;  %v4450_v6 = vsel %vm373_vm9, %v4442_v3, %v4449_v0  ;;  %v4202_v38 = vperm.slane %v4194_v21, %v6655_v34  ;;  %v4445_v28 = vrot.slane %v4426_v46, 4 }
 0xf83   :  { %5956 = vmatpush.xpose.msk.msrb.mxu2 %vm168_vm0, %v4450_v6  ;;  %v4182_v4 = vsel %vm373_vm9, %v4167_v31, %v4181_v12  ;;  %v4179_v2 = vrot.slane %v4167_v31, 4  ;;  %v4192_v63 = vsel %vm373_vm9, %v4191_v22, %v7883_v55  ;;  %v4457_v55 = vsel %vm373_vm9, %v4456_v15, %v7932_v52 }
 0xf84   :  { %v4444_v56 = vsel %vm373_vm9, %v4443_v32, %v4426_v46  ;;  %v4190_v61 = vperm.slane %v4182_v4, %v6655_v34  ;;  %v4207_v14 = vrot.slane %v4202_v38, 4  ;;  %v4446_v13 = vsel %vm373_vm9, %v4438_v44, %v4445_v28 }
 0xf85   :  { %5950 = vmatpush.xpose.msk.msra.mxu0 %vm168_vm0, %v4444_v56  ;;  %v4180_v16 = vsel %vm373_vm9, %v4179_v2, %v4161_v57  ;;  %v4198_v5 = vperm.slane %v4192_v63, %v6655_v34  ;;  %v4475_v23 = vrot.slane %v4455_v27, 4  ;;  %v4461_v3 = vperm.slane %v4457_v55, %v6649_v20 }
 0xf86   :  { %v4208_v9 = vsel %vm373_vm9, %v4207_v14, %v4190_v61  ;;  %v4186_v35 = vperm.slane %v4180_v16, %v6655_v34  ;;  %v4209_v45 = vrot.slane %v4190_v61, 4  ;;  %v4488_v53 = vsel %vm373_vm9, %v7946_v58, %v4487_v37 }
 0xf87   :  { %5955 = vmatmul.msk.f32.vlgmr.msra.gmra.mxu1 %vm168_vm0, %v4208_v9  ;;  %v4203_v49 = vrot.slane %v4198_v5, 4  ;;  %v4486_v52 = vsel %vm373_vm9, %v4485_v39, %v7928_v33  ;;  %v4215_v15 = vperm.slane %v4211_v62, %v6649_v20  ;;  %v4476_v19 = vsel %vm373_vm9, %v4461_v3, %v4475_v23 }
 0xf88   :  { %v4210_v51 = vsel %vm373_vm9, %v4202_v38, %v4209_v45  ;;  %v4496_v59 = vperm.slane %v4488_v53, %v6655_v34  ;;  %v4473_v24 = vrot.slane %v4461_v3, 4  ;;  %v4150_v48 = vsel %vm373_vm9, 0.0, %v4149_v47 }
 0xf89   :  { %5952 = vmatpush.xpose.msk.msrb.mxu0 %vm168_vm0, %v4446_v13  ;;  %v4204_v10 = vsel %vm373_vm9, %v4203_v49, %v4186_v35  ;;  %5957 = vmatmul.msk.f32.vlgmr.msrb.gmra.mxu2 %vm168_vm0, %v4210_v51  ;;  %v4484_v58 = vperm.slane %v4476_v19, %v6655_v34  ;;  %v4492_v33 = vperm.slane %v4486_v52, %v6655_v34  ;;  %v4235_v11 = vrot.slane %v4215_v15, 4 }
 0xf8a   :  { %5951 = vmatmul.msk.f32.vlgmr.msra.gmra.mxu0 %vm168_vm0, %v4204_v10  ;;  %v4501_v37 = vrot.slane %v4496_v59, 4  ;;  %v4474_v39 = vsel %vm373_vm9, %v4473_v24, %v4455_v27  ;;  %v4217_v62 = vsel %vm373_vm9, %v4216_v36, %v4150_v48  ;;  %v4205_v42 = vrot.slane %v4186_v35, 4  ;;  %v8078_v27 = vpop.f32.mrf.mxu3 }
 0xf8b   :  { %v4480_v47 = vperm.slane %v4474_v39, %v6655_v34  ;;  %v4497_v18 = vrot.slane %v4492_v33, 4  ;;  %v4503_v7 = vrot.slane %v4484_v58, 4  ;;  %v4221_v57 = vperm.slane %v4217_v62, %v6649_v20 }
 0xf8c   :  { %v4502_v40 = vsel %vm373_vm9, %v4501_v37, %v4484_v58  ;;  %v4248_v26 = vsel %vm373_vm9, %v7989_v8, %v4247_v41  ;;  %v4246_v25 = vsel %vm373_vm9, %v4245_v30, %v7976_v17  ;;  %v4206_v21 = vsel %vm373_vm9, %v4198_v5, %v4205_v42 }
 0xf8d   :  { %5962 = vmatpush.xpose.msk.msrb.mxu1 %vm168_vm0, %v4502_v40  ;;  %v4498_v50 = vsel %vm373_vm9, %v4497_v18, %v4480_v47  ;;  %v4504_v36 = vsel %vm373_vm9, %v4496_v59, %v4503_v7  ;;  %v4499_v54 = vrot.slane %v4480_v47, 4  ;;  %v4256_v46 = vperm.slane %v4248_v26, %v6655_v34 }
 0xf8e   :  { %5958 = vmatpush.xpose.msk.msra.mxu3 %vm168_vm0, %v4498_v50  ;;  %5964 = vmatpush.xpose.msk.msra.mxu2 %vm168_vm0, %v4504_v36  ;;  %v4236_v44 = vsel %vm373_vm9, %v4221_v57, %v4235_v11  ;;  %v4233_v0 = vrot.slane %v4221_v57, 4  ;;  %v4252_v8 = vperm.slane %v4246_v25, %v6655_v34 }
 0xf8f   :  { %v4500_v17 = vsel %vm373_vm9, %v4492_v33, %v4499_v54  ;;  %v4244_v41 = vperm.slane %v4236_v44, %v6655_v34  ;;  %v4261_v31 = vrot.slane %v4256_v46, 4 }
 0xf90   :  { %5960 = vmatpush.xpose.msk.msra.mxu0 %vm168_vm0, %v4500_v17  ;;  %v4234_v30 = vsel %vm373_vm9, %v4233_v0, %v4215_v15  ;;  %v4257_v12 = vrot.slane %v4252_v8, 4 }
 0xf91   :  { %v4262_v22 = vsel %vm373_vm9, %v4261_v31, %v4244_v41  ;;  %v4240_v32 = vperm.slane %v4234_v30, %v6655_v34  ;;  %v4263_v6 = vrot.slane %v4244_v41, 4 }
 0xf92   :  { %5953 = vmatmul.msk.f32.vlgmr.msrb.gmra.mxu0 %vm168_vm0, %v4206_v21  ;;  %5963 = vmatmul.msk.f32.vlgmr.msrb.gmra.mxu1 %vm168_vm0, %v4262_v22  ;;  %v8089_v9 = vpop.f32.mrf.mxu3 }
 0xf93   :  { %v4258_v38 = vsel %vm373_vm9, %v4257_v12, %v4240_v32  ;;  %v4264_v28 = vsel %vm373_vm9, %v4256_v46, %v4263_v6  ;;  %v4259_v4 = vrot.slane %v4240_v32, 4  ;;  %v6051_v37 = vpack.i.bf16 %v8089_v9, %v8078_v27 }
 0xf94   :  { %5959 = vmatmul.msk.f32.vlgmr.msra.gmra.mxu3 %vm168_vm0, %v4258_v38  ;;  %5965 = vmatmul.msk.f32.vlgmr.msra.gmra.mxu2 %vm168_vm0, %v4264_v28 }
 0xf95   :  { %v4260_v2 = vsel %vm373_vm9, %v4252_v8, %v4259_v4 }
 0xf9a   :  { %5961 = vmatmul.msk.f32.vlgmr.msra.gmra.mxu0 %vm168_vm0, %v4260_v2 }
0x1004   :  { %v4820_v63 = vpop.f32.mrf.mxu1 }
0x1005   :  { %v4955_v56 = vsel %vm6896_vm10, %v4820_v63, -1e+30 }
0x1006   :  { %v4967_v61 = vsel %vm1291_vm11, %v4955_v56, -inf }
0x1007   :  { %v4768_v14 = vpop.f32.mrf.mxu0  ;;  %4968 = vmax.xlane.f32.xlu1 %v4967_v61 }
0x1008   :  { %v4953_v13 = vsel %vm6896_vm10, %v4768_v14, -1e+30 }
0x1009   :  { %v4961_v16 = vsel %vm1291_vm11, %v4953_v13, -inf }
0x100a   :  { %4962 = vmax.xlane.f32.xlu2 %v4961_v16 }
0x100c   :  { %v4846_v5 = vpop.f32.mrf.mxu2 }
0x100d   :  { %v4956_v55 = vsel %vm6896_vm10, %v4846_v5, -1e+30 }
0x100e   :  { %v4970_v23 = vsel %vm1291_vm11, %v4956_v55, -inf }
0x100f   :  { %4971 = vmax.xlane.f32.xlu0 %v4970_v23  ;;  %v4924_v35 = vpop.f32.mrf.mxu1  ;;  %v4794_v3 = vpop.f32.mrf.mxu0 }
0x1010   :  { %v4959_v45 = vsel %vm6896_vm10, %v4924_v35, -1e+30  ;;  %v4954_v53 = vsel %vm6896_vm10, %v4794_v3, -1e+30  ;;  %v4527_v3 = vrot.slane %v8078_v27, 4 }
0x1011   :  { %v4979_v49 = vsel %vm1291_vm11, %v4959_v45, -inf  ;;  %v4964_v59 = vsel %vm1291_vm11, %v4954_v53, -inf }
0x1012   :  { %4980 = vmax.xlane.f32.xlu2 %v4979_v49  ;;  %v4583_v49 = vrot.slane %v8089_v9, 4 }
0x1017   :  { %v4872_v52 = vpop.f32.mrf.mxu3  ;;  %v4950_v51 = vpop.f32.mrf.mxu2 }
0x1018   :  { %v4957_v15 = vsel %vm6896_vm10, %v4872_v52, -1e+30  ;;  %v4960_v19 = vsel %vm6896_vm10, %v4950_v51, -1e+30  ;;  %v4898_v10 = vpop.f32.mrf.mxu0 }
0x1019   :  { %v4973_v24 = vsel %vm1291_vm11, %v4957_v15, -inf  ;;  %v4982_v48 = vsel %vm1291_vm11, %v4960_v19, -inf  ;;  %v4958_v58 = vsel %vm6896_vm10, %v4898_v10, -1e+30 }
0x101a   :  { %4965 = vmax.xlane.f32.xlu2 %v4964_v59  ;;  %4974 = vmax.xlane.f32.xlu0 %v4973_v24  ;;  %v4976_v33 = vsel %vm1291_vm11, %v4958_v58, -inf }
0x101b   :  { %4983 = vmax.xlane.f32.xlu1 %v4982_v48 }
0x1022   :  { %4977 = vmax.xlane.f32.xlu0 %v4976_v33 }
0x1032   :  { %6052 = vrot.lane.b32.xlu2 %v6051_v37, %s6442_s29 }
0x1034   :  { %6047 = vrot.lane.b32.xlu1 %v6051_v37, %s6440_s2 }
0x1036   :  { %6057 = vrot.lane.b32.xlu0 %v6051_v37, %s6441_s28 }
0x107a   :  { %v4969_v39 = vpop.xlane.xlu1 %4968 }
0x107b   :  { %v4987_v62 = vsub.f32 %v4955_v56, %v4969_v39 }
0x107d   :  { %v4997_v11 = vmul.f32 1.442695, %v4987_v62  ;;  %v4963_v47 = vpop.xlane.xlu2 %4962 }
0x107e   :  { %v4985_v18 = vsub.f32 %v4953_v13, %v4963_v47 }
0x107f   :  { %6172 = vpow2.f32 %v4997_v11 }
0x1080   :  { %v4993_v1 = vmul.f32 1.442695, %v4985_v18 }
0x1082   :  { %6174 = vpow2.f32 %v4993_v1  ;;  %v4972_v7 = vpop.xlane.xlu0 %4971 }
0x1083   :  { %v4988_v42 = vsub.f32 %v4956_v55, %v4972_v7 }
0x1085   :  { %v8111_v40 = vpop.eup %6172  ;;  %v4999_v57 = vmul.f32 1.442695, %v4988_v42  ;;  %v4981_v26 = vpop.xlane.xlu2 %4980 }
0x1086   :  { %v5015_v25 = vsel %vm1291_vm11, %v8111_v40, 0.0  ;;  %v4991_v30 = vsub.f32 %v4959_v45, %v4981_v26 }
0x1087   :  { %6176 = vpow2.f32 %v4999_v57  ;;  %5016 = vadd.xlane.f32.xlu2 %v5015_v25 }
0x1088   :  { %v8115_v50 = vpop.eup %6174  ;;  %v5005_v32 = vmul.f32 1.442695, %v4991_v30 }
0x1089   :  { %v5009_v36 = vsel %vm1291_vm11, %v8115_v50, 0.0 }
0x108a   :  { %5010 = vadd.xlane.f32.xlu1 %v5009_v36 }
0x108d   :  { %v8119_v54 = vpop.eup %6176  ;;  %v4966_v46 = vpop.xlane.xlu2 %4965 }
0x108e   :  { %v4975_v44 = vpop.xlane.xlu0 %4974  ;;  %v5018_v0 = vsel %vm1291_vm11, %v8119_v54, 0.0  ;;  %v4984_v8 = vpop.xlane.xlu1 %4983  ;;  %v4986_v17 = vsub.f32 %v4954_v53, %v4966_v46 }
0x108f   :  { %v4989_v41 = vsub.f32 %v4957_v15, %v4975_v44  ;;  %5019 = vadd.xlane.f32.xlu0 %v5018_v0  ;;  %v4992_v31 = vsub.f32 %v4960_v19, %v4984_v8 }
0x1090   :  { %v4995_v12 = vmul.f32 1.442695, %v4986_v17 }
0x1091   :  { %v5001_v21 = vmul.f32 1.442695, %v4989_v41  ;;  %v5007_v22 = vmul.f32 1.442695, %v4992_v31 }
0x1092   :  { %6178 = vpow2.f32 %v4995_v12 }
0x1093   :  { %6180 = vpow2.f32 %v5007_v22 }
0x1094   :  { %6182 = vpow2.f32 %v5001_v21 }
0x1095   :  { %6184 = vpow2.f32 %v5005_v32  ;;  %v6053_v61 = vpop.permute.xlu2 %6052 }
0x1096   :  { %v4978_v6 = vpop.xlane.xlu0 %4977  ;;  %v6055_v16 = vunpack.i.h.bf16 %v6053_v61  ;;  %v6054_v55 = vunpack.i.l.bf16 %v6053_v61 }
0x1097   :  { %v4990_v38 = vsub.f32 %v4958_v58, %v4978_v6 }
0x1098   :  { %v8123_v28 = vpop.eup %6178  ;;  %v4581_v23 = vrot.slane %v6055_v16, 4  ;;  %v4525_v53 = vrot.slane %v6054_v55, 4  ;;  %v4584_v51 = vsel %vm373_vm9, %v6055_v16, %v4583_v49  ;;  %v4528_v19 = vsel %vm373_vm9, %v6054_v55, %v4527_v3 }
0x1099   :  { %v8125_v4 = vpop.eup %6180  ;;  %v5003_v2 = vmul.f32 1.442695, %v4990_v38  ;;  %v5012_v63 = vsel %vm1291_vm11, %v8123_v28, 0.0  ;;  %v4592_v33 = vperm.slane %v4584_v51, %v6649_v20  ;;  %v4536_v37 = vperm.slane %v4528_v19, %v6649_v20 }
0x109a   :  { %v8129_v56 = vpop.eup %6182  ;;  %v5030_v14 = vsel %vm1291_vm11, %v8125_v4, 0.0  ;;  %5013 = vadd.xlane.f32.xlu1 %v5012_v63  ;;  %v4582_v15 = vsel %vm373_vm9, %v4581_v23, %v8089_v9  ;;  %v4526_v24 = vsel %vm373_vm9, %v4525_v53, %v8078_v27 }
0x109b   :  { %5031 = vadd.xlane.f32.xlu2 %v5030_v14  ;;  %6186 = vpow2.f32 %v5003_v2  ;;  %v5021_v13 = vsel %vm1291_vm11, %v8129_v56, 0.0  ;;  %v8135_v5 = vpop.eup %6184  ;;  %v4588_v58 = vperm.slane %v4582_v15, %v6649_v20  ;;  %v4532_v18 = vperm.slane %v4526_v24, %v6649_v20 }
0x109c   :  { %5022 = vadd.xlane.f32.xlu0 %v5021_v13  ;;  %v5027_v35 = vsel %vm1291_vm11, %v8135_v5, 0.0  ;;  %v4619_v57 = vrot.slane %v4592_v33, 4  ;;  %v4563_v46 = vrot.slane %v4536_v37, 4 }
0x109d   :  { %v4607_v36 = vrot.slane %v4588_v58, 4  ;;  %v4551_v30 = vrot.slane %v4532_v18, 4 }
0x10a1   :  { %v8139_v45 = vpop.eup %6186 }
0x10a2   :  { %5028 = vadd.xlane.f32.xlu1 %v5027_v35  ;;  %v5024_v52 = vsel %vm1291_vm11, %v8139_v45, 0.0 }
0x10a4   :  { %5025 = vadd.xlane.f32.xlu0 %v5024_v52 }
0x10a6   :  { %v6048_v59 = vpop.permute.xlu1 %6047 }
0x10a7   :  { %v6050_v48 = vunpack.i.h.bf16 %v6048_v59  ;;  %v6049_v10 = vunpack.i.l.bf16 %v6048_v59 }
0x10a8   :  { %v6058_v39 = vpop.permute.xlu0 %6057 }
0x10a9   :  { %v4595_v62 = vrot.slane %v6050_v48, 4  ;;  %v4539_v9 = vrot.slane %v6049_v10, 4  ;;  %v6060_v11 = vunpack.i.h.bf16 %v6058_v39  ;;  %v6059_v47 = vunpack.i.l.bf16 %v6058_v39 }
0x10ab   :  { %v4593_v1 = vrot.slane %v6060_v11, 4  ;;  %v4596_v7 = vsel %vm373_vm9, %v6060_v11, %v4595_v62  ;;  %v4537_v42 = vrot.slane %v6059_v47, 4  ;;  %v4540_v27 = vsel %vm373_vm9, %v6059_v47, %v4539_v9 }
0x10ac   :  { %v4604_v26 = vperm.slane %v4596_v7, %v6649_v20  ;;  %v4548_v25 = vperm.slane %v4540_v27, %v6649_v20 }
0x10ad   :  { %v4594_v44 = vsel %vm373_vm9, %v4593_v1, %v6050_v48  ;;  %v4538_v0 = vsel %vm373_vm9, %v4537_v42, %v6049_v10 }
0x10ae   :  { %v4600_v8 = vperm.slane %v4594_v44, %v6649_v20  ;;  %v4617_v17 = vrot.slane %v4604_v26, 4  ;;  %v4620_v41 = vsel %vm373_vm9, %v4604_v26, %v4619_v57  ;;  %v4544_v31 = vperm.slane %v4538_v0, %v6649_v20 }
0x10af   :  { %v4628_v12 = vperm.slane %v4620_v41, %v6655_v34  ;;  %v4561_v21 = vrot.slane %v4548_v25, 4  ;;  %v4564_v22 = vsel %vm373_vm9, %v4548_v25, %v4563_v46 }
0x10b0   :  { %v4605_v32 = vrot.slane %v4600_v8, 4  ;;  %v4608_v6 = vsel %vm373_vm9, %v4600_v8, %v4607_v36  ;;  %v4618_v38 = vsel %vm373_vm9, %v4617_v17, %v4592_v33  ;;  %v4549_v2 = vrot.slane %v4544_v31, 4 }
0x10b1   :  { %v4616_v63 = vperm.slane %v4608_v6, %v6655_v34  ;;  %v4624_v61 = vperm.slane %v4618_v38, %v6655_v34  ;;  %v4635_v14 = vrot.slane %v4628_v12, 4  ;;  %v4552_v13 = vsel %vm373_vm9, %v4544_v31, %v4551_v30 }
0x10b2   :  { %v4606_v16 = vsel %vm373_vm9, %v4605_v32, %v4588_v58  ;;  %v4550_v55 = vsel %vm373_vm9, %v4549_v2, %v4532_v18  ;;  %v4560_v23 = vperm.slane %v4552_v13, %v6655_v34  ;;  %v4562_v35 = vsel %vm373_vm9, %v4561_v21, %v4536_v37 }
0x10b3   :  { %v4612_v3 = vperm.slane %v4606_v16, %v6655_v34  ;;  %v4631_v49 = vrot.slane %v4616_v63, 4  ;;  %v4633_v53 = vrot.slane %v4624_v61, 4  ;;  %v4636_v52 = vsel %vm373_vm9, 0.0, %v4635_v14 }
0x10b4   :  { %v4702_v15 = vsel %vm373_vm9, %v4635_v14, %v4624_v61  ;;  %v4707_v51 = vrot.slane %v4636_v52, 4  ;;  %v4556_v19 = vperm.slane %v4550_v55, %v6655_v34  ;;  %v4568_v59 = vperm.slane %v4562_v35, %v6655_v34 }
0x10b5   :  { %v4632_v24 = vsel %vm373_vm9, 0.0, %v4631_v49  ;;  %v4572_v48 = vperm.slane %v4564_v22, %v6655_v34  ;;  %v4575_v10 = vrot.slane %v4560_v23, 4  ;;  %v4629_v58 = vrot.slane %v4612_v3, 4 }
0x10b6   :  { %v4696_v33 = vrot.slane %v4632_v24, 4  ;;  %v4577_v37 = vrot.slane %v4568_v59, 4  ;;  %v4573_v39 = vrot.slane %v4556_v19, 4  ;;  %v4634_v62 = vsel %vm373_vm9, 0.0, %v4633_v53 }
0x10b7   :  { %v4576_v9 = vsel %vm373_vm9, 0.0, %v4575_v10  ;;  %v4579_v11 = vrot.slane %v4572_v48, 4  ;;  %v4637_v47 = vsel %vm373_vm9, %v4575_v10, %v4556_v19  ;;  %v4630_v18 = vsel %vm373_vm9, 0.0, %v4629_v58 }
0x10b8   :  { %v4642_v1 = vrot.slane %v4576_v9, 4  ;;  %v4574_v7 = vsel %vm373_vm9, 0.0, %v4573_v39  ;;  %v4578_v42 = vsel %vm373_vm9, 0.0, %v4577_v37  ;;  %v4641_v27 = vperm.slane %v4637_v47, %v6649_v20 }
0x10b9   :  { %v4580_v57 = vsel %vm373_vm9, 0.0, %v4579_v11  ;;  %v4648_v26 = vsel %vm373_vm9, %v4579_v11, %v4568_v59  ;;  %v4691_v25 = vsel %vm373_vm9, %v4631_v49, %v4612_v3  ;;  %v4697_v36 = vsel %vm373_vm9, %v4696_v33, %v4630_v18 }
0x10ba   :  { %v4653_v46 = vrot.slane %v4580_v57, 4  ;;  %v4643_v44 = vsel %vm373_vm9, %v4642_v1, %v4574_v7  ;;  %v4652_v0 = vperm.slane %v4648_v26, %v6649_v20  ;;  %v4661_v8 = vrot.slane %v4641_v27, 4 }
0x10bb   :  { %v4647_v17 = vperm.slane %v4643_v44, %v6649_v20  ;;  %v4695_v41 = vperm.slane %v4691_v25, %v6649_v20  ;;  %v4701_v31 = vperm.slane %v4697_v36, %v6649_v20  ;;  %v4706_v30 = vperm.slane %v4702_v15, %v6649_v20 }
0x10bc   :  { %v4654_v12 = vsel %vm373_vm9, %v4653_v46, %v4578_v42  ;;  %v4673_v21 = vrot.slane %v4652_v0, 4  ;;  %v4708_v22 = vsel %vm373_vm9, %v4707_v51, %v4634_v62 }
0x10bd   :  { %v4658_v32 = vperm.slane %v4654_v12, %v6649_v20  ;;  %v4662_v6 = vsel %vm373_vm9, %v4647_v17, %v4661_v8  ;;  %v4712_v38 = vperm.slane %v4708_v22, %v6649_v20  ;;  %v4715_v2 = vrot.slane %v4695_v41, 4 }
0x10be   :  { %v4670_v63 = vperm.slane %v4662_v6, %v6655_v34  ;;  %v4727_v61 = vrot.slane %v4706_v30, 4  ;;  %v4659_v14 = vrot.slane %v4647_v17, 4  ;;  %v4713_v13 = vrot.slane %v4701_v31, 4 }
0x10bf   :  { %v4674_v16 = vsel %vm373_vm9, %v4658_v32, %v4673_v21  ;;  %v4716_v55 = vsel %vm373_vm9, %v4701_v31, %v4715_v2  ;;  %v4671_v23 = vrot.slane %v4658_v32, 4  ;;  %v4725_v35 = vrot.slane %v4712_v38, 4 }
0x10c0   :  { %v4682_v3 = vperm.slane %v4674_v16, %v6655_v34  ;;  %v4724_v49 = vperm.slane %v4716_v55, %v6655_v34  ;;  %v4728_v53 = vsel %vm373_vm9, %v4712_v38, %v4727_v61  ;;  %v4660_v52 = vsel %vm373_vm9, %v4659_v14, %v4641_v27 }
0x10c1   :  { %v4736_v15 = vperm.slane %v4728_v53, %v6655_v34  ;;  %v4666_v51 = vperm.slane %v4660_v52, %v6655_v34  ;;  %v4672_v19 = vsel %vm373_vm9, %v4671_v23, %v4652_v0  ;;  %v4689_v59 = vrot.slane %v4670_v63, 4 }
0x10c2   :  { %v4687_v24 = vrot.slane %v4682_v3, 4  ;;  %v4678_v48 = vperm.slane %v4672_v19, %v6655_v34  ;;  %v4714_v10 = vsel %vm373_vm9, %v4713_v13, %v4695_v41  ;;  %v4726_v58 = vsel %vm373_vm9, %v4725_v35, %v4706_v30 }
0x10c3   :  { %v4741_v33 = vrot.slane %v4736_v15, 4  ;;  %v4690_v37 = vsel %vm373_vm9, %v4682_v3, %v4689_v59  ;;  %v4720_v39 = vperm.slane %v4714_v10, %v6655_v34  ;;  %v4732_v62 = vperm.slane %v4726_v58, %v6655_v34 }
0x10c4   :  { %v4688_v9 = vsel %vm373_vm9, %v4687_v24, %v4670_v63  ;;  %v4683_v11 = vrot.slane %v4678_v48, 4  ;;  %5136 = vmatpush.msrb.mxu2 %v4690_v37  ;;  %v4743_v47 = vrot.slane %v4724_v49, 4  ;;  %v4685_v18 = vrot.slane %v4666_v51, 4 }
0x10c5   :  { %5113 = vmatpush.msra.mxu1 %v4688_v9  ;;  %v4742_v1 = vsel %vm373_vm9, %v4741_v33, %v4724_v49  ;;  %v4737_v7 = vrot.slane %v4732_v62, 4  ;;  %v4739_v42 = vrot.slane %v4720_v39, 4 }
0x10c6   :  { %v4684_v27 = vsel %vm373_vm9, %v4683_v11, %v4666_v51  ;;  %v4744_v57 = vsel %vm373_vm9, %v4736_v15, %v4743_v47  ;;  %v4686_v26 = vsel %vm373_vm9, %v4678_v48, %v4685_v18 }
0x10c7   :  { %5205 = vmatpush.msrb.mxu1 %v4742_v1  ;;  %5067 = vmatpush.msrb.mxu3 %v4684_v27  ;;  %v4738_v25 = vsel %vm373_vm9, %v4737_v7, %v4720_v39  ;;  %v4740_v36 = vsel %vm373_vm9, %v4732_v62, %v4739_v42 }
0x10c8   :  { %5228 = vmatpush.msra.mxu2 %v4744_v57  ;;  %5090 = vmatpush.msrb.mxu0 %v4686_v26 }
0x10c9   :  { %5159 = vmatpush.msra.mxu3 %v4738_v25 }
0x10ca   :  { %5182 = vmatpush.msra.mxu0 %v4740_v36 }
0x10fa   :  { %v5017_v46 = vpop.xlane.xlu2 %5016 }
0x10fb   :  { %6188 = vrcp.f32 %v5017_v46 }
0x10fd   :  { %v5011_v44 = vpop.xlane.xlu1 %5010 }
0x10fe   :  { %6190 = vrcp.f32 %v5011_v44 }
0x1101   :  { %v6189_v0 = vpop.eup %6188 }
0x1102   :  { %v5043_v8 = vmul.f32 %v6189_v0, %v8111_v40  ;;  %v5020_v17 = vpop.xlane.xlu0 %5019 }
0x1103   :  { %6192 = vrcp.f32 %v5020_v17 }
0x1104   :  { %v6191_v41 = vpop.eup %6190  ;;  %5968 = vmatmul.msk.f32.vlgmr.msra.gmra.mxu1 %vm1291_vm11, %v5043_v8 }
0x1105   :  { %v5041_v31 = vmul.f32 %v6191_v41, %v8115_v50 }
0x1107   :  { %5966 = vmatmul.msk.f32.vlgmr.msrb.gmra.mxu3 %vm1291_vm11, %v5041_v31 }
0x1109   :  { %v6193_v30 = vpop.eup %6192 }
0x110a   :  { %v5044_v12 = vmul.f32 %v6193_v30, %v8119_v54 }
0x110c   :  { %5969 = vmatmul.msk.f32.vlgmr.msrb.gmra.mxu2 %vm1291_vm11, %v5044_v12 }
0x110d   :  { %v5014_v21 = vpop.xlane.xlu1 %5013 }
0x110e   :  { %6194 = vrcp.f32 %v5014_v21  ;;  %v5032_v22 = vpop.xlane.xlu2 %5031 }
0x110f   :  { %6196 = vrcp.f32 %v5032_v22  ;;  %v5023_v32 = vpop.xlane.xlu0 %5022 }
0x1110   :  { %6198 = vrcp.f32 %v5023_v32 }
0x1114   :  { %v6195_v40 = vpop.eup %6194 }
0x1115   :  { %v6197_v6 = vpop.eup %6196  ;;  %v5042_v38 = vmul.f32 %v6195_v40, %v8123_v28  ;;  %v5029_v2 = vpop.xlane.xlu1 %5028 }
0x1116   :  { %v5048_v50 = vmul.f32 %v6197_v6, %v8125_v4  ;;  %6200 = vrcp.f32 %v5029_v2  ;;  %v6199_v63 = vpop.eup %6198 }
0x1117   :  { %5967 = vmatmul.msk.f32.vlgmr.msrb.gmra.mxu0 %vm1291_vm11, %v5042_v38  ;;  %v5045_v54 = vmul.f32 %v6199_v63, %v8129_v56  ;;  %v5026_v61 = vpop.xlane.xlu0 %5025 }
0x1118   :  { %5973 = vmatmul.msk.f32.vlgmr.msra.gmra.mxu2 %vm1291_vm11, %v5048_v50  ;;  %6202 = vrcp.f32 %v5026_v61 }
0x1119   :  { %5970 = vmatmul.msk.f32.vlgmr.msra.gmra.mxu3 %vm1291_vm11, %v5045_v54 }
0x111c   :  { %v6201_v14 = vpop.eup %6200 }
0x111d   :  { %v5047_v13 = vmul.f32 %v6201_v14, %v8135_v5 }
0x111e   :  { %v6203_v16 = vpop.eup %6202 }
0x111f   :  { %5972 = vmatmul.msk.f32.vlgmr.msrb.gmra.mxu1 %vm1291_vm11, %v5047_v13  ;;  %v5046_v28 = vmul.f32 %v6203_v16, %v8139_v45 }
0x1121   :  { %5971 = vmatmul.msk.f32.vlgmr.msra.gmra.mxu0 %vm1291_vm11, %v5046_v28 }
0x1181   :  { %v5115_v4 = vpop.f32.mrf.mxu1 }
0x1182   :  { %v5233_v23 = vrot.slane %v5115_v4, 4 }
0x118a   :  { %v5069_v55 = vpop.f32.mrf.mxu3 }
0x118b   :  { %v5235_v56 = vrot.slane %v5069_v55, 4  ;;  %v5234_v35 = vsel %vm373_vm9, %v5233_v23, %v5069_v55 }
0x118c   :  { %v5240_v53 = vperm.slane %v5234_v35, %v6649_v20 }
0x118d   :  { %v5236_v49 = vsel %vm373_vm9, %v5115_v4, %v5235_v56 }
0x118e   :  { %v5244_v5 = vperm.slane %v5236_v49, %v6649_v20  ;;  %v5259_v19 = vrot.slane %v5240_v53, 4 }
0x118f   :  { %v5138_v3 = vpop.f32.mrf.mxu2 }
0x1190   :  { %v5245_v52 = vrot.slane %v5138_v3, 4  ;;  %v5271_v48 = vrot.slane %v5244_v5, 4 }
0x1194   :  { %v5092_v15 = vpop.f32.mrf.mxu0 }
0x1195   :  { %v5246_v51 = vsel %vm373_vm9, %v5245_v52, %v5092_v15  ;;  %v5247_v45 = vrot.slane %v5092_v15, 4 }
0x1196   :  { %v5252_v59 = vperm.slane %v5246_v51, %v6649_v20 }
0x1197   :  { %v5248_v24 = vsel %vm373_vm9, %v5138_v3, %v5247_v45 }
0x1198   :  { %v5256_v10 = vperm.slane %v5248_v24, %v6649_v20  ;;  %v5257_v58 = vrot.slane %v5252_v59, 4  ;;  %v5260_v33 = vsel %vm373_vm9, %v5252_v59, %v5259_v19 }
0x1199   :  { %v5268_v37 = vperm.slane %v5260_v33, %v6655_v34 }
0x119a   :  { %v5258_v39 = vsel %vm373_vm9, %v5257_v58, %v5240_v53  ;;  %v5269_v62 = vrot.slane %v5256_v10, 4  ;;  %v5272_v9 = vsel %vm373_vm9, %v5256_v10, %v5271_v48 }
0x119b   :  { %v5264_v11 = vperm.slane %v5258_v39, %v6655_v34  ;;  %v5280_v47 = vperm.slane %v5272_v9, %v6655_v34  ;;  %v5283_v18 = vrot.slane %v5268_v37, 4  ;;  %v5230_v1 = vpop.f32.mrf.mxu2 }
0x119c   :  { %v5270_v7 = vsel %vm373_vm9, %v5269_v62, %v5244_v5  ;;  %v5301_v42 = vrot.slane %v5230_v1, 4  ;;  %v5207_v27 = vpop.f32.mrf.mxu1  ;;  %v5161_v46 = vpop.f32.mrf.mxu3 }
0x119d   :  { %v5276_v57 = vperm.slane %v5270_v7, %v6655_v34  ;;  %v5281_v26 = vrot.slane %v5264_v11, 4  ;;  %v5284_v25 = vsel %vm373_vm9, 0.0, %v5283_v18  ;;  %v5287_v36 = vrot.slane %v5280_v47, 4 }
0x119e   :  { %v5345_v44 = vsel %vm373_vm9, %v5283_v18, %v5264_v11  ;;  %v5350_v0 = vrot.slane %v5284_v25, 4  ;;  %v5291_v8 = vrot.slane %v5161_v46, 4  ;;  %v5289_v17 = vrot.slane %v5207_v27, 4  ;;  %v5184_v21 = vpop.f32.mrf.mxu0 }
0x119f   :  { %v5282_v41 = vsel %vm373_vm9, 0.0, %v5281_v26  ;;  %v5285_v31 = vrot.slane %v5276_v57, 4  ;;  %v5288_v30 = vsel %vm373_vm9, 0.0, %v5287_v36  ;;  %v5349_v12 = vperm.slane %v5345_v44, %v6649_v20 }
0x11a0   :  { %v5361_v22 = vrot.slane %v5288_v30, 4  ;;  %v5302_v32 = vsel %vm373_vm9, %v5301_v42, %v5184_v21  ;;  %v5303_v40 = vrot.slane %v5184_v21, 4  ;;  %v5290_v6 = vsel %vm373_vm9, %v5289_v17, %v5161_v46 }
0x11a1   :  { %v5308_v38 = vperm.slane %v5302_v32, %v6649_v20  ;;  %v5292_v2 = vsel %vm373_vm9, %v5207_v27, %v5291_v8  ;;  %v5296_v50 = vperm.slane %v5290_v6, %v6649_v20  ;;  %v5286_v63 = vsel %vm373_vm9, 0.0, %v5285_v31 }
0x11a2   :  { %v5304_v54 = vsel %vm373_vm9, %v5230_v1, %v5303_v40  ;;  %v5300_v61 = vperm.slane %v5292_v2, %v6649_v20  ;;  %v5351_v14 = vsel %vm373_vm9, %v5350_v0, %v5282_v41  ;;  %v5356_v13 = vsel %vm373_vm9, %v5287_v36, %v5276_v57 }
0x11a3   :  { %v5312_v16 = vperm.slane %v5304_v54, %v6649_v20  ;;  %v5313_v28 = vrot.slane %v5308_v38, 4  ;;  %v5315_v4 = vrot.slane %v5296_v50, 4  ;;  %v5355_v55 = vperm.slane %v5351_v14, %v6649_v20 }
0x11a4   :  { %v5327_v23 = vrot.slane %v5300_v61, 4  ;;  %v5360_v56 = vperm.slane %v5356_v13, %v6649_v20  ;;  %v5362_v35 = vsel %vm373_vm9, %v5361_v22, %v5286_v63  ;;  %v5369_v3 = vrot.slane %v5349_v12, 4 }
0x11a5   :  { %v5325_v49 = vrot.slane %v5312_v16, 4  ;;  %v5314_v53 = vsel %vm373_vm9, %v5313_v28, %v5296_v50  ;;  %v5316_v52 = vsel %vm373_vm9, %v5308_v38, %v5315_v4  ;;  %v5366_v5 = vperm.slane %v5362_v35, %v6649_v20 }
0x11a6   :  { %v5320_v15 = vperm.slane %v5314_v53, %v6655_v34  ;;  %v5324_v51 = vperm.slane %v5316_v52, %v6655_v34  ;;  %v5328_v45 = vsel %vm373_vm9, %v5312_v16, %v5327_v23  ;;  %v5370_v19 = vsel %vm373_vm9, %v5355_v55, %v5369_v3 }
0x11a7   :  { %v5326_v59 = vsel %vm373_vm9, %v5325_v49, %v5300_v61  ;;  %v5336_v24 = vperm.slane %v5328_v45, %v6655_v34  ;;  %v5378_v48 = vperm.slane %v5370_v19, %v6655_v34  ;;  %v5381_v10 = vrot.slane %v5360_v56, 4  ;;  %v5491_v19 = vld [vmem:[#allocation8 + $0xb8] sm:$0xff] }
0x11a8   :  { %v5332_v58 = vperm.slane %v5326_v59, %v6655_v34  ;;  %v5337_v33 = vrot.slane %v5320_v15, 4  ;;  %v5339_v37 = vrot.slane %v5324_v51, 4  ;;  %v5367_v39 = vrot.slane %v5355_v55, 4  ;;  %5506 = vmatpush.msrb.mxu3 %v5491_v19  ;;  %v5490_v59 = vld [vmem:[#allocation8 + $0xb0] sm:$0xff] }
0x11a9   :  { %v5343_v62 = vrot.slane %v5336_v24, 4  ;;  %v5382_v9 = vsel %vm373_vm9, %v5366_v5, %v5381_v10  ;;  %v5397_v11 = vrot.slane %v5378_v48, 4  ;;  %v5379_v47 = vrot.slane %v5366_v5, 4  ;;  %v5488_v24 = vld [vmem:[#allocation8 + $0xa0] sm:$0xff]  ;;  %v5486_v10 = vld [vmem:[#allocation8 + $0x90] sm:$0xff] }
0x11aa   :  { %v5340_v18 = vsel %vm373_vm9, 0.0, %v5339_v37  ;;  %v5341_v1 = vrot.slane %v5332_v58, 4  ;;  %v5390_v7 = vperm.slane %v5382_v9, %v6655_v34  ;;  %v5368_v42 = vsel %vm373_vm9, %v5367_v39, %v5349_v12  ;;  %5507 = vmatpush.msrb.mxu3 %v5490_v59 }
0x11ab   :  { %v5344_v27 = vsel %vm373_vm9, 0.0, %v5343_v62  ;;  %v5410_v57 = vsel %vm373_vm9, %v5343_v62, %v5332_v58  ;;  %v5374_v26 = vperm.slane %v5368_v42, %v6655_v34  ;;  %v5380_v25 = vsel %vm373_vm9, %v5379_v47, %v5360_v56  ;;  %v5485_v58 = vld [vmem:[#allocation8 + $0x88] sm:$0xff] }
0x11ac   :  { %v5342_v36 = vsel %vm373_vm9, 0.0, %v5341_v1  ;;  %v5414_v46 = vperm.slane %v5410_v57, %v6649_v20  ;;  %v5415_v44 = vrot.slane %v5344_v27, 4  ;;  %v5398_v0 = vsel %vm373_vm9, %v5390_v7, %v5397_v11 }
0x11ad   :  { %5471 = vrot.lane.b32.xlu0 %v5398_v0, %s6445_s30  ;;  %v5395_v8 = vrot.slane %v5390_v7, 4  ;;  %v5386_v17 = vperm.slane %v5380_v25, %v6655_v34  ;;  %v5393_v41 = vrot.slane %v5374_v26, 4  ;;  %v5338_v31 = vsel %vm373_vm9, 0.0, %v5337_v33  ;;  %v5484_v33 = vld [vmem:[#allocation8 + $0x80] sm:$0xff] }
0x11ae   :  { %v5416_v30 = vsel %vm373_vm9, %v5415_v44, %v5342_v36  ;;  %v5399_v12 = vsel %vm373_vm9, %v5339_v37, %v5320_v15  ;;  %v5404_v21 = vrot.slane %v5340_v18, 4  ;;  %v5435_v22 = vrot.slane %v5414_v46, 4 }
0x11af   :  { %v5396_v32 = vsel %vm373_vm9, %v5395_v8, %v5378_v48  ;;  %v5391_v40 = vrot.slane %v5386_v17, 4  ;;  %v5394_v6 = vsel %vm373_vm9, %v5386_v17, %v5393_v41  ;;  %v5403_v38 = vperm.slane %v5399_v12, %v6649_v20  ;;  %v5487_v48 = vld [vmem:[#allocation8 + $0x98] sm:$0xff]  ;;  %v5570_v12 = vld [vmem:[#allocation10 + $0xa8] sm:$0xff] }
0x11b0   :  { %5463 = vrot.lane.b32.xlu1 %v5396_v32, %s6446_s16  ;;  %5455 = vrot.lane.b32.xlu2 %v5394_v6, %s6447_s7  ;;  %v5405_v2 = vsel %vm373_vm9, %v5404_v21, %v5338_v31  ;;  %v5420_v50 = vperm.slane %v5416_v30, %v6649_v20  ;;  %v5572_v41 = vld [vmem:[#allocation10 + $0xb8] sm:$0xff]  ;;  %v5609_v30 = vld [vmem:[#allocation13 + $0xb0] sm:$0xff]  ;;  %v5608_v21 = vld [vmem:[#allocation13 + $0xa8] sm:$0xff] }
0x11b1   :  { %v5409_v63 = vperm.slane %v5405_v2, %v6649_v20  ;;  %v5423_v54 = vrot.slane %v5403_v38, 4  ;;  %v5392_v61 = vsel %vm373_vm9, %v5391_v40, %v5374_v26  ;;  %v5610_v31 = vld [vmem:[#allocation13 + $0xb8] sm:$0xff]  ;;  %5587 = vmatpush.msrb.mxu0 %v5572_v41  ;;  %v5567_v6 = vld [vmem:[#allocation10 + $0x90] sm:$0xff]  ;;  %v5566_v2 = vld [vmem:[#allocation10 + $0x88] sm:$0xff] }
0x11b2   :  { %v5436_v14 = vsel %vm373_vm9, %v5420_v50, %v5435_v22  ;;  %v5433_v13 = vrot.slane %v5420_v50, 4  ;;  %5619 = vmatpush.msra.mxu1 %v5610_v31  ;;  %v5607_v22 = vld [vmem:[#allocation13 + $0xa0] sm:$0xff]  ;;  %v5568_v32 = vld [vmem:[#allocation10 + $0x98] sm:$0xff]  ;;  %v5604_v50 = vld [vmem:[#allocation13 + $0x88] sm:$0xff] }
0x11b3   :  { %v5424_v16 = vsel %vm373_vm9, %v5409_v63, %v5423_v54  ;;  %v5444_v28 = vperm.slane %v5436_v14, %v6655_v34  ;;  %v5421_v4 = vrot.slane %v5409_v63, 4  ;;  %v5606_v40 = vld [vmem:[#allocation13 + $0x98] sm:$0xff]  ;;  %v5565_v63 = vld [vmem:[#allocation10 + $0x80] sm:$0xff] }
0x11b4   :  { %v5432_v55 = vperm.slane %v5424_v16, %v6655_v34  ;;  %v5434_v23 = vsel %vm373_vm9, %v5433_v13, %v5414_v46  ;;  %5620 = vmatpush.msra.mxu1 %v5609_v30  ;;  %v5603_v54 = vld [vmem:[#allocation13 + $0x80] sm:$0xff] }
0x11b5   :  { %v5449_v56 = vrot.slane %v5444_v28, 4  ;;  %v5422_v35 = vsel %vm373_vm9, %v5421_v4, %v5403_v38  ;;  %v5440_v20 = vperm.slane %v5434_v23, %v6655_v34  ;;  %v5605_v38 = vld [vmem:[#allocation13 + $0x90] sm:$0xff] }
0x11b6   :  { %v5451_v3 = vrot.slane %v5432_v55, 4  ;;  %v5428_v49 = vperm.slane %v5422_v35, %v6655_v34  ;;  %v5489_v34 = vld [vmem:[#allocation8 + $0xa8] sm:$0xff]  ;;  %5621 = vmatpush.msra.mxu1 %v5608_v21 }
0x11b7   :  { %v5450_v53 = vsel %vm373_vm9, %v5449_v56, %v5432_v55  ;;  %v5445_v52 = vrot.slane %v5440_v20, 4  ;;  %5508 = vmatpush.msrb.mxu3 %v5489_v34 }
0x11b8   :  { %5465 = vrot.lane.b32.xlu0 %v5450_v53, %s6446_s16  ;;  %v5452_v5 = vsel %vm373_vm9, %v5444_v28, %v5451_v3  ;;  %v5447_v15 = vrot.slane %v5428_v49, 4  ;;  %5622 = vmatpush.msra.mxu1 %v5607_v22 }
0x11b9   :  { %5473 = vrot.lane.b32.xlu1 %v5452_v5, %s6445_s30  ;;  %v5446_v51 = vsel %vm373_vm9, %v5445_v52, %v5428_v49  ;;  %5509 = vmatpush.msrb.mxu3 %v5488_v24  ;;  %v6067_v52 = vld [vmem:[%s8412_s4 + $0x2] ss:$0 sm:$0xff] }
0x11ba   :  { %v5448_v45 = vsel %vm373_vm9, %v5440_v20, %v5447_v15  ;;  %5623 = vmatpush.msra.mxu1 %v5606_v40 }
0x11bb   :  { %5457 = vrot.lane.b32.xlu2 %v5448_v45, %s6447_s7  ;;  %5510 = vmatpush.msrb.mxu3 %v5487_v48 }
0x11bc   :  { %5624 = vmatpush.msra.mxu1 %v5605_v38 }
0x11bd   :  { %5511 = vmatpush.msrb.mxu3 %v5486_v10 }
0x11be   :  { %5625 = vmatpush.msra.mxu1 %v5604_v50 }
0x11bf   :  { %5512 = vmatpush.msrb.mxu3 %v5485_v58  ;;  %v5684_v58 = vld [vmem:[#allocation11 + $0xb8] sm:$0xff] }
0x11c0   :  { %5626 = vmatpush.msra.mxu1 %v5603_v54  ;;  %5699 = vmatpush.msrb.mxu2 %v5684_v58 }
0x11c1   :  { %5513 = vmatpush.msrb.mxu3 %v5484_v33  ;;  %v5683_v33 = vld [vmem:[#allocation11 + $0xb0] sm:$0xff] }
0x11c2   :  { %5700 = vmatpush.msrb.mxu2 %v5683_v33 }
0x120a   :  { %v5456_v37 = vpop.permute.xlu2 %5455 }
0x120b   :  { %v5477_v39 = vsel %vm168_vm0, %v5392_v61, %v5456_v37  ;;  %v5682_v37 = vld [vmem:[#allocation11 + $0xa8] sm:$0xff] }
0x120c   :  { %5701 = vmatpush.msrb.mxu2 %v5682_v37 }
0x1215   :  { %v5458_v18 = vpop.permute.xlu2 %5457 }
0x1216   :  { %v5478_v1 = vsel %vm168_vm0, %v5446_v51, %v5458_v18 }
0x121f   :  { %v5472_v62 = vpop.permute.xlu0 %5471 }
0x1222   :  { %v5464_v9 = vpop.permute.xlu1 %5463 }
0x1223   :  { %v5479_v11 = vsel %vm1810_vm12, %v5477_v39, %v5464_v9  ;;  %v5681_v39 = vld [vmem:[#allocation11 + $0xa0] sm:$0xff]  ;;  %v5679_v9 = vld [vmem:[#allocation11 + $0x90] sm:$0xff] }
0x1224   :  { %v5481_v47 = vsel %vm1813_vm13, %v5479_v11, %v5472_v62  ;;  %5702 = vmatpush.msrb.mxu2 %v5681_v39  ;;  %v5680_v62 = vld [vmem:[#allocation11 + $0x98] sm:$0xff] }
0x1225   :  { %5974 = vmatmul.msk.f32.vlgmr.msrb.gmra.mxu3 %vm206_vm1, %v5481_v47  ;;  %v5678_v47 = vld [vmem:[#allocation11 + $0x88] sm:$0xff] }
0x1226   :  { %5703 = vmatpush.msrb.mxu2 %v5680_v62 }
0x1228   :  { %5704 = vmatpush.msrb.mxu2 %v5679_v9 }
0x122a   :  { %v5466_v7 = vpop.permute.xlu0 %5465  ;;  %5705 = vmatpush.msrb.mxu2 %v5678_v47 }
0x122b   :  { %v5480_v42 = vsel %vm1810_vm12, %v5478_v1, %v5466_v7  ;;  %v5474_v27 = vpop.permute.xlu1 %5473  ;;  %v5677_v1 = vld [vmem:[#allocation11 + $0x80] sm:$0xff] }
0x122c   :  { %v5482_v57 = vsel %vm1813_vm13, %v5480_v42, %v5474_v27  ;;  %5706 = vmatpush.msrb.mxu2 %v5677_v1  ;;  %v6068_v1 = vld [vmem:[%s8420_s12] ss:$0 sm:$0xff] }
0x122d   :  { %5975 = vmatmul.msk.f32.gmra.mxu3 %vm206_vm1, %v5482_v57 }
0x12a8   :  { %v5515_v26 = vpop.f32.mrf.mxu3 }
0x12a9   :  { %v8338_v25 = vadd.f32 %v5515_v26, %v7765_v60  ;;  %v5571_v60 = vld [vmem:[#allocation10 + $0xb0] sm:$0xff] }
0x12aa   :  { %5588 = vmatpush.msrb.mxu0 %v5571_v60 }
0x12ab   :  { %v5525_v36 = vmul.f32 %v8338_v25, %v8338_v25 }
0x12ac   :  { %5589 = vmatpush.msrb.mxu0 %v5570_v12 }
0x12ad   :  { %v5527_v46 = vsel %vm206_vm1, %v5525_v36, 0.0 }
0x12ae   :  { %5528 = vadd.xlane.f32.xlu2 %v5527_v46 }
0x12b0   :  { %v5518_v44 = vpop.f32.mrf.mxu3 }
0x12b1   :  { %v8344_v0 = vadd.f32 %v5518_v44, %v7771_v29  ;;  %v5569_v29 = vld [vmem:[#allocation10 + $0xa0] sm:$0xff] }
0x12b2   :  { %5590 = vmatpush.msrb.mxu0 %v5569_v29 }
0x12b3   :  { %v5526_v8 = vmul.f32 %v8344_v0, %v8344_v0 }
0x12b4   :  { %5591 = vmatpush.msrb.mxu0 %v5568_v32 }
0x12b5   :  { %v5530_v17 = vsel %vm206_vm1, %v5526_v8, 0.0 }
0x12b6   :  { %5531 = vadd.xlane.f32.xlu0 %v5530_v17  ;;  %5592 = vmatpush.msrb.mxu0 %v5567_v6 }
0x12b8   :  { %5593 = vmatpush.msrb.mxu0 %v5566_v2 }
0x12ba   :  { %5594 = vmatpush.msrb.mxu0 %v5565_v63 }
0x1321   :  { %v5529_v61 = vpop.xlane.xlu2 %5528 }
0x1322   :  { %v5533_v14 = vmul.f32 %v5529_v61, %v6605_v43 }
0x1324   :  { %v5535_v13 = vadd.f32 1e-06, %v5533_v14 }
0x1326   :  { %6204 = vrsqrt.f32 %v5535_v13  ;;  %vm5543_vm9 = vweird.f32 %v5535_v13 }
0x1329   :  { %v5532_v16 = vpop.xlane.xlu0 %5531 }
0x132a   :  { %v5534_v28 = vmul.f32 %v5532_v16, %v6605_v43 }
0x132c   :  { %v6205_v4 = vpop.eup %6204  ;;  %v5536_v55 = vadd.f32 1e-06, %v5534_v28 }
0x132d   :  { %v5538_v23 = vmul.f32 %v6205_v4, %v5535_v13  ;;  %vm5544_vm0 = vweird.f32 %v6205_v4 }
0x132e   :  { %6206 = vrsqrt.f32 %v5536_v55  ;;  %vm5545_vm10 = vmor %vm5543_vm9, %vm5544_vm0  ;;  %vm5553_vm13 = vweird.f32 %v5536_v55 }
0x132f   :  { %v5539_v56 = vmul.f32 %v6205_v4, %v5538_v23 }
0x1331   :  { %v5540_v35 = vmul.f32 0.5, %v5539_v56 }
0x1333   :  { %v5541_v20 = vsub.f32 1.5, %v5540_v35 }
0x1334   :  { %v6207_v3 = vpop.eup %6206 }
0x1335   :  { %v5542_v49 = vmul.f32 %v6205_v4, %v5541_v20  ;;  %v5548_v53 = vmul.f32 %v6207_v3, %v5536_v55  ;;  %vm5554_vm11 = vweird.f32 %v6207_v3 }
0x1336   :  { %vm5555_vm4 = vmor %vm5553_vm13, %vm5554_vm11 }
0x1337   :  { %v5546_v5 = vsel %vm5545_vm10, %v6205_v4, %v5542_v49  ;;  %v5549_v15 = vmul.f32 %v6207_v3, %v5548_v53 }
0x1338   :  { %v5557_v51 = vmul.f32 %v5546_v5, %v8338_v25  ;;  %v5761_v5 = vld [vmem:[%s8421_s13 + $0x28] sm:$0xff] }
0x1339   :  { %v5550_v45 = vmul.f32 0.5, %v5549_v15  ;;  %v5759_v15 = vld [vmem:[%s8421_s13 + $0x18] sm:$0xff] }
0x133a   :  { %v5562_v19 = vmul.f32 %v6067_v52, %v5557_v51  ;;  %v5758_v51 = vld [vmem:[%s8421_s13 + $0x10] sm:$0xff] }
0x133b   :  { %v5551_v59 = vsub.f32 1.5, %v5550_v45  ;;  %v5757_v45 = vld [vmem:[%s8421_s13 + $0x8] sm:$0xff] }
0x133c   :  { %5977 = vmatmul.msk.f32.vlgmr.msrb.gmra.mxu0 %vm206_vm1, %v5562_v19  ;;  %5979 = vmatmul.msk.f32.vlgmr.msra.gmra.mxu1 %vm206_vm1, %v5562_v19  ;;  %v5756_v19 = vld [vmem:[%s8421_s13] sm:$0xff] }
0x133d   :  { %v5552_v34 = vmul.f32 %v6207_v3, %v5551_v59 }
0x133f   :  { %v5556_v24 = vsel %vm5555_vm4, %v6207_v3, %v5552_v34 }
0x1340   :  { %v5558_v48 = vmul.f32 %v5556_v24, %v8344_v0 }
0x1342   :  { %v5563_v10 = vmul.f32 %v6067_v52, %v5558_v48  ;;  %v5763_v52 = vld [vmem:[%s8421_s13 + $0x38] sm:$0xff] }
0x1343   :  { %5782 = vmatpush.msra.mxu3 %v5763_v52 }
0x1344   :  { %5978 = vmatmul.msk.f32.gmra.mxu0 %vm206_vm1, %v5563_v10  ;;  %5980 = vmatmul.msk.f32.gmra.mxu1 %vm206_vm1, %v5563_v10 }
0x13b9   :  { %v5596_v11 = vpop.f32.mrf.mxu0  ;;  %v5628_v32 = vpop.f32.mrf.mxu1 }
0x13ba   :  { %v5981_v18 = vmul.f32 -1.442695, %v5596_v11 }
0x13bc   :  { %6208 = vpow2.f32 %v5981_v18 }
0x13c1   :  { %v5599_v7 = vpop.f32.mrf.mxu0  ;;  %v5631_v28 = vpop.f32.mrf.mxu1 }
0x13c2   :  { %v6209_v42 = vpop.eup %6208  ;;  %v5982_v27 = vmul.f32 -1.442695, %v5599_v7 }
0x13c3   :  { %v5640_v57 = vadd.f32 1.0, %v6209_v42 }
0x13c4   :  { %6210 = vpow2.f32 %v5982_v27 }
0x13c5   :  { %6212 = vrcp.f32 %v5640_v57  ;;  %v5653_v17 = vand.u32 2147483648, %v5640_v57  ;;  %v5651_v31 = vand.u32 2147483647, %v5640_v57  ;;  %vm5647_vm6 = vweird.f32 %v5640_v57 }
0x13c7   :  { %v5654_v12 = vor.u32 1.1754944e-38, %v5653_v17  ;;  %vm5652_vm8 = vcmp.eq.f32.partialorder %v5651_v31, 8.507059e+37  ;;  %v6069_v17 = vld [vmem:[%s8422_s14] ss:$0 sm:$0xff]  ;;  %s6448_s14 = smov [#allocation14]  }
0x13c8   :  { %s5841_s9 = sshll.u32 %s6448_s14, 4  ;;  %s5842_s9 = int_to_ptr.vmem [resolvable:$true] %s5841_s9 }
0x13ca   :  { %v6211_v26 = vpop.eup %6210 }
0x13cb   :  { %v6213_v36 = vpop.eup %6212  ;;  %v5641_v46 = vadd.f32 1.0, %v6211_v26 }
0x13cc   :  { %v5643_v44 = vmul.f32 %v6213_v36, %v5640_v57  ;;  %vm5648_vm5 = vweird.f32 %v6213_v36 }
0x13cd   :  { %6214 = vrcp.f32 %v5641_v46  ;;  %vm5649_vm7 = vmor %vm5647_vm6, %vm5648_vm5  ;;  %v5668_v38 = vand.u32 2147483648, %v5641_v46  ;;  %v5666_v63 = vand.u32 2147483647, %v5641_v46  ;;  %vm5662_vm15 = vweird.f32 %v5641_v46 }
0x13ce   :  { %v5644_v8 = vsub.f32 1.0, %v5643_v44 }
0x13cf   :  { %v5669_v61 = vor.u32 1.1754944e-38, %v5668_v38  ;;  %vm5667_vm3 = vcmp.eq.f32.partialorder %v5666_v63, 8.507059e+37 }
0x13d0   :  { %v5645_v41 = vmul.f32 %v6213_v36, %v5644_v8 }
0x13d2   :  { %v5646_v60 = vadd.f32 %v6213_v36, %v5645_v41 }
0x13d3   :  { %v6215_v30 = vpop.eup %6214 }
0x13d4   :  { %v5650_v21 = vsel %vm5649_vm7, %v6213_v36, %v5646_v60  ;;  %v5658_v29 = vmul.f32 %v6215_v30, %v5641_v46  ;;  %vm5663_vm14 = vweird.f32 %v6215_v30 }
0x13d5   :  { %v5655_v22 = vsel %vm5652_vm8, %v5654_v12, %v5650_v21  ;;  %vm5664_vm2 = vmor %vm5662_vm15, %vm5663_vm14 }
0x13d6   :  { %v5672_v40 = vmul.f32 %v5655_v22, %v5596_v11  ;;  %v5659_v6 = vsub.f32 1.0, %v5658_v29 }
0x13d8   :  { %v5674_v2 = vmul.f32 %v5672_v40, %v5628_v32  ;;  %v5660_v50 = vmul.f32 %v6215_v30, %v5659_v6 }
0x13da   :  { %v5661_v54 = vadd.f32 %v6215_v30, %v5660_v50  ;;  %5983 = vmatmul.msk.f32.vlgmr.msrb.gmra.mxu2 %vm206_vm1, %v5674_v2 }
0x13dc   :  { %v5665_v14 = vsel %vm5664_vm2, %v6215_v30, %v5661_v54 }
0x13dd   :  { %v5670_v13 = vsel %vm5667_vm3, %v5669_v61, %v5665_v14 }
0x13de   :  { %v5673_v16 = vmul.f32 %v5670_v13, %v5599_v7 }
0x13e0   :  { %v5675_v4 = vmul.f32 %v5673_v16, %v5631_v28 }
0x13e2   :  { %5984 = vmatmul.msk.f32.gmra.mxu2 %vm206_vm1, %v5675_v4 }
0x145d   :  { %v5708_v55 = vpop.f32.mrf.mxu2 }
0x145e   :  { %v5714_v23 = vadd.f32 %v5708_v55, %v8338_v25  ;;  %v5762_v25 = vld [vmem:[%s8421_s13 + $0x30] sm:$0xff] }
0x145f   :  { %5783 = vmatpush.msra.mxu3 %v5762_v25 }
0x1460   :  { %v5717_v56 = vmul.f32 %v5714_v23, %v5714_v23 }
0x1461   :  { %5784 = vmatpush.msra.mxu3 %v5761_v5 }
0x1462   :  { %v5719_v35 = vsel %vm206_vm1, %v5717_v56, 0.0 }
0x1463   :  { %5720 = vadd.xlane.f32.xlu1 %v5719_v35 }
0x1465   :  { %v5711_v20 = vpop.f32.mrf.mxu2 }
0x1466   :  { %v5715_v3 = vadd.f32 %v5711_v20, %v8344_v0  ;;  %v5760_v0 = vld [vmem:[%s8421_s13 + $0x20] sm:$0xff] }
0x1467   :  { %5785 = vmatpush.msra.mxu3 %v5760_v0 }
0x1468   :  { %v5718_v49 = vmul.f32 %v5715_v3, %v5715_v3 }
0x1469   :  { %5786 = vmatpush.msra.mxu3 %v5759_v15 }
0x146a   :  { %v5722_v53 = vsel %vm206_vm1, %v5718_v49, 0.0 }
0x146b   :  { %5723 = vadd.xlane.f32.xlu2 %v5722_v53  ;;  %5787 = vmatpush.msra.mxu3 %v5758_v51 }
0x146d   :  { %5788 = vmatpush.msra.mxu3 %v5757_v45 }
0x146f   :  { %5789 = vmatpush.msra.mxu3 %v5756_v19 }
0x14d6   :  { %v5721_v59 = vpop.xlane.xlu1 %5720 }
0x14d7   :  { %v5725_v34 = vmul.f32 %v5721_v59, %v6605_v43 }
0x14d9   :  { %v5727_v24 = vadd.f32 1e-06, %v5725_v34 }
0x14db   :  { %6216 = vrsqrt.f32 %v5727_v24  ;;  %vm5735_vm9 = vweird.f32 %v5727_v24 }
0x14de   :  { %v5724_v48 = vpop.xlane.xlu2 %5723 }
0x14df   :  { %v5726_v10 = vmul.f32 %v5724_v48, %v6605_v43 }
0x14e1   :  { %v6217_v58 = vpop.eup %6216  ;;  %v5728_v33 = vadd.f32 1e-06, %v5726_v10 }
0x14e2   :  { %v5730_v37 = vmul.f32 %v6217_v58, %v5727_v24  ;;  %vm5736_vm0 = vweird.f32 %v6217_v58 }
0x14e3   :  { %6218 = vrsqrt.f32 %v5728_v33  ;;  %vm5737_vm10 = vmor %vm5735_vm9, %vm5736_vm0  ;;  %vm5745_vm13 = vweird.f32 %v5728_v33 }
0x14e4   :  { %v5731_v39 = vmul.f32 %v6217_v58, %v5730_v37 }
0x14e6   :  { %v5732_v62 = vmul.f32 0.5, %v5731_v39 }
0x14e8   :  { %v5733_v9 = vsub.f32 1.5, %v5732_v62 }
0x14e9   :  { %v6219_v11 = vpop.eup %6218 }
0x14ea   :  { %v5734_v47 = vmul.f32 %v6217_v58, %v5733_v9  ;;  %v5740_v18 = vmul.f32 %v6219_v11, %v5728_v33  ;;  %vm5746_vm11 = vweird.f32 %v6219_v11 }
0x14eb   :  { %vm5747_vm4 = vmor %vm5745_vm13, %vm5746_vm11 }
0x14ec   :  { %v5738_v7 = vsel %vm5737_vm10, %v6217_v58, %v5734_v47  ;;  %v5741_v42 = vmul.f32 %v6219_v11, %v5740_v18 }
0x14ed   :  { %v5749_v43 = vmul.f32 %v5738_v7, %v5714_v23 }
0x14ee   :  { %v5742_v27 = vmul.f32 0.5, %v5741_v42 }
0x14ef   :  { %v5754_v57 = vmul.f32 %v6068_v1, %v5749_v43 }
0x14f0   :  { %v5743_v26 = vsub.f32 1.5, %v5742_v27 }
0x14f1   :  { %5985 = vmatmul.msk.f32.vlgmr.msra.gmra.mxu3 %vm206_vm1, %v5754_v57 }
0x14f2   :  { %v5744_v36 = vmul.f32 %v6219_v11, %v5743_v26 }
0x14f4   :  { %v5748_v46 = vsel %vm5747_vm4, %v6219_v11, %v5744_v36 }
0x14f5   :  { %v5750_v44 = vmul.f32 %v5748_v46, %v5715_v3 }
0x14f7   :  { %v5755_v8 = vmul.f32 %v6068_v1, %v5750_v44 }
0x14f9   :  { %5986 = vmatmul.msk.f32.gmra.mxu3 %vm206_vm1, %v5755_v8 }
0x1574   :  { %v5791_v41 = vpop.f32.mrf.mxu3 }
0x1575   :  { %v5792_v31 = vadd.f32 %v6069_v17, %v5791_v41 }
0x1577   :  { %v5987_v60 = vmul.f32 -1.442695, %v5792_v31 }
0x1579   :  { %6220 = vpow2.f32 %v5987_v60 }
0x157c   :  { %v5794_v30 = vpop.f32.mrf.mxu3 }
0x157d   :  { %v5795_v12 = vadd.f32 %v6069_v17, %v5794_v30 }
0x157f   :  { %v6221_v21 = vpop.eup %6220  ;;  %v5988_v29 = vmul.f32 -1.442695, %v5795_v12 }
0x1580   :  { %v5803_v22 = vadd.f32 1.0, %v6221_v21 }
0x1581   :  { %6222 = vpow2.f32 %v5988_v29 }
0x1582   :  { %6224 = vrcp.f32 %v5803_v22  ;;  %v5816_v50 = vand.u32 2147483648, %v5803_v22  ;;  %v5814_v54 = vand.u32 2147483647, %v5803_v22  ;;  %vm5810_vm5 = vweird.f32 %v5803_v22 }
0x1584   :  { %v5817_v13 = vor.u32 1.1754944e-38, %v5816_v50  ;;  %vm5815_vm7 = vcmp.eq.f32.partialorder %v5814_v54, 8.507059e+37 }
0x1587   :  { %v6223_v32 = vpop.eup %6222 }
0x1588   :  { %v6225_v40 = vpop.eup %6224  ;;  %v5804_v6 = vadd.f32 1.0, %v6223_v32 }
0x1589   :  { %v5806_v38 = vmul.f32 %v6225_v40, %v5803_v22  ;;  %vm5811_vm1 = vweird.f32 %v6225_v40 }
0x158a   :  { %6226 = vrcp.f32 %v5804_v6  ;;  %vm5812_vm6 = vmor %vm5810_vm5, %vm5811_vm1  ;;  %v5831_v23 = vand.u32 2147483648, %v5804_v6  ;;  %v5829_v35 = vand.u32 2147483647, %v5804_v6  ;;  %vm5825_vm14 = vweird.f32 %v5804_v6 }
0x158b   :  { %v5807_v2 = vsub.f32 1.0, %v5806_v38 }
0x158c   :  { %v5832_v3 = vor.u32 1.1754944e-38, %v5831_v23  ;;  %vm5830_vm2 = vcmp.eq.f32.partialorder %v5829_v35, 8.507059e+37 }
0x158d   :  { %v5808_v63 = vmul.f32 %v6225_v40, %v5807_v2 }
0x158f   :  { %v5809_v61 = vadd.f32 %v6225_v40, %v5808_v63 }
0x1590   :  { %v6227_v14 = vpop.eup %6226 }
0x1591   :  { %v5821_v16 = vmul.f32 %v6227_v14, %v5804_v6  ;;  %v5813_v28 = vsel %vm5812_vm6, %v6225_v40, %v5809_v61  ;;  %vm5826_vm8 = vweird.f32 %v6227_v14 }
0x1592   :  { %v5818_v4 = vsel %vm5815_vm7, %v5817_v13, %v5813_v28  ;;  %vm5827_vm15 = vmor %vm5825_vm14, %vm5826_vm8 }
0x1593   :  { %v5822_v55 = vsub.f32 1.0, %v5821_v16  ;;  %5835 = vst.msk [vmem:[#allocation14] sm:$0xff] %vm1810_vm12, %v5818_v4 }
0x1595   :  { %v5823_v56 = vmul.f32 %v6227_v14, %v5822_v55 }
0x1597   :  { %v5824_v20 = vadd.f32 %v6227_v14, %v5823_v56 }
0x1599   :  { %v5828_v49 = vsel %vm5827_vm15, %v6227_v14, %v5824_v20 }
0x159a   :  { %v5833_v53 = vsel %vm5830_vm2, %v5832_v3, %v5828_v49 }
0x159b   :  { %5836 = vst.msk [vmem:[#allocation14 + $0x8] sm:$0xff] %vm1810_vm12, %v5833_v53 }
0x159c   :  { %5849 = dma.vmem_to_hbm [thread:$0]  %s5842_s9, 256, %s5844_s19, [#allocation4], %s6431_s26, %s6431_s26, %s6432_s27  }
0x159d   :  { %6428 = dma.done.wait [#allocation4], 256  }
0x159e   :  { %6429 = vsyncadd [#allocation4], 4294967040 }
0x159f   :  { %5854 = vsyncpa [#allocation3], 1 }
0x15a0   :  { %5855 = vsyncpa [#allocation6], 1 }
0x15a1   :  { %5856 = vsyncpa [#allocation9], 1 }
0x15a2   :  { %5857 = vsyncpa [#allocation12], 1 }
0x15a3   :  { %5858 = vsyncpa [#allocation4], 1 }

</bundles_post_ra>
